<compile_context>
chip_gen: v5e
topology: v5e:2x2
jax: 0.10.0
libtpu: 0.0.40
codegen_flags: <defaults>
</compile_context>

<pallas_src>
import functools

import jax
import jax.numpy as jnp
from jax import lax
from jax.experimental import pallas as pl
from jax.experimental.pallas import tpu as pltpu

_STORE_DTYPE = jnp.bfloat16   # storage / MXU-input dtype (x, W_ih, W_hh, seq, gates)
_ACC_DTYPE = jnp.float32      # gate math, cell state, h carry (f32 on all generations)
_LANE = 128
_TIME_CHUNK_BYTES = 6 << 20   # budget per hoisted-gate chunk buffer (2 buffers total)


# ----------------------------------------------------------------------------
# Fused kernel
# ----------------------------------------------------------------------------
def _fused_lstm_kernel(num_layers, seq_len, batch, time_chunk, x_ref, *refs):
    """Fused multi-layer LSTM + BatchNorm1d(eval) + Dropout(identity) + Linear.

    x_ref   : (T, Bc, Din) bf16, time-major batch chunk.
    per-layer refs: w_ih_t (Din_l, 4*Hp) bf16, w_hh_t (Hp, 4*Hp) bf16, b (1, 4*Hp) f32.
    head refs: gamma/beta/rm/rv (1, Hp) f32, w_fc_t (Hp, Op) f32, b_fc (1, Op) f32.
    init: h0 / c0 (L, Bc, Hp) f32.
    outputs: out (Bc, Op) f32, h_n / c_n (L, Bc, Hp) f32.
    scratch: seq_scr (T, Bc, Hp) bf16 inter-layer hidden sequence,
             gbuf0/gbuf1 (TC, Bc, 4*Hp) bf16 alternating hoisted-gate chunk buffers.
    """
    L, T, Bc, TC = num_layers, seq_len, batch, time_chunk
    n_in = 3 * L + 8
    in_refs = refs[:n_in]
    out_ref, hT_ref, cT_ref = refs[n_in:n_in + 3]
    seq_scr, gbuf0, gbuf1 = refs[n_in + 3:n_in + 6]

    wih_refs = in_refs[0:L]
    whh_refs = in_refs[L:2 * L]
    b_refs = in_refs[2 * L:3 * L]
    (gamma_ref, beta_ref, rm_ref, rv_ref,
     wfc_ref, bfc_ref, h0_ref, c0_ref) = in_refs[3 * L:]

    Hp = h0_ref.shape[-1]                       # lane-padded hidden size (multiple of 128)
    n_chunks = -(-T // TC)
    gbufs = (gbuf0, gbuf1)

    h = None
    for l in range(L):
        wih = wih_refs[l][...]                  # bf16 (Din_l, 4*Hp)
        whh = whh_refs[l][...]                  # bf16 (Hp, 4*Hp)
        b = b_refs[l][...]                      # f32  (1, 4*Hp)
        write_seq = l < L - 1                   # top layer's per-step outputs are unused

        def compute_gates(c, buf, layer=l, wih=wih, b=b):
            # Hoisted input projection for time chunk c: ONE MXU matmul per chunk, off
            # the serial critical path.  Result stored lane-dense in bf16.
            t0 = c * TC
            steps = min(TC, T - t0)
            if layer == 0:
                xc = x_ref[pl.ds(t0, steps)]                 # (steps, Bc, Din) bf16
            else:
                xc = seq_scr[pl.ds(t0, steps)]               # (steps, Bc, Hp) bf16
            x2 = xc.reshape(steps * Bc, xc.shape[-1])
            g = jnp.dot(x2, wih, preferred_element_type=jnp.float32) + b
            buf[pl.ds(0, steps)] = g.reshape(steps, Bc, 4 * Hp).astype(buf.dtype)

        compute_gates(0, gbufs[0])

        h = h0_ref[l].astype(_ACC_DTYPE)        # (Bc, Hp) f32 carries
        c_st = c0_ref[l].astype(_ACC_DTYPE)

        for c in range(n_chunks):
            # Prefetch chunk c+1's gates before consuming chunk c (different buffer, no
            # data dependence on this chunk's recurrence) so the big MXU matmul can hide
            # under the latency-bound step loop.
            if c + 1 < n_chunks:
                compute_gates(c + 1, gbufs[(c + 1) % 2])
            buf = gbufs[c % 2]
            t0 = c * TC
            steps = min(TC, T - t0)

            def step(t, carry, whh=whh, buf=buf, t0=t0, write_seq=write_seq):
                hh, cc = carry
                # gates = hoisted x@W_ih (bf16 storage) + h@W_hh, accumulated in f32.
                g = buf[t].astype(_ACC_DTYPE) + jnp.dot(
                    hh.astype(whh.dtype), whh, preferred_element_type=jnp.float32)
                # PyTorch gate order i, f, g, o.  Hp is a multiple of 128, so every
                # slice below is a whole-vreg, full-lane EUP/VPU op (no masked lanes);
                # per-gate activations are already the minimal EUP issue count.
                i_g = jax.nn.sigmoid(g[:, 0 * Hp:1 * Hp])
                f_g = jax.nn.sigmoid(g[:, 1 * Hp:2 * Hp])
                g_g = jnp.tanh(g[:, 2 * Hp:3 * Hp])
                o_g = jax.nn.sigmoid(g[:, 3 * Hp:4 * Hp])
                cc = f_g * cc + i_g * g_g
                hh = o_g * jnp.tanh(cc)
                if write_seq:
                    seq_scr[t0 + t] = hh.astype(seq_scr.dtype)
                return (hh, cc)

            # fori_loop bounds vreg live ranges; partial unroll keeps LLO scheduling
            # visibility so step t+1's MXU push overlaps step t's EUP/VPU work.
            h, c_st = lax.fori_loop(0, steps, step, (h, c_st),
                                    unroll=min(int(steps), 8))

        hT_ref[l] = h
        cT_ref[l] = c_st

    # Fused head: BatchNorm1d (eval, running stats) + Dropout (identity) + Linear.
    eps = 1e-5
    xn = (h - rm_ref[...]) * lax.rsqrt(rv_ref[...] + eps)
    xn = xn * gamma_ref[...] + beta_ref[...]
    out_ref[...] = (jnp.dot(xn, wfc_ref[...], preferred_element_type=jnp.float32)
                    + bfc_ref[...]).astype(out_ref.dtype)


# ----------------------------------------------------------------------------
# Padding helpers (lane-align H and O; zero pads keep padded hidden units exactly 0)
# ----------------------------------------------------------------------------
def _round_up(n, m):
    return ((n + m - 1) // m) * m


def _pad_gate_cols(w, H, Hp):
    """Pad the trailing 4*H gate axis (PyTorch [i|f|g|o] blocks) to 4*Hp per gate."""
    if Hp == H:
        return w
    lead = w.shape[:-1]
    w4 = w.reshape(lead + (4, H))
    w4 = jnp.pad(w4, [(0, 0)] * (w4.ndim - 1) + [(0, Hp - H)])
    return w4.reshape(lead + (4 * Hp,))


def _pad_trailing(a, new, value=0.0):
    pad = new - a.shape[-1]
    if pad == 0:
        return a
    return jnp.pad(a, [(0, 0)] * (a.ndim - 1) + [(0, pad)], constant_values=value)


# ----------------------------------------------------------------------------
# Wrapper
# ----------------------------------------------------------------------------
@jax.jit
def lstm_forward(x, params, hidden_state=None):
    """Equivalent of LSTM.forward(x) in eval mode.

    x: (B, T, input_size) float32, batch_first like PyTorch.
    Returns (out, (h_n, c_n)) with out (B, output_size),
    h_n/c_n (num_layers, B, hidden_size).
    """
    B, T, Din = x.shape
    layers = params["layers"]
    L = len(layers)
    H = layers[0]["w_hh_t"].shape[0]
    O = params["w_fc_t"].shape[-1]
    Hp = _round_up(H, _LANE)
    Op = _round_up(O, _LANE)

    # --- lane-pad every hidden/output feature axis to a multiple of 128.
    wih_p, whh_p, b_p = [], [], []
    for l, lp in enumerate(layers):
        wih = _pad_gate_cols(lp["w_ih_t"], H, Hp)
        if l > 0:
            wih = jnp.pad(wih, [(0, Hp - H), (0, 0)])
        whh = jnp.pad(_pad_gate_cols(lp["w_hh_t"], H, Hp), [(0, Hp - H), (0, 0)])
        wih_p.append(wih.astype(_STORE_DTYPE))
        whh_p.append(whh.astype(_STORE_DTYPE))
        b_p.append(_pad_gate_cols(lp["b"], H, Hp).astype(jnp.float32))

    gamma = _pad_trailing(params["bn_gamma"], Hp, 1.0).astype(jnp.float32)
    beta = _pad_trailing(params["bn_beta"], Hp).astype(jnp.float32)
    rm = _pad_trailing(params["bn_rm"], Hp).astype(jnp.float32)
    rv = _pad_trailing(params["bn_rv"], Hp, 1.0).astype(jnp.float32)
    wfc = jnp.pad(params["w_fc_t"], [(0, Hp - H), (0, Op - O)]).astype(jnp.float32)
    bfc = _pad_trailing(params["b_fc"], Op).astype(jnp.float32)

    if hidden_state is None:
        h0 = jnp.zeros((L, B, Hp), jnp.float32)
        c0 = jnp.zeros((L, B, Hp), jnp.float32)
    else:
        h0 = _pad_trailing(hidden_state[0].astype(jnp.float32), Hp)
        c0 = _pad_trailing(hidden_state[1].astype(jnp.float32), Hp)

    # Time-major, bf16 storage; f32 accumulation happens inside the kernel.
    x_tm = jnp.transpose(x, (1, 0, 2)).astype(_STORE_DTYPE)          # (T, B, Din)

    # --- batch-chunk grid axis: 2 chunks so v7x's two TensorCores each take half the
    #     batch (dimension_semantics="parallel"); chunks stay multiples of 8 sublanes.
    n_bchunks = 2 if (B >= 16 and B % 16 == 0) else 1
    Bc = B // n_bchunks

    # --- time chunking of the hoisted input projection: resident gate scratch is
    #     2 * TC*Bc*4*Hp bytes regardless of T, sized against v7x's 64 MiB VMEM.
    bf_bytes = jnp.dtype(_STORE_DTYPE).itemsize
    per_step = Bc * 4 * Hp * bf_bytes
    TC = int(max(1, min(T, _TIME_CHUNK_BYTES // per_step, 128)))
    n_chunks = -(-T // TC)

    seq_shape = (T if L > 1 else 1, Bc, Hp)
    g0_shape = (TC, Bc, 4 * Hp)
    g1_shape = (TC if n_chunks > 1 else 1, Bc, 4 * Hp)

    inputs = ([x_tm] + wih_p + whh_p + b_p
              + [gamma, beta, rm, rv, wfc, bfc, h0, c0])

    def full_spec(a):
        return pl.BlockSpec(a.shape, lambda j, n=a.ndim: (0,) * n)

    in_specs = [pl.BlockSpec((T, Bc, Din), lambda j: (0, j, 0))]
    in_specs += [full_spec(a) for a in wih_p + whh_p + b_p]
    in_specs += [full_spec(a) for a in (gamma, beta, rm, rv, wfc, bfc)]
    in_specs += [pl.BlockSpec((L, Bc, Hp), lambda j: (0, j, 0)),
                 pl.BlockSpec((L, Bc, Hp), lambda j: (0, j, 0))]

    out_specs = (pl.BlockSpec((Bc, Op), lambda j: (j, 0)),
                 pl.BlockSpec((L, Bc, Hp), lambda j: (0, j, 0)),
                 pl.BlockSpec((L, Bc, Hp), lambda j: (0, j, 0)))

    def nelem(shape):
        n = 1
        for s in shape:
            n *= s
        return n

    # Scoped-VMEM limit sized to the actual footprint (defaults are only 16/32 MiB),
    # capped at v7x's 64 MiB so one configuration stays portable across generations.
    weight_bytes = sum(int(a.size) * a.dtype.itemsize
                       for a in wih_p + whh_p + b_p
                       + [gamma, beta, rm, rv, wfc, bfc])
    block_io = (nelem((T, Bc, Din)) * bf_bytes
                + 4 * nelem((L, Bc, Hp)) * 4          # h0,c0 in + h_n,c_n out
                + nelem((Bc, Op)) * 4)
    scratch_bytes = (nelem(seq_shape) + nelem(g0_shape) + nelem(g1_shape)) * bf_bytes
    est = 2 * (block_io + weight_bytes) + scratch_bytes + (4 << 20)
    vmem_limit = int(min(64 << 20, max(16 << 20, est)))

    kernel = functools.partial(_fused_lstm_kernel, L, T, Bc, TC)

    out, h_n, c_n = pl.pallas_call(
        kernel,
        grid=(n_bchunks,),
        out_shape=(
            jax.ShapeDtypeStruct((B, Op), jnp.float32),
            jax.ShapeDtypeStruct((L, B, Hp), jnp.float32),
            jax.ShapeDtypeStruct((L, B, Hp), jnp.float32),
        ),
        in_specs=in_specs,
        out_specs=out_specs,
        scratch_shapes=[
            pltpu.VMEM(seq_shape, _STORE_DTYPE),   # inter-layer hidden sequence
            pltpu.VMEM(g0_shape, _STORE_DTYPE),    # hoisted gate chunk buffer, slot 0
            pltpu.VMEM(g1_shape, _STORE_DTYPE),    # hoisted gate chunk buffer, slot 1
        ],
        compiler_params=pltpu.CompilerParams(
            dimension_semantics=("parallel",),
            vmem_limit_bytes=vmem_limit),
    )(*inputs)

    # Strip lane padding (padded hidden/output entries are exactly zero).
    return out[:, :O], (h_n[:, :, :H], c_n[:, :, :H])


# ----------------------------------------------------------------------------
# Deterministic parameter construction (shapes mirror nn.LSTM / nn.Linear /
# nn.BatchNorm1d from the PyTorch module's __init__)
# ----------------------------------------------------------------------------
def make_params(key, input_size, hidden_size, output_size, num_layers):
    layers = []
    k = 1.0 / jnp.sqrt(hidden_size)
    for l in range(num_layers):
        din = input_size if l == 0 else hidden_size
        key, k1, k2, k3, k4 = jax.random.split(key, 5)
        w_ih = jax.random.uniform(k1, (4 * hidden_size, din), jnp.float32, -k, k)
        w_hh = jax.random.uniform(k2, (4 * hidden_size, hidden_size), jnp.float32, -k, k)
        b_ih = jax.random.uniform(k3, (4 * hidden_size,), jnp.float32, -k, k)
        b_hh = jax.random.uniform(k4, (4 * hidden_size,), jnp.float32, -k, k)
        layers.append({
            "w_ih_t": w_ih.T,                                  # (din, 4H)
            "w_hh_t": w_hh.T,                                  # (H, 4H)
            "b": (b_ih + b_hh).reshape(1, 4 * hidden_size),    # (1, 4H)
        })
    key, k5, k6, k7, k8 = jax.random.split(key, 5)
    w_fc = jax.random.uniform(k5, (output_size, hidden_size), jnp.float32, -k, k)
    b_fc = jax.random.uniform(k6, (output_size,), jnp.float32, -k, k)
    bn_gamma = 1.0 + 0.1 * jax.random.normal(k7, (hidden_size,), jnp.float32)
    bn_beta = 0.1 * jax.random.normal(k8, (hidden_size,), jnp.float32)
    bn_rm = jnp.zeros((hidden_size,), jnp.float32)
    bn_rv = jnp.ones((hidden_size,), jnp.float32)
    return {
        "layers": layers,
        "w_fc_t": w_fc.T,                              # (H, O)
        "b_fc": b_fc.reshape(1, output_size),          # (1, O)
        "bn_gamma": bn_gamma.reshape(1, hidden_size),
        "bn_beta": bn_beta.reshape(1, hidden_size),
        "bn_rm": bn_rm.reshape(1, hidden_size),
        "bn_rv": bn_rv.reshape(1, hidden_size),
    }


if __name__ == "__main__":
    INPUT_SIZE = 16
    HIDDEN_SIZE = 32
    OUTPUT_SIZE = 8
    NUM_LAYERS = 2
    BATCH = 16        # >= 16 so the batch-chunk grid axis (v7x two-core split) is exercised
    SEQ = 8

    key = jax.random.PRNGKey(0)
    key, kx = jax.random.split(key)
    x = jax.random.normal(kx, (BATCH, SEQ, INPUT_SIZE), jnp.float32)
    params = make_params(key, INPUT_SIZE, HIDDEN_SIZE, OUTPUT_SIZE, NUM_LAYERS)

    out, (h_n, c_n) = lstm_forward(x, params)
    jax.block_until_ready((out, h_n, c_n))

    assert out.shape == (BATCH, OUTPUT_SIZE)
    assert h_n.shape == (NUM_LAYERS, BATCH, HIDDEN_SIZE)
    assert c_n.shape == (NUM_LAYERS, BATCH, HIDDEN_SIZE)
    assert bool(jnp.all(jnp.isfinite(out)))
    assert bool(jnp.all(jnp.isfinite(h_n))) and bool(jnp.all(jnp.isfinite(c_n)))
    print("KERNEL_OK")
</pallas_src>

<mosaic_0001>
module attributes {stable_mosaic.version = 11 : i64} {
  func.func @_fused_lstm_kernel(%arg0: i32, %arg1: memref<8x8x16xbf16, #tpu.memory_space<vmem>>, %arg2: memref<16x512xbf16, #tpu.memory_space<vmem>>, %arg3: memref<128x512xbf16, #tpu.memory_space<vmem>>, %arg4: memref<128x512xbf16, #tpu.memory_space<vmem>>, %arg5: memref<128x512xbf16, #tpu.memory_space<vmem>>, %arg6: memref<1x512xf32, #tpu.memory_space<vmem>>, %arg7: memref<1x512xf32, #tpu.memory_space<vmem>>, %arg8: memref<1x128xf32, #tpu.memory_space<vmem>>, %arg9: memref<1x128xf32, #tpu.memory_space<vmem>>, %arg10: memref<1x128xf32, #tpu.memory_space<vmem>>, %arg11: memref<1x128xf32, #tpu.memory_space<vmem>>, %arg12: memref<128x128xf32, #tpu.memory_space<vmem>>, %arg13: memref<1x128xf32, #tpu.memory_space<vmem>>, %arg14: memref<2x8x128xf32, #tpu.memory_space<vmem>>, %arg15: memref<2x8x128xf32, #tpu.memory_space<vmem>>, %arg16: memref<8x128xf32, #tpu.memory_space<vmem>>, %arg17: memref<2x8x128xf32, #tpu.memory_space<vmem>>, %arg18: memref<2x8x128xf32, #tpu.memory_space<vmem>>, %arg19: memref<8x8x128xbf16, #tpu.memory_space<vmem>>, %arg20: memref<8x8x512xbf16, #tpu.memory_space<vmem>>, %arg21: memref<1x8x512xbf16, #tpu.memory_space<vmem>>) attributes {dimension_semantics = [#tpu.dimension_semantics<parallel>], iteration_bounds = array<i64: 2>, scalar_prefetch = 0 : i64, scratch_operands = 3 : i64, tpu.core_type = #tpu.core_type<tc>, window_params = [{transform_indices = @transform_0, window_bounds = array<i64: 8, 8, 16>}, {pipeline_mode = #tpu.pipeline_mode<synchronous>, transform_indices = @transform_1, window_bounds = array<i64: 16, 512>}, {pipeline_mode = #tpu.pipeline_mode<synchronous>, transform_indices = @transform_2, window_bounds = array<i64: 128, 512>}, {pipeline_mode = #tpu.pipeline_mode<synchronous>, transform_indices = @transform_3, window_bounds = array<i64: 128, 512>}, {pipeline_mode = #tpu.pipeline_mode<synchronous>, transform_indices = @transform_4, window_bounds = array<i64: 128, 512>}, {pipeline_mode = #tpu.pipeline_mode<synchronous>, transform_indices = @transform_5, window_bounds = array<i64: 1, 512>}, {pipeline_mode = #tpu.pipeline_mode<synchronous>, transform_indices = @transform_6, window_bounds = array<i64: 1, 512>}, {pipeline_mode = #tpu.pipeline_mode<synchronous>, transform_indices = @transform_7, window_bounds = array<i64: 1, 128>}, {pipeline_mode = #tpu.pipeline_mode<synchronous>, transform_indices = @transform_8, window_bounds = array<i64: 1, 128>}, {pipeline_mode = #tpu.pipeline_mode<synchronous>, transform_indices = @transform_9, window_bounds = array<i64: 1, 128>}, {pipeline_mode = #tpu.pipeline_mode<synchronous>, transform_indices = @transform_10, window_bounds = array<i64: 1, 128>}, {pipeline_mode = #tpu.pipeline_mode<synchronous>, transform_indices = @transform_11, window_bounds = array<i64: 128, 128>}, {pipeline_mode = #tpu.pipeline_mode<synchronous>, transform_indices = @transform_12, window_bounds = array<i64: 1, 128>}, {transform_indices = @transform_13, window_bounds = array<i64: 2, 8, 128>}, {transform_indices = @transform_14, window_bounds = array<i64: 2, 8, 128>}, {transform_indices = @transform_15, window_bounds = array<i64: 8, 128>}, {transform_indices = @transform_16, window_bounds = array<i64: 2, 8, 128>}, {transform_indices = @transform_17, window_bounds = array<i64: 2, 8, 128>}]} {
    %c0 = arith.constant 0 : index
    %c0_0 = arith.constant 0 : index
    %0 = vector.load %arg2[%c0, %c0_0] : memref<16x512xbf16, #tpu.memory_space<vmem>>, vector<16x512xbf16>
    %c0_1 = arith.constant 0 : index
    %c0_2 = arith.constant 0 : index
    %1 = vector.load %arg4[%c0_1, %c0_2] : memref<128x512xbf16, #tpu.memory_space<vmem>>, vector<128x512xbf16>
    %c0_3 = arith.constant 0 : index
    %c0_4 = arith.constant 0 : index
    %2 = vector.load %arg6[%c0_3, %c0_4] : memref<1x512xf32, #tpu.memory_space<vmem>>, vector<1x512xf32>
    %c0_5 = arith.constant 0 : index
    %c0_6 = arith.constant 0 : index
    %c0_7 = arith.constant 0 : index
    %3 = vector.load %arg1[%c0_5, %c0_6, %c0_7] : memref<8x8x16xbf16, #tpu.memory_space<vmem>>, vector<8x8x16xbf16>
    %4 = vector.shape_cast %3 : vector<8x8x16xbf16> to vector<64x16xbf16>
    %cst = arith.constant dense<0.000000e+00> : vector<64x512xf32>
    %5 = tpu.matmul %4, %0, %cst {dimension_numbers = #tpu.dot_dimension_numbers<[1], [0], [0], [1], [0, 0, 1, 1], [], []>} : vector<64x16xbf16>, vector<16x512xbf16>, vector<64x512xf32> -> vector<64x512xf32>
    %6 = vector.broadcast %2 : vector<1x512xf32> to vector<64x512xf32>
    %7 = arith.addf %5, %6 : vector<64x512xf32>
    %8 = vector.shape_cast %7 : vector<64x512xf32> to vector<8x8x512xf32>
    %9 = arith.truncf %8 : vector<8x8x512xf32> to vector<8x8x512xbf16>
    %c0_8 = arith.constant 0 : index
    %c0_9 = arith.constant 0 : index
    %c0_10 = arith.constant 0 : index
    %10 = vector.load %arg20[%c0_8, %c0_9, %c0_10] : memref<8x8x512xbf16, #tpu.memory_space<vmem>>, vector<8x8x512xbf16>
    tpu.vector_store %arg20[%c0_8, %c0_9, %c0_10], %9 {strides = array<i32>} : memref<8x8x512xbf16, #tpu.memory_space<vmem>>, vector<8x8x512xbf16>,
    %c0_11 = arith.constant 0 : index
    %c0_12 = arith.constant 0 : index
    %c0_13 = arith.constant 0 : index
    %11 = vector.load %arg14[%c0_11, %c0_12, %c0_13] : memref<2x8x128xf32, #tpu.memory_space<vmem>>, vector<1x8x128xf32>
    %12 = vector.shape_cast %11 : vector<1x8x128xf32> to vector<8x128xf32>
    %c0_14 = arith.constant 0 : index
    %c0_15 = arith.constant 0 : index
    %c0_16 = arith.constant 0 : index
    %13 = vector.load %arg15[%c0_14, %c0_15, %c0_16] : memref<2x8x128xf32, #tpu.memory_space<vmem>>, vector<1x8x128xf32>
    %14 = vector.shape_cast %13 : vector<1x8x128xf32> to vector<8x128xf32>
    %c0_i32 = arith.constant 0 : i32
    %15 = arith.index_cast %c0_i32 : i32 to index
    %c0_17 = arith.constant 0 : index
    %c0_18 = arith.constant 0 : index
    %16 = vector.load %arg20[%15, %c0_17, %c0_18] : memref<8x8x512xbf16, #tpu.memory_space<vmem>>, vector<1x8x512xbf16>
    %17 = vector.shape_cast %16 : vector<1x8x512xbf16> to vector<8x512xbf16>
    %18 = arith.extf %17 : vector<8x512xbf16> to vector<8x512xf32>
    %19 = arith.truncf %12 : vector<8x128xf32> to vector<8x128xbf16>
    %cst_19 = arith.constant dense<0.000000e+00> : vector<8x512xf32>
    %20 = tpu.matmul %19, %1, %cst_19 {dimension_numbers = #tpu.dot_dimension_numbers<[1], [0], [0], [1], [0, 0, 1, 1], [], []>} : vector<8x128xbf16>, vector<128x512xbf16>, vector<8x512xf32> -> vector<8x512xf32>
    %21 = arith.addf %18, %20 : vector<8x512xf32>
    %22 = vector.extract_strided_slice %21 {offsets = [0, 0], sizes = [8, 128], strides = [1, 1]} : vector<8x512xf32> to vector<8x128xf32>
    %23 = arith.negf %22 : vector<8x128xf32>
    %24 = math.exp %23 : vector<8x128xf32>
    %cst_20 = arith.constant 1.000000e+00 : f32
    %25 = vector.broadcast %cst_20 : f32 to vector<8x128xf32>
    %26 = arith.addf %25, %24 : vector<8x128xf32>
    %27 = arith.divf %25, %26 : vector<8x128xf32>
    %28 = vector.extract_strided_slice %21 {offsets = [0, 128], sizes = [8, 128], strides = [1, 1]} : vector<8x512xf32> to vector<8x128xf32>
    %29 = arith.negf %28 : vector<8x128xf32>
    %30 = math.exp %29 : vector<8x128xf32>
    %cst_21 = arith.constant 1.000000e+00 : f32
    %31 = vector.broadcast %cst_21 : f32 to vector<8x128xf32>
    %32 = arith.addf %31, %30 : vector<8x128xf32>
    %33 = arith.divf %31, %32 : vector<8x128xf32>
    %34 = vector.extract_strided_slice %21 {offsets = [0, 256], sizes = [8, 128], strides = [1, 1]} : vector<8x512xf32> to vector<8x128xf32>
    %35 = math.tanh %34 : vector<8x128xf32>
    %36 = vector.extract_strided_slice %21 {offsets = [0, 384], sizes = [8, 128], strides = [1, 1]} : vector<8x512xf32> to vector<8x128xf32>
    %37 = arith.negf %36 : vector<8x128xf32>
    %38 = math.exp %37 : vector<8x128xf32>
    %cst_22 = arith.constant 1.000000e+00 : f32
    %39 = vector.broadcast %cst_22 : f32 to vector<8x128xf32>
    %40 = arith.addf %39, %38 : vector<8x128xf32>
    %41 = arith.divf %39, %40 : vector<8x128xf32>
    %42 = arith.mulf %33, %14 : vector<8x128xf32>
    %43 = arith.mulf %27, %35 : vector<8x128xf32>
    %44 = arith.addf %42, %43 : vector<8x128xf32>
    %45 = math.tanh %44 : vector<8x128xf32>
    %46 = arith.mulf %41, %45 : vector<8x128xf32>
    %47 = arith.truncf %46 : vector<8x128xf32> to vector<8x128xbf16>
    %c0_i32_23 = arith.constant 0 : i32
    %48 = arith.addi %c0_i32_23, %c0_i32 : i32
    %49 = arith.index_cast %48 : i32 to index
    %c0_24 = arith.constant 0 : index
    %c0_25 = arith.constant 0 : index
    %50 = vector.load %arg19[%49, %c0_24, %c0_25] : memref<8x8x128xbf16, #tpu.memory_space<vmem>>, vector<1x8x128xbf16>
    %51 = vector.shape_cast %50 : vector<1x8x128xbf16> to vector<8x128xbf16>
    %52 = vector.shape_cast %47 : vector<8x128xbf16> to vector<1x8x128xbf16>
    tpu.vector_store %arg19[%49, %c0_24, %c0_25], %52 {strides = array<i32>} : memref<8x8x128xbf16, #tpu.memory_space<vmem>>, vector<1x8x128xbf16>,
    %c1_i32 = arith.constant 1 : i32
    %53 = arith.index_cast %c1_i32 : i32 to index
    %c0_26 = arith.constant 0 : index
    %c0_27 = arith.constant 0 : index
    %54 = vector.load %arg20[%53, %c0_26, %c0_27] : memref<8x8x512xbf16, #tpu.memory_space<vmem>>, vector<1x8x512xbf16>
    %55 = vector.shape_cast %54 : vector<1x8x512xbf16> to vector<8x512xbf16>
    %56 = arith.extf %55 : vector<8x512xbf16> to vector<8x512xf32>
    %57 = arith.truncf %46 : vector<8x128xf32> to vector<8x128xbf16>
    %cst_28 = arith.constant dense<0.000000e+00> : vector<8x512xf32>
    %58 = tpu.matmul %57, %1, %cst_28 {dimension_numbers = #tpu.dot_dimension_numbers<[1], [0], [0], [1], [0, 0, 1, 1], [], []>} : vector<8x128xbf16>, vector<128x512xbf16>, vector<8x512xf32> -> vector<8x512xf32>
    %59 = arith.addf %56, %58 : vector<8x512xf32>
    %60 = vector.extract_strided_slice %59 {offsets = [0, 0], sizes = [8, 128], strides = [1, 1]} : vector<8x512xf32> to vector<8x128xf32>
    %61 = arith.negf %60 : vector<8x128xf32>
    %62 = math.exp %61 : vector<8x128xf32>
    %cst_29 = arith.constant 1.000000e+00 : f32
    %63 = vector.broadcast %cst_29 : f32 to vector<8x128xf32>
    %64 = arith.addf %63, %62 : vector<8x128xf32>
    %65 = arith.divf %63, %64 : vector<8x128xf32>
    %66 = vector.extract_strided_slice %59 {offsets = [0, 128], sizes = [8, 128], strides = [1, 1]} : vector<8x512xf32> to vector<8x128xf32>
    %67 = arith.negf %66 : vector<8x128xf32>
    %68 = math.exp %67 : vector<8x128xf32>
    %cst_30 = arith.constant 1.000000e+00 : f32
    %69 = vector.broadcast %cst_30 : f32 to vector<8x128xf32>
    %70 = arith.addf %69, %68 : vector<8x128xf32>
    %71 = arith.divf %69, %70 : vector<8x128xf32>
    %72 = vector.extract_strided_slice %59 {offsets = [0, 256], sizes = [8, 128], strides = [1, 1]} : vector<8x512xf32> to vector<8x128xf32>
    %73 = math.tanh %72 : vector<8x128xf32>
    %74 = vector.extract_strided_slice %59 {offsets = [0, 384], sizes = [8, 128], strides = [1, 1]} : vector<8x512xf32> to vector<8x128xf32>
    %75 = arith.negf %74 : vector<8x128xf32>
    %76 = math.exp %75 : vector<8x128xf32>
    %cst_31 = arith.constant 1.000000e+00 : f32
    %77 = vector.broadcast %cst_31 : f32 to vector<8x128xf32>
    %78 = arith.addf %77, %76 : vector<8x128xf32>
    %79 = arith.divf %77, %78 : vector<8x128xf32>
    %80 = arith.mulf %71, %44 : vector<8x128xf32>
    %81 = arith.mulf %65, %73 : vector<8x128xf32>
    %82 = arith.addf %80, %81 : vector<8x128xf32>
    %83 = math.tanh %82 : vector<8x128xf32>
    %84 = arith.mulf %79, %83 : vector<8x128xf32>
    %85 = arith.truncf %84 : vector<8x128xf32> to vector<8x128xbf16>
    %c0_i32_32 = arith.constant 0 : i32
    %86 = arith.addi %c0_i32_32, %c1_i32 : i32
    %87 = arith.index_cast %86 : i32 to index
    %c0_33 = arith.constant 0 : index
    %c0_34 = arith.constant 0 : index
    %88 = vector.load %arg19[%87, %c0_33, %c0_34] : memref<8x8x128xbf16, #tpu.memory_space<vmem>>, vector<1x8x128xbf16>
    %89 = vector.shape_cast %88 : vector<1x8x128xbf16> to vector<8x128xbf16>
    %90 = vector.shape_cast %85 : vector<8x128xbf16> to vector<1x8x128xbf16>
    tpu.vector_store %arg19[%87, %c0_33, %c0_34], %90 {strides = array<i32>} : memref<8x8x128xbf16, #tpu.memory_space<vmem>>, vector<1x8x128xbf16>,
    %c2_i32 = arith.constant 2 : i32
    %91 = arith.index_cast %c2_i32 : i32 to index
    %c0_35 = arith.constant 0 : index
    %c0_36 = arith.constant 0 : index
    %92 = vector.load %arg20[%91, %c0_35, %c0_36] : memref<8x8x512xbf16, #tpu.memory_space<vmem>>, vector<1x8x512xbf16>
    %93 = vector.shape_cast %92 : vector<1x8x512xbf16> to vector<8x512xbf16>
    %94 = arith.extf %93 : vector<8x512xbf16> to vector<8x512xf32>
    %95 = arith.truncf %84 : vector<8x128xf32> to vector<8x128xbf16>
    %cst_37 = arith.constant dense<0.000000e+00> : vector<8x512xf32>
    %96 = tpu.matmul %95, %1, %cst_37 {dimension_numbers = #tpu.dot_dimension_numbers<[1], [0], [0], [1], [0, 0, 1, 1], [], []>} : vector<8x128xbf16>, vector<128x512xbf16>, vector<8x512xf32> -> vector<8x512xf32>
    %97 = arith.addf %94, %96 : vector<8x512xf32>
    %98 = vector.extract_strided_slice %97 {offsets = [0, 0], sizes = [8, 128], strides = [1, 1]} : vector<8x512xf32> to vector<8x128xf32>
    %99 = arith.negf %98 : vector<8x128xf32>
    %100 = math.exp %99 : vector<8x128xf32>
    %cst_38 = arith.constant 1.000000e+00 : f32
    %101 = vector.broadcast %cst_38 : f32 to vector<8x128xf32>
    %102 = arith.addf %101, %100 : vector<8x128xf32>
    %103 = arith.divf %101, %102 : vector<8x128xf32>
    %104 = vector.extract_strided_slice %97 {offsets = [0, 128], sizes = [8, 128], strides = [1, 1]} : vector<8x512xf32> to vector<8x128xf32>
    %105 = arith.negf %104 : vector<8x128xf32>
    %106 = math.exp %105 : vector<8x128xf32>
    %cst_39 = arith.constant 1.000000e+00 : f32
    %107 = vector.broadcast %cst_39 : f32 to vector<8x128xf32>
    %108 = arith.addf %107, %106 : vector<8x128xf32>
    %109 = arith.divf %107, %108 : vector<8x128xf32>
    %110 = vector.extract_strided_slice %97 {offsets = [0, 256], sizes = [8, 128], strides = [1, 1]} : vector<8x512xf32> to vector<8x128xf32>
    %111 = math.tanh %110 : vector<8x128xf32>
    %112 = vector.extract_strided_slice %97 {offsets = [0, 384], sizes = [8, 128], strides = [1, 1]} : vector<8x512xf32> to vector<8x128xf32>
    %113 = arith.negf %112 : vector<8x128xf32>
    %114 = math.exp %113 : vector<8x128xf32>
    %cst_40 = arith.constant 1.000000e+00 : f32
    %115 = vector.broadcast %cst_40 : f32 to vector<8x128xf32>
    %116 = arith.addf %115, %114 : vector<8x128xf32>
    %117 = arith.divf %115, %116 : vector<8x128xf32>
    %118 = arith.mulf %109, %82 : vector<8x128xf32>
    %119 = arith.mulf %103, %111 : vector<8x128xf32>
    %120 = arith.addf %118, %119 : vector<8x128xf32>
    %121 = math.tanh %120 : vector<8x128xf32>
    %122 = arith.mulf %117, %121 : vector<8x128xf32>
    %123 = arith.truncf %122 : vector<8x128xf32> to vector<8x128xbf16>
    %c0_i32_41 = arith.constant 0 : i32
    %124 = arith.addi %c0_i32_41, %c2_i32 : i32
    %125 = arith.index_cast %124 : i32 to index
    %c0_42 = arith.constant 0 : index
    %c0_43 = arith.constant 0 : index
    %126 = vector.load %arg19[%125, %c0_42, %c0_43] : memref<8x8x128xbf16, #tpu.memory_space<vmem>>, vector<1x8x128xbf16>
    %127 = vector.shape_cast %126 : vector<1x8x128xbf16> to vector<8x128xbf16>
    %128 = vector.shape_cast %123 : vector<8x128xbf16> to vector<1x8x128xbf16>
    tpu.vector_store %arg19[%125, %c0_42, %c0_43], %128 {strides = array<i32>} : memref<8x8x128xbf16, #tpu.memory_space<vmem>>, vector<1x8x128xbf16>,
    %c3_i32 = arith.constant 3 : i32
    %129 = arith.index_cast %c3_i32 : i32 to index
    %c0_44 = arith.constant 0 : index
    %c0_45 = arith.constant 0 : index
    %130 = vector.load %arg20[%129, %c0_44, %c0_45] : memref<8x8x512xbf16, #tpu.memory_space<vmem>>, vector<1x8x512xbf16>
    %131 = vector.shape_cast %130 : vector<1x8x512xbf16> to vector<8x512xbf16>
    %132 = arith.extf %131 : vector<8x512xbf16> to vector<8x512xf32>
    %133 = arith.truncf %122 : vector<8x128xf32> to vector<8x128xbf16>
    %cst_46 = arith.constant dense<0.000000e+00> : vector<8x512xf32>
    %134 = tpu.matmul %133, %1, %cst_46 {dimension_numbers = #tpu.dot_dimension_numbers<[1], [0], [0], [1], [0, 0, 1, 1], [], []>} : vector<8x128xbf16>, vector<128x512xbf16>, vector<8x512xf32> -> vector<8x512xf32>
    %135 = arith.addf %132, %134 : vector<8x512xf32>
    %136 = vector.extract_strided_slice %135 {offsets = [0, 0], sizes = [8, 128], strides = [1, 1]} : vector<8x512xf32> to vector<8x128xf32>
    %137 = arith.negf %136 : vector<8x128xf32>
    %138 = math.exp %137 : vector<8x128xf32>
    %cst_47 = arith.constant 1.000000e+00 : f32
    %139 = vector.broadcast %cst_47 : f32 to vector<8x128xf32>
    %140 = arith.addf %139, %138 : vector<8x128xf32>
    %141 = arith.divf %139, %140 : vector<8x128xf32>
    %142 = vector.extract_strided_slice %135 {offsets = [0, 128], sizes = [8, 128], strides = [1, 1]} : vector<8x512xf32> to vector<8x128xf32>
    %143 = arith.negf %142 : vector<8x128xf32>
    %144 = math.exp %143 : vector<8x128xf32>
    %cst_48 = arith.constant 1.000000e+00 : f32
    %145 = vector.broadcast %cst_48 : f32 to vector<8x128xf32>
    %146 = arith.addf %145, %144 : vector<8x128xf32>
    %147 = arith.divf %145, %146 : vector<8x128xf32>
    %148 = vector.extract_strided_slice %135 {offsets = [0, 256], sizes = [8, 128], strides = [1, 1]} : vector<8x512xf32> to vector<8x128xf32>
    %149 = math.tanh %148 : vector<8x128xf32>
    %150 = vector.extract_strided_slice %135 {offsets = [0, 384], sizes = [8, 128], strides = [1, 1]} : vector<8x512xf32> to vector<8x128xf32>
    %151 = arith.negf %150 : vector<8x128xf32>
    %152 = math.exp %151 : vector<8x128xf32>
    %cst_49 = arith.constant 1.000000e+00 : f32
    %153 = vector.broadcast %cst_49 : f32 to vector<8x128xf32>
    %154 = arith.addf %153, %152 : vector<8x128xf32>
    %155 = arith.divf %153, %154 : vector<8x128xf32>
    %156 = arith.mulf %147, %120 : vector<8x128xf32>
    %157 = arith.mulf %141, %149 : vector<8x128xf32>
    %158 = arith.addf %156, %157 : vector<8x128xf32>
    %159 = math.tanh %158 : vector<8x128xf32>
    %160 = arith.mulf %155, %159 : vector<8x128xf32>
    %161 = arith.truncf %160 : vector<8x128xf32> to vector<8x128xbf16>
    %c0_i32_50 = arith.constant 0 : i32
    %162 = arith.addi %c0_i32_50, %c3_i32 : i32
    %163 = arith.index_cast %162 : i32 to index
    %c0_51 = arith.constant 0 : index
    %c0_52 = arith.constant 0 : index
    %164 = vector.load %arg19[%163, %c0_51, %c0_52] : memref<8x8x128xbf16, #tpu.memory_space<vmem>>, vector<1x8x128xbf16>
    %165 = vector.shape_cast %164 : vector<1x8x128xbf16> to vector<8x128xbf16>
    %166 = vector.shape_cast %161 : vector<8x128xbf16> to vector<1x8x128xbf16>
    tpu.vector_store %arg19[%163, %c0_51, %c0_52], %166 {strides = array<i32>} : memref<8x8x128xbf16, #tpu.memory_space<vmem>>, vector<1x8x128xbf16>,
    %c4_i32 = arith.constant 4 : i32
    %167 = arith.index_cast %c4_i32 : i32 to index
    %c0_53 = arith.constant 0 : index
    %c0_54 = arith.constant 0 : index
    %168 = vector.load %arg20[%167, %c0_53, %c0_54] : memref<8x8x512xbf16, #tpu.memory_space<vmem>>, vector<1x8x512xbf16>
    %169 = vector.shape_cast %168 : vector<1x8x512xbf16> to vector<8x512xbf16>
    %170 = arith.extf %169 : vector<8x512xbf16> to vector<8x512xf32>
    %171 = arith.truncf %160 : vector<8x128xf32> to vector<8x128xbf16>
    %cst_55 = arith.constant dense<0.000000e+00> : vector<8x512xf32>
    %172 = tpu.matmul %171, %1, %cst_55 {dimension_numbers = #tpu.dot_dimension_numbers<[1], [0], [0], [1], [0, 0, 1, 1], [], []>} : vector<8x128xbf16>, vector<128x512xbf16>, vector<8x512xf32> -> vector<8x512xf32>
    %173 = arith.addf %170, %172 : vector<8x512xf32>
    %174 = vector.extract_strided_slice %173 {offsets = [0, 0], sizes = [8, 128], strides = [1, 1]} : vector<8x512xf32> to vector<8x128xf32>
    %175 = arith.negf %174 : vector<8x128xf32>
    %176 = math.exp %175 : vector<8x128xf32>
    %cst_56 = arith.constant 1.000000e+00 : f32
    %177 = vector.broadcast %cst_56 : f32 to vector<8x128xf32>
    %178 = arith.addf %177, %176 : vector<8x128xf32>
    %179 = arith.divf %177, %178 : vector<8x128xf32>
    %180 = vector.extract_strided_slice %173 {offsets = [0, 128], sizes = [8, 128], strides = [1, 1]} : vector<8x512xf32> to vector<8x128xf32>
    %181 = arith.negf %180 : vector<8x128xf32>
    %182 = math.exp %181 : vector<8x128xf32>
    %cst_57 = arith.constant 1.000000e+00 : f32
    %183 = vector.broadcast %cst_57 : f32 to vector<8x128xf32>
    %184 = arith.addf %183, %182 : vector<8x128xf32>
    %185 = arith.divf %183, %184 : vector<8x128xf32>
    %186 = vector.extract_strided_slice %173 {offsets = [0, 256], sizes = [8, 128], strides = [1, 1]} : vector<8x512xf32> to vector<8x128xf32>
    %187 = math.tanh %186 : vector<8x128xf32>
    %188 = vector.extract_strided_slice %173 {offsets = [0, 384], sizes = [8, 128], strides = [1, 1]} : vector<8x512xf32> to vector<8x128xf32>
    %189 = arith.negf %188 : vector<8x128xf32>
    %190 = math.exp %189 : vector<8x128xf32>
    %cst_58 = arith.constant 1.000000e+00 : f32
    %191 = vector.broadcast %cst_58 : f32 to vector<8x128xf32>
    %192 = arith.addf %191, %190 : vector<8x128xf32>
    %193 = arith.divf %191, %192 : vector<8x128xf32>
    %194 = arith.mulf %185, %158 : vector<8x128xf32>
    %195 = arith.mulf %179, %187 : vector<8x128xf32>
    %196 = arith.addf %194, %195 : vector<8x128xf32>
    %197 = math.tanh %196 : vector<8x128xf32>
    %198 = arith.mulf %193, %197 : vector<8x128xf32>
    %199 = arith.truncf %198 : vector<8x128xf32> to vector<8x128xbf16>
    %c0_i32_59 = arith.constant 0 : i32
    %200 = arith.addi %c0_i32_59, %c4_i32 : i32
    %201 = arith.index_cast %200 : i32 to index
    %c0_60 = arith.constant 0 : index
    %c0_61 = arith.constant 0 : index
    %202 = vector.load %arg19[%201, %c0_60, %c0_61] : memref<8x8x128xbf16, #tpu.memory_space<vmem>>, vector<1x8x128xbf16>
    %203 = vector.shape_cast %202 : vector<1x8x128xbf16> to vector<8x128xbf16>
    %204 = vector.shape_cast %199 : vector<8x128xbf16> to vector<1x8x128xbf16>
    tpu.vector_store %arg19[%201, %c0_60, %c0_61], %204 {strides = array<i32>} : memref<8x8x128xbf16, #tpu.memory_space<vmem>>, vector<1x8x128xbf16>,
    %c5_i32 = arith.constant 5 : i32
    %205 = arith.index_cast %c5_i32 : i32 to index
    %c0_62 = arith.constant 0 : index
    %c0_63 = arith.constant 0 : index
    %206 = vector.load %arg20[%205, %c0_62, %c0_63] : memref<8x8x512xbf16, #tpu.memory_space<vmem>>, vector<1x8x512xbf16>
    %207 = vector.shape_cast %206 : vector<1x8x512xbf16> to vector<8x512xbf16>
    %208 = arith.extf %207 : vector<8x512xbf16> to vector<8x512xf32>
    %209 = arith.truncf %198 : vector<8x128xf32> to vector<8x128xbf16>
    %cst_64 = arith.constant dense<0.000000e+00> : vector<8x512xf32>
    %210 = tpu.matmul %209, %1, %cst_64 {dimension_numbers = #tpu.dot_dimension_numbers<[1], [0], [0], [1], [0, 0, 1, 1], [], []>} : vector<8x128xbf16>, vector<128x512xbf16>, vector<8x512xf32> -> vector<8x512xf32>
    %211 = arith.addf %208, %210 : vector<8x512xf32>
    %212 = vector.extract_strided_slice %211 {offsets = [0, 0], sizes = [8, 128], strides = [1, 1]} : vector<8x512xf32> to vector<8x128xf32>
    %213 = arith.negf %212 : vector<8x128xf32>
    %214 = math.exp %213 : vector<8x128xf32>
    %cst_65 = arith.constant 1.000000e+00 : f32
    %215 = vector.broadcast %cst_65 : f32 to vector<8x128xf32>
    %216 = arith.addf %215, %214 : vector<8x128xf32>
    %217 = arith.divf %215, %216 : vector<8x128xf32>
    %218 = vector.extract_strided_slice %211 {offsets = [0, 128], sizes = [8, 128], strides = [1, 1]} : vector<8x512xf32> to vector<8x128xf32>
    %219 = arith.negf %218 : vector<8x128xf32>
    %220 = math.exp %219 : vector<8x128xf32>
    %cst_66 = arith.constant 1.000000e+00 : f32
    %221 = vector.broadcast %cst_66 : f32 to vector<8x128xf32>
    %222 = arith.addf %221, %220 : vector<8x128xf32>
    %223 = arith.divf %221, %222 : vector<8x128xf32>
    %224 = vector.extract_strided_slice %211 {offsets = [0, 256], sizes = [8, 128], strides = [1, 1]} : vector<8x512xf32> to vector<8x128xf32>
    %225 = math.tanh %224 : vector<8x128xf32>
    %226 = vector.extract_strided_slice %211 {offsets = [0, 384], sizes = [8, 128], strides = [1, 1]} : vector<8x512xf32> to vector<8x128xf32>
    %227 = arith.negf %226 : vector<8x128xf32>
    %228 = math.exp %227 : vector<8x128xf32>
    %cst_67 = arith.constant 1.000000e+00 : f32
    %229 = vector.broadcast %cst_67 : f32 to vector<8x128xf32>
    %230 = arith.addf %229, %228 : vector<8x128xf32>
    %231 = arith.divf %229, %230 : vector<8x128xf32>
    %232 = arith.mulf %223, %196 : vector<8x128xf32>
    %233 = arith.mulf %217, %225 : vector<8x128xf32>
    %234 = arith.addf %232, %233 : vector<8x128xf32>
    %235 = math.tanh %234 : vector<8x128xf32>
    %236 = arith.mulf %231, %235 : vector<8x128xf32>
    %237 = arith.truncf %236 : vector<8x128xf32> to vector<8x128xbf16>
    %c0_i32_68 = arith.constant 0 : i32
    %238 = arith.addi %c0_i32_68, %c5_i32 : i32
    %239 = arith.index_cast %238 : i32 to index
    %c0_69 = arith.constant 0 : index
    %c0_70 = arith.constant 0 : index
    %240 = vector.load %arg19[%239, %c0_69, %c0_70] : memref<8x8x128xbf16, #tpu.memory_space<vmem>>, vector<1x8x128xbf16>
    %241 = vector.shape_cast %240 : vector<1x8x128xbf16> to vector<8x128xbf16>
    %242 = vector.shape_cast %237 : vector<8x128xbf16> to vector<1x8x128xbf16>
    tpu.vector_store %arg19[%239, %c0_69, %c0_70], %242 {strides = array<i32>} : memref<8x8x128xbf16, #tpu.memory_space<vmem>>, vector<1x8x128xbf16>,
    %c6_i32 = arith.constant 6 : i32
    %243 = arith.index_cast %c6_i32 : i32 to index
    %c0_71 = arith.constant 0 : index
    %c0_72 = arith.constant 0 : index
    %244 = vector.load %arg20[%243, %c0_71, %c0_72] : memref<8x8x512xbf16, #tpu.memory_space<vmem>>, vector<1x8x512xbf16>
    %245 = vector.shape_cast %244 : vector<1x8x512xbf16> to vector<8x512xbf16>
    %246 = arith.extf %245 : vector<8x512xbf16> to vector<8x512xf32>
    %247 = arith.truncf %236 : vector<8x128xf32> to vector<8x128xbf16>
    %cst_73 = arith.constant dense<0.000000e+00> : vector<8x512xf32>
    %248 = tpu.matmul %247, %1, %cst_73 {dimension_numbers = #tpu.dot_dimension_numbers<[1], [0], [0], [1], [0, 0, 1, 1], [], []>} : vector<8x128xbf16>, vector<128x512xbf16>, vector<8x512xf32> -> vector<8x512xf32>
    %249 = arith.addf %246, %248 : vector<8x512xf32>
    %250 = vector.extract_strided_slice %249 {offsets = [0, 0], sizes = [8, 128], strides = [1, 1]} : vector<8x512xf32> to vector<8x128xf32>
    %251 = arith.negf %250 : vector<8x128xf32>
    %252 = math.exp %251 : vector<8x128xf32>
    %cst_74 = arith.constant 1.000000e+00 : f32
    %253 = vector.broadcast %cst_74 : f32 to vector<8x128xf32>
    %254 = arith.addf %253, %252 : vector<8x128xf32>
    %255 = arith.divf %253, %254 : vector<8x128xf32>
    %256 = vector.extract_strided_slice %249 {offsets = [0, 128], sizes = [8, 128], strides = [1, 1]} : vector<8x512xf32> to vector<8x128xf32>
    %257 = arith.negf %256 : vector<8x128xf32>
    %258 = math.exp %257 : vector<8x128xf32>
    %cst_75 = arith.constant 1.000000e+00 : f32
    %259 = vector.broadcast %cst_75 : f32 to vector<8x128xf32>
    %260 = arith.addf %259, %258 : vector<8x128xf32>
    %261 = arith.divf %259, %260 : vector<8x128xf32>
    %262 = vector.extract_strided_slice %249 {offsets = [0, 256], sizes = [8, 128], strides = [1, 1]} : vector<8x512xf32> to vector<8x128xf32>
    %263 = math.tanh %262 : vector<8x128xf32>
    %264 = vector.extract_strided_slice %249 {offsets = [0, 384], sizes = [8, 128], strides = [1, 1]} : vector<8x512xf32> to vector<8x128xf32>
    %265 = arith.negf %264 : vector<8x128xf32>
    %266 = math.exp %265 : vector<8x128xf32>
    %cst_76 = arith.constant 1.000000e+00 : f32
    %267 = vector.broadcast %cst_76 : f32 to vector<8x128xf32>
    %268 = arith.addf %267, %266 : vector<8x128xf32>
    %269 = arith.divf %267, %268 : vector<8x128xf32>
    %270 = arith.mulf %261, %234 : vector<8x128xf32>
    %271 = arith.mulf %255, %263 : vector<8x128xf32>
    %272 = arith.addf %270, %271 : vector<8x128xf32>
    %273 = math.tanh %272 : vector<8x128xf32>
    %274 = arith.mulf %269, %273 : vector<8x128xf32>
    %275 = arith.truncf %274 : vector<8x128xf32> to vector<8x128xbf16>
    %c0_i32_77 = arith.constant 0 : i32
    %276 = arith.addi %c0_i32_77, %c6_i32 : i32
    %277 = arith.index_cast %276 : i32 to index
    %c0_78 = arith.constant 0 : index
    %c0_79 = arith.constant 0 : index
    %278 = vector.load %arg19[%277, %c0_78, %c0_79] : memref<8x8x128xbf16, #tpu.memory_space<vmem>>, vector<1x8x128xbf16>
    %279 = vector.shape_cast %278 : vector<1x8x128xbf16> to vector<8x128xbf16>
    %280 = vector.shape_cast %275 : vector<8x128xbf16> to vector<1x8x128xbf16>
    tpu.vector_store %arg19[%277, %c0_78, %c0_79], %280 {strides = array<i32>} : memref<8x8x128xbf16, #tpu.memory_space<vmem>>, vector<1x8x128xbf16>,
    %c7_i32 = arith.constant 7 : i32
    %281 = arith.index_cast %c7_i32 : i32 to index
    %c0_80 = arith.constant 0 : index
    %c0_81 = arith.constant 0 : index
    %282 = vector.load %arg20[%281, %c0_80, %c0_81] : memref<8x8x512xbf16, #tpu.memory_space<vmem>>, vector<1x8x512xbf16>
    %283 = vector.shape_cast %282 : vector<1x8x512xbf16> to vector<8x512xbf16>
    %284 = arith.extf %283 : vector<8x512xbf16> to vector<8x512xf32>
    %285 = arith.truncf %274 : vector<8x128xf32> to vector<8x128xbf16>
    %cst_82 = arith.constant dense<0.000000e+00> : vector<8x512xf32>
    %286 = tpu.matmul %285, %1, %cst_82 {dimension_numbers = #tpu.dot_dimension_numbers<[1], [0], [0], [1], [0, 0, 1, 1], [], []>} : vector<8x128xbf16>, vector<128x512xbf16>, vector<8x512xf32> -> vector<8x512xf32>
    %287 = arith.addf %284, %286 : vector<8x512xf32>
    %288 = vector.extract_strided_slice %287 {offsets = [0, 0], sizes = [8, 128], strides = [1, 1]} : vector<8x512xf32> to vector<8x128xf32>
    %289 = arith.negf %288 : vector<8x128xf32>
    %290 = math.exp %289 : vector<8x128xf32>
    %cst_83 = arith.constant 1.000000e+00 : f32
    %291 = vector.broadcast %cst_83 : f32 to vector<8x128xf32>
    %292 = arith.addf %291, %290 : vector<8x128xf32>
    %293 = arith.divf %291, %292 : vector<8x128xf32>
    %294 = vector.extract_strided_slice %287 {offsets = [0, 128], sizes = [8, 128], strides = [1, 1]} : vector<8x512xf32> to vector<8x128xf32>
    %295 = arith.negf %294 : vector<8x128xf32>
    %296 = math.exp %295 : vector<8x128xf32>
    %cst_84 = arith.constant 1.000000e+00 : f32
    %297 = vector.broadcast %cst_84 : f32 to vector<8x128xf32>
    %298 = arith.addf %297, %296 : vector<8x128xf32>
    %299 = arith.divf %297, %298 : vector<8x128xf32>
    %300 = vector.extract_strided_slice %287 {offsets = [0, 256], sizes = [8, 128], strides = [1, 1]} : vector<8x512xf32> to vector<8x128xf32>
    %301 = math.tanh %300 : vector<8x128xf32>
    %302 = vector.extract_strided_slice %287 {offsets = [0, 384], sizes = [8, 128], strides = [1, 1]} : vector<8x512xf32> to vector<8x128xf32>
    %303 = arith.negf %302 : vector<8x128xf32>
    %304 = math.exp %303 : vector<8x128xf32>
    %cst_85 = arith.constant 1.000000e+00 : f32
    %305 = vector.broadcast %cst_85 : f32 to vector<8x128xf32>
    %306 = arith.addf %305, %304 : vector<8x128xf32>
    %307 = arith.divf %305, %306 : vector<8x128xf32>
    %308 = arith.mulf %299, %272 : vector<8x128xf32>
    %309 = arith.mulf %293, %301 : vector<8x128xf32>
    %310 = arith.addf %308, %309 : vector<8x128xf32>
    %311 = math.tanh %310 : vector<8x128xf32>
    %312 = arith.mulf %307, %311 : vector<8x128xf32>
    %313 = arith.truncf %312 : vector<8x128xf32> to vector<8x128xbf16>
    %c0_i32_86 = arith.constant 0 : i32
    %314 = arith.addi %c0_i32_86, %c7_i32 : i32
    %315 = arith.index_cast %314 : i32 to index
    %c0_87 = arith.constant 0 : index
    %c0_88 = arith.constant 0 : index
    %316 = vector.load %arg19[%315, %c0_87, %c0_88] : memref<8x8x128xbf16, #tpu.memory_space<vmem>>, vector<1x8x128xbf16>
    %317 = vector.shape_cast %316 : vector<1x8x128xbf16> to vector<8x128xbf16>
    %318 = vector.shape_cast %313 : vector<8x128xbf16> to vector<1x8x128xbf16>
    tpu.vector_store %arg19[%315, %c0_87, %c0_88], %318 {strides = array<i32>} : memref<8x8x128xbf16, #tpu.memory_space<vmem>>, vector<1x8x128xbf16>,
    %c8_i32 = arith.constant 8 : i32
    %c0_89 = arith.constant 0 : index
    %c0_90 = arith.constant 0 : index
    %c0_91 = arith.constant 0 : index
    %319 = vector.load %arg17[%c0_89, %c0_90, %c0_91] : memref<2x8x128xf32, #tpu.memory_space<vmem>>, vector<1x8x128xf32>
    %320 = vector.shape_cast %319 : vector<1x8x128xf32> to vector<8x128xf32>
    %321 = vector.shape_cast %312 : vector<8x128xf32> to vector<1x8x128xf32>
    tpu.vector_store %arg17[%c0_89, %c0_90, %c0_91], %321 {strides = array<i32>} : memref<2x8x128xf32, #tpu.memory_space<vmem>>, vector<1x8x128xf32>,
    %c0_92 = arith.constant 0 : index
    %c0_93 = arith.constant 0 : index
    %c0_94 = arith.constant 0 : index
    %322 = vector.load %arg18[%c0_92, %c0_93, %c0_94] : memref<2x8x128xf32, #tpu.memory_space<vmem>>, vector<1x8x128xf32>
    %323 = vector.shape_cast %322 : vector<1x8x128xf32> to vector<8x128xf32>
    %324 = vector.shape_cast %310 : vector<8x128xf32> to vector<1x8x128xf32>
    tpu.vector_store %arg18[%c0_92, %c0_93, %c0_94], %324 {strides = array<i32>} : memref<2x8x128xf32, #tpu.memory_space<vmem>>, vector<1x8x128xf32>,
    %c0_95 = arith.constant 0 : index
    %c0_96 = arith.constant 0 : index
    %325 = vector.load %arg3[%c0_95, %c0_96] : memref<128x512xbf16, #tpu.memory_space<vmem>>, vector<128x512xbf16>
    %c0_97 = arith.constant 0 : index
    %c0_98 = arith.constant 0 : index
    %326 = vector.load %arg5[%c0_97, %c0_98] : memref<128x512xbf16, #tpu.memory_space<vmem>>, vector<128x512xbf16>
    %c0_99 = arith.constant 0 : index
    %c0_100 = arith.constant 0 : index
    %327 = vector.load %arg7[%c0_99, %c0_100] : memref<1x512xf32, #tpu.memory_space<vmem>>, vector<1x512xf32>
    %c0_101 = arith.constant 0 : index
    %c0_102 = arith.constant 0 : index
    %c0_103 = arith.constant 0 : index
    %328 = vector.load %arg19[%c0_101, %c0_102, %c0_103] : memref<8x8x128xbf16, #tpu.memory_space<vmem>>, vector<8x8x128xbf16>
    %329 = vector.shape_cast %328 : vector<8x8x128xbf16> to vector<64x128xbf16>
    %cst_104 = arith.constant dense<0.000000e+00> : vector<64x512xf32>
    %330 = tpu.matmul %329, %325, %cst_104 {dimension_numbers = #tpu.dot_dimension_numbers<[1], [0], [0], [1], [0, 0, 1, 1], [], []>} : vector<64x128xbf16>, vector<128x512xbf16>, vector<64x512xf32> -> vector<64x512xf32>
    %331 = vector.broadcast %327 : vector<1x512xf32> to vector<64x512xf32>
    %332 = arith.addf %330, %331 : vector<64x512xf32>
    %333 = vector.shape_cast %332 : vector<64x512xf32> to vector<8x8x512xf32>
    %334 = arith.truncf %333 : vector<8x8x512xf32> to vector<8x8x512xbf16>
    %c0_105 = arith.constant 0 : index
    %c0_106 = arith.constant 0 : index
    %c0_107 = arith.constant 0 : index
    %335 = vector.load %arg20[%c0_105, %c0_106, %c0_107] : memref<8x8x512xbf16, #tpu.memory_space<vmem>>, vector<8x8x512xbf16>
    tpu.vector_store %arg20[%c0_105, %c0_106, %c0_107], %334 {strides = array<i32>} : memref<8x8x512xbf16, #tpu.memory_space<vmem>>, vector<8x8x512xbf16>,
    %c1 = arith.constant 1 : index
    %c0_108 = arith.constant 0 : index
    %c0_109 = arith.constant 0 : index
    %336 = vector.load %arg14[%c1, %c0_108, %c0_109] : memref<2x8x128xf32, #tpu.memory_space<vmem>>, vector<1x8x128xf32>
    %337 = vector.shape_cast %336 : vector<1x8x128xf32> to vector<8x128xf32>
    %c1_110 = arith.constant 1 : index
    %c0_111 = arith.constant 0 : index
    %c0_112 = arith.constant 0 : index
    %338 = vector.load %arg15[%c1_110, %c0_111, %c0_112] : memref<2x8x128xf32, #tpu.memory_space<vmem>>, vector<1x8x128xf32>
    %339 = vector.shape_cast %338 : vector<1x8x128xf32> to vector<8x128xf32>
    %c0_i32_113 = arith.constant 0 : i32
    %340 = arith.index_cast %c0_i32_113 : i32 to index
    %c0_114 = arith.constant 0 : index
    %c0_115 = arith.constant 0 : index
    %341 = vector.load %arg20[%340, %c0_114, %c0_115] : memref<8x8x512xbf16, #tpu.memory_space<vmem>>, vector<1x8x512xbf16>
    %342 = vector.shape_cast %341 : vector<1x8x512xbf16> to vector<8x512xbf16>
    %343 = arith.extf %342 : vector<8x512xbf16> to vector<8x512xf32>
    %344 = arith.truncf %337 : vector<8x128xf32> to vector<8x128xbf16>
    %cst_116 = arith.constant dense<0.000000e+00> : vector<8x512xf32>
    %345 = tpu.matmul %344, %326, %cst_116 {dimension_numbers = #tpu.dot_dimension_numbers<[1], [0], [0], [1], [0, 0, 1, 1], [], []>} : vector<8x128xbf16>, vector<128x512xbf16>, vector<8x512xf32> -> vector<8x512xf32>
    %346 = arith.addf %343, %345 : vector<8x512xf32>
    %347 = vector.extract_strided_slice %346 {offsets = [0, 0], sizes = [8, 128], strides = [1, 1]} : vector<8x512xf32> to vector<8x128xf32>
    %348 = arith.negf %347 : vector<8x128xf32>
    %349 = math.exp %348 : vector<8x128xf32>
    %cst_117 = arith.constant 1.000000e+00 : f32
    %350 = vector.broadcast %cst_117 : f32 to vector<8x128xf32>
    %351 = arith.addf %350, %349 : vector<8x128xf32>
    %352 = arith.divf %350, %351 : vector<8x128xf32>
    %353 = vector.extract_strided_slice %346 {offsets = [0, 128], sizes = [8, 128], strides = [1, 1]} : vector<8x512xf32> to vector<8x128xf32>
    %354 = arith.negf %353 : vector<8x128xf32>
    %355 = math.exp %354 : vector<8x128xf32>
    %cst_118 = arith.constant 1.000000e+00 : f32
    %356 = vector.broadcast %cst_118 : f32 to vector<8x128xf32>
    %357 = arith.addf %356, %355 : vector<8x128xf32>
    %358 = arith.divf %356, %357 : vector<8x128xf32>
    %359 = vector.extract_strided_slice %346 {offsets = [0, 256], sizes = [8, 128], strides = [1, 1]} : vector<8x512xf32> to vector<8x128xf32>
    %360 = math.tanh %359 : vector<8x128xf32>
    %361 = vector.extract_strided_slice %346 {offsets = [0, 384], sizes = [8, 128], strides = [1, 1]} : vector<8x512xf32> to vector<8x128xf32>
    %362 = arith.negf %361 : vector<8x128xf32>
    %363 = math.exp %362 : vector<8x128xf32>
    %cst_119 = arith.constant 1.000000e+00 : f32
    %364 = vector.broadcast %cst_119 : f32 to vector<8x128xf32>
    %365 = arith.addf %364, %363 : vector<8x128xf32>
    %366 = arith.divf %364, %365 : vector<8x128xf32>
    %367 = arith.mulf %358, %339 : vector<8x128xf32>
    %368 = arith.mulf %352, %360 : vector<8x128xf32>
    %369 = arith.addf %367, %368 : vector<8x128xf32>
    %370 = math.tanh %369 : vector<8x128xf32>
    %371 = arith.mulf %366, %370 : vector<8x128xf32>
    %c1_i32_120 = arith.constant 1 : i32
    %372 = arith.index_cast %c1_i32_120 : i32 to index
    %c0_121 = arith.constant 0 : index
    %c0_122 = arith.constant 0 : index
    %373 = vector.load %arg20[%372, %c0_121, %c0_122] : memref<8x8x512xbf16, #tpu.memory_space<vmem>>, vector<1x8x512xbf16>
    %374 = vector.shape_cast %373 : vector<1x8x512xbf16> to vector<8x512xbf16>
    %375 = arith.extf %374 : vector<8x512xbf16> to vector<8x512xf32>
    %376 = arith.truncf %371 : vector<8x128xf32> to vector<8x128xbf16>
    %cst_123 = arith.constant dense<0.000000e+00> : vector<8x512xf32>
    %377 = tpu.matmul %376, %326, %cst_123 {dimension_numbers = #tpu.dot_dimension_numbers<[1], [0], [0], [1], [0, 0, 1, 1], [], []>} : vector<8x128xbf16>, vector<128x512xbf16>, vector<8x512xf32> -> vector<8x512xf32>
    %378 = arith.addf %375, %377 : vector<8x512xf32>
    %379 = vector.extract_strided_slice %378 {offsets = [0, 0], sizes = [8, 128], strides = [1, 1]} : vector<8x512xf32> to vector<8x128xf32>
    %380 = arith.negf %379 : vector<8x128xf32>
    %381 = math.exp %380 : vector<8x128xf32>
    %cst_124 = arith.constant 1.000000e+00 : f32
    %382 = vector.broadcast %cst_124 : f32 to vector<8x128xf32>
    %383 = arith.addf %382, %381 : vector<8x128xf32>
    %384 = arith.divf %382, %383 : vector<8x128xf32>
    %385 = vector.extract_strided_slice %378 {offsets = [0, 128], sizes = [8, 128], strides = [1, 1]} : vector<8x512xf32> to vector<8x128xf32>
    %386 = arith.negf %385 : vector<8x128xf32>
    %387 = math.exp %386 : vector<8x128xf32>
    %cst_125 = arith.constant 1.000000e+00 : f32
    %388 = vector.broadcast %cst_125 : f32 to vector<8x128xf32>
    %389 = arith.addf %388, %387 : vector<8x128xf32>
    %390 = arith.divf %388, %389 : vector<8x128xf32>
    %391 = vector.extract_strided_slice %378 {offsets = [0, 256], sizes = [8, 128], strides = [1, 1]} : vector<8x512xf32> to vector<8x128xf32>
    %392 = math.tanh %391 : vector<8x128xf32>
    %393 = vector.extract_strided_slice %378 {offsets = [0, 384], sizes = [8, 128], strides = [1, 1]} : vector<8x512xf32> to vector<8x128xf32>
    %394 = arith.negf %393 : vector<8x128xf32>
    %395 = math.exp %394 : vector<8x128xf32>
    %cst_126 = arith.constant 1.000000e+00 : f32
    %396 = vector.broadcast %cst_126 : f32 to vector<8x128xf32>
    %397 = arith.addf %396, %395 : vector<8x128xf32>
    %398 = arith.divf %396, %397 : vector<8x128xf32>
    %399 = arith.mulf %390, %369 : vector<8x128xf32>
    %400 = arith.mulf %384, %392 : vector<8x128xf32>
    %401 = arith.addf %399, %400 : vector<8x128xf32>
    %402 = math.tanh %401 : vector<8x128xf32>
    %403 = arith.mulf %398, %402 : vector<8x128xf32>
    %c2_i32_127 = arith.constant 2 : i32
    %404 = arith.index_cast %c2_i32_127 : i32 to index
    %c0_128 = arith.constant 0 : index
    %c0_129 = arith.constant 0 : index
    %405 = vector.load %arg20[%404, %c0_128, %c0_129] : memref<8x8x512xbf16, #tpu.memory_space<vmem>>, vector<1x8x512xbf16>
    %406 = vector.shape_cast %405 : vector<1x8x512xbf16> to vector<8x512xbf16>
    %407 = arith.extf %406 : vector<8x512xbf16> to vector<8x512xf32>
    %408 = arith.truncf %403 : vector<8x128xf32> to vector<8x128xbf16>
    %cst_130 = arith.constant dense<0.000000e+00> : vector<8x512xf32>
    %409 = tpu.matmul %408, %326, %cst_130 {dimension_numbers = #tpu.dot_dimension_numbers<[1], [0], [0], [1], [0, 0, 1, 1], [], []>} : vector<8x128xbf16>, vector<128x512xbf16>, vector<8x512xf32> -> vector<8x512xf32>
    %410 = arith.addf %407, %409 : vector<8x512xf32>
    %411 = vector.extract_strided_slice %410 {offsets = [0, 0], sizes = [8, 128], strides = [1, 1]} : vector<8x512xf32> to vector<8x128xf32>
    %412 = arith.negf %411 : vector<8x128xf32>
    %413 = math.exp %412 : vector<8x128xf32>
    %cst_131 = arith.constant 1.000000e+00 : f32
    %414 = vector.broadcast %cst_131 : f32 to vector<8x128xf32>
    %415 = arith.addf %414, %413 : vector<8x128xf32>
    %416 = arith.divf %414, %415 : vector<8x128xf32>
    %417 = vector.extract_strided_slice %410 {offsets = [0, 128], sizes = [8, 128], strides = [1, 1]} : vector<8x512xf32> to vector<8x128xf32>
    %418 = arith.negf %417 : vector<8x128xf32>
    %419 = math.exp %418 : vector<8x128xf32>
    %cst_132 = arith.constant 1.000000e+00 : f32
    %420 = vector.broadcast %cst_132 : f32 to vector<8x128xf32>
    %421 = arith.addf %420, %419 : vector<8x128xf32>
    %422 = arith.divf %420, %421 : vector<8x128xf32>
    %423 = vector.extract_strided_slice %410 {offsets = [0, 256], sizes = [8, 128], strides = [1, 1]} : vector<8x512xf32> to vector<8x128xf32>
    %424 = math.tanh %423 : vector<8x128xf32>
    %425 = vector.extract_strided_slice %410 {offsets = [0, 384], sizes = [8, 128], strides = [1, 1]} : vector<8x512xf32> to vector<8x128xf32>
    %426 = arith.negf %425 : vector<8x128xf32>
    %427 = math.exp %426 : vector<8x128xf32>
    %cst_133 = arith.constant 1.000000e+00 : f32
    %428 = vector.broadcast %cst_133 : f32 to vector<8x128xf32>
    %429 = arith.addf %428, %427 : vector<8x128xf32>
    %430 = arith.divf %428, %429 : vector<8x128xf32>
    %431 = arith.mulf %422, %401 : vector<8x128xf32>
    %432 = arith.mulf %416, %424 : vector<8x128xf32>
    %433 = arith.addf %431, %432 : vector<8x128xf32>
    %434 = math.tanh %433 : vector<8x128xf32>
    %435 = arith.mulf %430, %434 : vector<8x128xf32>
    %c3_i32_134 = arith.constant 3 : i32
    %436 = arith.index_cast %c3_i32_134 : i32 to index
    %c0_135 = arith.constant 0 : index
    %c0_136 = arith.constant 0 : index
    %437 = vector.load %arg20[%436, %c0_135, %c0_136] : memref<8x8x512xbf16, #tpu.memory_space<vmem>>, vector<1x8x512xbf16>
    %438 = vector.shape_cast %437 : vector<1x8x512xbf16> to vector<8x512xbf16>
    %439 = arith.extf %438 : vector<8x512xbf16> to vector<8x512xf32>
    %440 = arith.truncf %435 : vector<8x128xf32> to vector<8x128xbf16>
    %cst_137 = arith.constant dense<0.000000e+00> : vector<8x512xf32>
    %441 = tpu.matmul %440, %326, %cst_137 {dimension_numbers = #tpu.dot_dimension_numbers<[1], [0], [0], [1], [0, 0, 1, 1], [], []>} : vector<8x128xbf16>, vector<128x512xbf16>, vector<8x512xf32> -> vector<8x512xf32>
    %442 = arith.addf %439, %441 : vector<8x512xf32>
    %443 = vector.extract_strided_slice %442 {offsets = [0, 0], sizes = [8, 128], strides = [1, 1]} : vector<8x512xf32> to vector<8x128xf32>
    %444 = arith.negf %443 : vector<8x128xf32>
    %445 = math.exp %444 : vector<8x128xf32>
    %cst_138 = arith.constant 1.000000e+00 : f32
    %446 = vector.broadcast %cst_138 : f32 to vector<8x128xf32>
    %447 = arith.addf %446, %445 : vector<8x128xf32>
    %448 = arith.divf %446, %447 : vector<8x128xf32>
    %449 = vector.extract_strided_slice %442 {offsets = [0, 128], sizes = [8, 128], strides = [1, 1]} : vector<8x512xf32> to vector<8x128xf32>
    %450 = arith.negf %449 : vector<8x128xf32>
    %451 = math.exp %450 : vector<8x128xf32>
    %cst_139 = arith.constant 1.000000e+00 : f32
    %452 = vector.broadcast %cst_139 : f32 to vector<8x128xf32>
    %453 = arith.addf %452, %451 : vector<8x128xf32>
    %454 = arith.divf %452, %453 : vector<8x128xf32>
    %455 = vector.extract_strided_slice %442 {offsets = [0, 256], sizes = [8, 128], strides = [1, 1]} : vector<8x512xf32> to vector<8x128xf32>
    %456 = math.tanh %455 : vector<8x128xf32>
    %457 = vector.extract_strided_slice %442 {offsets = [0, 384], sizes = [8, 128], strides = [1, 1]} : vector<8x512xf32> to vector<8x128xf32>
    %458 = arith.negf %457 : vector<8x128xf32>
    %459 = math.exp %458 : vector<8x128xf32>
    %cst_140 = arith.constant 1.000000e+00 : f32
    %460 = vector.broadcast %cst_140 : f32 to vector<8x128xf32>
    %461 = arith.addf %460, %459 : vector<8x128xf32>
    %462 = arith.divf %460, %461 : vector<8x128xf32>
    %463 = arith.mulf %454, %433 : vector<8x128xf32>
    %464 = arith.mulf %448, %456 : vector<8x128xf32>
    %465 = arith.addf %463, %464 : vector<8x128xf32>
    %466 = math.tanh %465 : vector<8x128xf32>
    %467 = arith.mulf %462, %466 : vector<8x128xf32>
    %c4_i32_141 = arith.constant 4 : i32
    %468 = arith.index_cast %c4_i32_141 : i32 to index
    %c0_142 = arith.constant 0 : index
    %c0_143 = arith.constant 0 : index
    %469 = vector.load %arg20[%468, %c0_142, %c0_143] : memref<8x8x512xbf16, #tpu.memory_space<vmem>>, vector<1x8x512xbf16>
    %470 = vector.shape_cast %469 : vector<1x8x512xbf16> to vector<8x512xbf16>
    %471 = arith.extf %470 : vector<8x512xbf16> to vector<8x512xf32>
    %472 = arith.truncf %467 : vector<8x128xf32> to vector<8x128xbf16>
    %cst_144 = arith.constant dense<0.000000e+00> : vector<8x512xf32>
    %473 = tpu.matmul %472, %326, %cst_144 {dimension_numbers = #tpu.dot_dimension_numbers<[1], [0], [0], [1], [0, 0, 1, 1], [], []>} : vector<8x128xbf16>, vector<128x512xbf16>, vector<8x512xf32> -> vector<8x512xf32>
    %474 = arith.addf %471, %473 : vector<8x512xf32>
    %475 = vector.extract_strided_slice %474 {offsets = [0, 0], sizes = [8, 128], strides = [1, 1]} : vector<8x512xf32> to vector<8x128xf32>
    %476 = arith.negf %475 : vector<8x128xf32>
    %477 = math.exp %476 : vector<8x128xf32>
    %cst_145 = arith.constant 1.000000e+00 : f32
    %478 = vector.broadcast %cst_145 : f32 to vector<8x128xf32>
    %479 = arith.addf %478, %477 : vector<8x128xf32>
    %480 = arith.divf %478, %479 : vector<8x128xf32>
    %481 = vector.extract_strided_slice %474 {offsets = [0, 128], sizes = [8, 128], strides = [1, 1]} : vector<8x512xf32> to vector<8x128xf32>
    %482 = arith.negf %481 : vector<8x128xf32>
    %483 = math.exp %482 : vector<8x128xf32>
    %cst_146 = arith.constant 1.000000e+00 : f32
    %484 = vector.broadcast %cst_146 : f32 to vector<8x128xf32>
    %485 = arith.addf %484, %483 : vector<8x128xf32>
    %486 = arith.divf %484, %485 : vector<8x128xf32>
    %487 = vector.extract_strided_slice %474 {offsets = [0, 256], sizes = [8, 128], strides = [1, 1]} : vector<8x512xf32> to vector<8x128xf32>
    %488 = math.tanh %487 : vector<8x128xf32>
    %489 = vector.extract_strided_slice %474 {offsets = [0, 384], sizes = [8, 128], strides = [1, 1]} : vector<8x512xf32> to vector<8x128xf32>
    %490 = arith.negf %489 : vector<8x128xf32>
    %491 = math.exp %490 : vector<8x128xf32>
    %cst_147 = arith.constant 1.000000e+00 : f32
    %492 = vector.broadcast %cst_147 : f32 to vector<8x128xf32>
    %493 = arith.addf %492, %491 : vector<8x128xf32>
    %494 = arith.divf %492, %493 : vector<8x128xf32>
    %495 = arith.mulf %486, %465 : vector<8x128xf32>
    %496 = arith.mulf %480, %488 : vector<8x128xf32>
    %497 = arith.addf %495, %496 : vector<8x128xf32>
    %498 = math.tanh %497 : vector<8x128xf32>
    %499 = arith.mulf %494, %498 : vector<8x128xf32>
    %c5_i32_148 = arith.constant 5 : i32
    %500 = arith.index_cast %c5_i32_148 : i32 to index
    %c0_149 = arith.constant 0 : index
    %c0_150 = arith.constant 0 : index
    %501 = vector.load %arg20[%500, %c0_149, %c0_150] : memref<8x8x512xbf16, #tpu.memory_space<vmem>>, vector<1x8x512xbf16>
    %502 = vector.shape_cast %501 : vector<1x8x512xbf16> to vector<8x512xbf16>
    %503 = arith.extf %502 : vector<8x512xbf16> to vector<8x512xf32>
    %504 = arith.truncf %499 : vector<8x128xf32> to vector<8x128xbf16>
    %cst_151 = arith.constant dense<0.000000e+00> : vector<8x512xf32>
    %505 = tpu.matmul %504, %326, %cst_151 {dimension_numbers = #tpu.dot_dimension_numbers<[1], [0], [0], [1], [0, 0, 1, 1], [], []>} : vector<8x128xbf16>, vector<128x512xbf16>, vector<8x512xf32> -> vector<8x512xf32>
    %506 = arith.addf %503, %505 : vector<8x512xf32>
    %507 = vector.extract_strided_slice %506 {offsets = [0, 0], sizes = [8, 128], strides = [1, 1]} : vector<8x512xf32> to vector<8x128xf32>
    %508 = arith.negf %507 : vector<8x128xf32>
    %509 = math.exp %508 : vector<8x128xf32>
    %cst_152 = arith.constant 1.000000e+00 : f32
    %510 = vector.broadcast %cst_152 : f32 to vector<8x128xf32>
    %511 = arith.addf %510, %509 : vector<8x128xf32>
    %512 = arith.divf %510, %511 : vector<8x128xf32>
    %513 = vector.extract_strided_slice %506 {offsets = [0, 128], sizes = [8, 128], strides = [1, 1]} : vector<8x512xf32> to vector<8x128xf32>
    %514 = arith.negf %513 : vector<8x128xf32>
    %515 = math.exp %514 : vector<8x128xf32>
    %cst_153 = arith.constant 1.000000e+00 : f32
    %516 = vector.broadcast %cst_153 : f32 to vector<8x128xf32>
    %517 = arith.addf %516, %515 : vector<8x128xf32>
    %518 = arith.divf %516, %517 : vector<8x128xf32>
    %519 = vector.extract_strided_slice %506 {offsets = [0, 256], sizes = [8, 128], strides = [1, 1]} : vector<8x512xf32> to vector<8x128xf32>
    %520 = math.tanh %519 : vector<8x128xf32>
    %521 = vector.extract_strided_slice %506 {offsets = [0, 384], sizes = [8, 128], strides = [1, 1]} : vector<8x512xf32> to vector<8x128xf32>
    %522 = arith.negf %521 : vector<8x128xf32>
    %523 = math.exp %522 : vector<8x128xf32>
    %cst_154 = arith.constant 1.000000e+00 : f32
    %524 = vector.broadcast %cst_154 : f32 to vector<8x128xf32>
    %525 = arith.addf %524, %523 : vector<8x128xf32>
    %526 = arith.divf %524, %525 : vector<8x128xf32>
    %527 = arith.mulf %518, %497 : vector<8x128xf32>
    %528 = arith.mulf %512, %520 : vector<8x128xf32>
    %529 = arith.addf %527, %528 : vector<8x128xf32>
    %530 = math.tanh %529 : vector<8x128xf32>
    %531 = arith.mulf %526, %530 : vector<8x128xf32>
    %c6_i32_155 = arith.constant 6 : i32
    %532 = arith.index_cast %c6_i32_155 : i32 to index
    %c0_156 = arith.constant 0 : index
    %c0_157 = arith.constant 0 : index
    %533 = vector.load %arg20[%532, %c0_156, %c0_157] : memref<8x8x512xbf16, #tpu.memory_space<vmem>>, vector<1x8x512xbf16>
    %534 = vector.shape_cast %533 : vector<1x8x512xbf16> to vector<8x512xbf16>
    %535 = arith.extf %534 : vector<8x512xbf16> to vector<8x512xf32>
    %536 = arith.truncf %531 : vector<8x128xf32> to vector<8x128xbf16>
    %cst_158 = arith.constant dense<0.000000e+00> : vector<8x512xf32>
    %537 = tpu.matmul %536, %326, %cst_158 {dimension_numbers = #tpu.dot_dimension_numbers<[1], [0], [0], [1], [0, 0, 1, 1], [], []>} : vector<8x128xbf16>, vector<128x512xbf16>, vector<8x512xf32> -> vector<8x512xf32>
    %538 = arith.addf %535, %537 : vector<8x512xf32>
    %539 = vector.extract_strided_slice %538 {offsets = [0, 0], sizes = [8, 128], strides = [1, 1]} : vector<8x512xf32> to vector<8x128xf32>
    %540 = arith.negf %539 : vector<8x128xf32>
    %541 = math.exp %540 : vector<8x128xf32>
    %cst_159 = arith.constant 1.000000e+00 : f32
    %542 = vector.broadcast %cst_159 : f32 to vector<8x128xf32>
    %543 = arith.addf %542, %541 : vector<8x128xf32>
    %544 = arith.divf %542, %543 : vector<8x128xf32>
    %545 = vector.extract_strided_slice %538 {offsets = [0, 128], sizes = [8, 128], strides = [1, 1]} : vector<8x512xf32> to vector<8x128xf32>
    %546 = arith.negf %545 : vector<8x128xf32>
    %547 = math.exp %546 : vector<8x128xf32>
    %cst_160 = arith.constant 1.000000e+00 : f32
    %548 = vector.broadcast %cst_160 : f32 to vector<8x128xf32>
    %549 = arith.addf %548, %547 : vector<8x128xf32>
    %550 = arith.divf %548, %549 : vector<8x128xf32>
    %551 = vector.extract_strided_slice %538 {offsets = [0, 256], sizes = [8, 128], strides = [1, 1]} : vector<8x512xf32> to vector<8x128xf32>
    %552 = math.tanh %551 : vector<8x128xf32>
    %553 = vector.extract_strided_slice %538 {offsets = [0, 384], sizes = [8, 128], strides = [1, 1]} : vector<8x512xf32> to vector<8x128xf32>
    %554 = arith.negf %553 : vector<8x128xf32>
    %555 = math.exp %554 : vector<8x128xf32>
    %cst_161 = arith.constant 1.000000e+00 : f32
    %556 = vector.broadcast %cst_161 : f32 to vector<8x128xf32>
    %557 = arith.addf %556, %555 : vector<8x128xf32>
    %558 = arith.divf %556, %557 : vector<8x128xf32>
    %559 = arith.mulf %550, %529 : vector<8x128xf32>
    %560 = arith.mulf %544, %552 : vector<8x128xf32>
    %561 = arith.addf %559, %560 : vector<8x128xf32>
    %562 = math.tanh %561 : vector<8x128xf32>
    %563 = arith.mulf %558, %562 : vector<8x128xf32>
    %c7_i32_162 = arith.constant 7 : i32
    %564 = arith.index_cast %c7_i32_162 : i32 to index
    %c0_163 = arith.constant 0 : index
    %c0_164 = arith.constant 0 : index
    %565 = vector.load %arg20[%564, %c0_163, %c0_164] : memref<8x8x512xbf16, #tpu.memory_space<vmem>>, vector<1x8x512xbf16>
    %566 = vector.shape_cast %565 : vector<1x8x512xbf16> to vector<8x512xbf16>
    %567 = arith.extf %566 : vector<8x512xbf16> to vector<8x512xf32>
    %568 = arith.truncf %563 : vector<8x128xf32> to vector<8x128xbf16>
    %cst_165 = arith.constant dense<0.000000e+00> : vector<8x512xf32>
    %569 = tpu.matmul %568, %326, %cst_165 {dimension_numbers = #tpu.dot_dimension_numbers<[1], [0], [0], [1], [0, 0, 1, 1], [], []>} : vector<8x128xbf16>, vector<128x512xbf16>, vector<8x512xf32> -> vector<8x512xf32>
    %570 = arith.addf %567, %569 : vector<8x512xf32>
    %571 = vector.extract_strided_slice %570 {offsets = [0, 0], sizes = [8, 128], strides = [1, 1]} : vector<8x512xf32> to vector<8x128xf32>
    %572 = arith.negf %571 : vector<8x128xf32>
    %573 = math.exp %572 : vector<8x128xf32>
    %cst_166 = arith.constant 1.000000e+00 : f32
    %574 = vector.broadcast %cst_166 : f32 to vector<8x128xf32>
    %575 = arith.addf %574, %573 : vector<8x128xf32>
    %576 = arith.divf %574, %575 : vector<8x128xf32>
    %577 = vector.extract_strided_slice %570 {offsets = [0, 128], sizes = [8, 128], strides = [1, 1]} : vector<8x512xf32> to vector<8x128xf32>
    %578 = arith.negf %577 : vector<8x128xf32>
    %579 = math.exp %578 : vector<8x128xf32>
    %cst_167 = arith.constant 1.000000e+00 : f32
    %580 = vector.broadcast %cst_167 : f32 to vector<8x128xf32>
    %581 = arith.addf %580, %579 : vector<8x128xf32>
    %582 = arith.divf %580, %581 : vector<8x128xf32>
    %583 = vector.extract_strided_slice %570 {offsets = [0, 256], sizes = [8, 128], strides = [1, 1]} : vector<8x512xf32> to vector<8x128xf32>
    %584 = math.tanh %583 : vector<8x128xf32>
    %585 = vector.extract_strided_slice %570 {offsets = [0, 384], sizes = [8, 128], strides = [1, 1]} : vector<8x512xf32> to vector<8x128xf32>
    %586 = arith.negf %585 : vector<8x128xf32>
    %587 = math.exp %586 : vector<8x128xf32>
    %cst_168 = arith.constant 1.000000e+00 : f32
    %588 = vector.broadcast %cst_168 : f32 to vector<8x128xf32>
    %589 = arith.addf %588, %587 : vector<8x128xf32>
    %590 = arith.divf %588, %589 : vector<8x128xf32>
    %591 = arith.mulf %582, %561 : vector<8x128xf32>
    %592 = arith.mulf %576, %584 : vector<8x128xf32>
    %593 = arith.addf %591, %592 : vector<8x128xf32>
    %594 = math.tanh %593 : vector<8x128xf32>
    %595 = arith.mulf %590, %594 : vector<8x128xf32>
    %c8_i32_169 = arith.constant 8 : i32
    %c1_170 = arith.constant 1 : index
    %c0_171 = arith.constant 0 : index
    %c0_172 = arith.constant 0 : index
    %596 = vector.load %arg17[%c1_170, %c0_171, %c0_172] : memref<2x8x128xf32, #tpu.memory_space<vmem>>, vector<1x8x128xf32>
    %597 = vector.shape_cast %596 : vector<1x8x128xf32> to vector<8x128xf32>
    %598 = vector.shape_cast %595 : vector<8x128xf32> to vector<1x8x128xf32>
    tpu.vector_store %arg17[%c1_170, %c0_171, %c0_172], %598 {strides = array<i32>} : memref<2x8x128xf32, #tpu.memory_space<vmem>>, vector<1x8x128xf32>,
    %c1_173 = arith.constant 1 : index
    %c0_174 = arith.constant 0 : index
    %c0_175 = arith.constant 0 : index
    %599 = vector.load %arg18[%c1_173, %c0_174, %c0_175] : memref<2x8x128xf32, #tpu.memory_space<vmem>>, vector<1x8x128xf32>
    %600 = vector.shape_cast %599 : vector<1x8x128xf32> to vector<8x128xf32>
    %601 = vector.shape_cast %593 : vector<8x128xf32> to vector<1x8x128xf32>
    tpu.vector_store %arg18[%c1_173, %c0_174, %c0_175], %601 {strides = array<i32>} : memref<2x8x128xf32, #tpu.memory_space<vmem>>, vector<1x8x128xf32>,
    %c0_176 = arith.constant 0 : index
    %c0_177 = arith.constant 0 : index
    %602 = vector.load %arg10[%c0_176, %c0_177] : memref<1x128xf32, #tpu.memory_space<vmem>>, vector<1x128xf32>
    %603 = vector.broadcast %602 : vector<1x128xf32> to vector<8x128xf32>
    %604 = arith.subf %595, %603 : vector<8x128xf32>
    %c0_178 = arith.constant 0 : index
    %c0_179 = arith.constant 0 : index
    %605 = vector.load %arg11[%c0_178, %c0_179] : memref<1x128xf32, #tpu.memory_space<vmem>>, vector<1x128xf32>
    %cst_180 = arith.constant 9.99999974E-6 : f32
    %606 = vector.broadcast %cst_180 : f32 to vector<1x128xf32>
    %607 = arith.addf %605, %606 : vector<1x128xf32>
    %608 = math.rsqrt %607 : vector<1x128xf32>
    %609 = vector.broadcast %608 : vector<1x128xf32> to vector<8x128xf32>
    %610 = arith.mulf %604, %609 : vector<8x128xf32>
    %c0_181 = arith.constant 0 : index
    %c0_182 = arith.constant 0 : index
    %611 = vector.load %arg8[%c0_181, %c0_182] : memref<1x128xf32, #tpu.memory_space<vmem>>, vector<1x128xf32>
    %612 = vector.broadcast %611 : vector<1x128xf32> to vector<8x128xf32>
    %613 = arith.mulf %610, %612 : vector<8x128xf32>
    %c0_183 = arith.constant 0 : index
    %c0_184 = arith.constant 0 : index
    %614 = vector.load %arg9[%c0_183, %c0_184] : memref<1x128xf32, #tpu.memory_space<vmem>>, vector<1x128xf32>
    %615 = vector.broadcast %614 : vector<1x128xf32> to vector<8x128xf32>
    %616 = arith.addf %613, %615 : vector<8x128xf32>
    %c0_185 = arith.constant 0 : index
    %c0_186 = arith.constant 0 : index
    %617 = vector.load %arg12[%c0_185, %c0_186] : memref<128x128xf32, #tpu.memory_space<vmem>>, vector<128x128xf32>
    %cst_187 = arith.constant dense<0.000000e+00> : vector<8x128xf32>
    %618 = tpu.matmul %616, %617, %cst_187 {dimension_numbers = #tpu.dot_dimension_numbers<[1], [0], [0], [1], [0, 0, 1, 1], [], []>} : vector<8x128xf32>, vector<128x128xf32>, vector<8x128xf32> -> vector<8x128xf32>
    %c0_188 = arith.constant 0 : index
    %c0_189 = arith.constant 0 : index
    %619 = vector.load %arg13[%c0_188, %c0_189] : memref<1x128xf32, #tpu.memory_space<vmem>>, vector<1x128xf32>
    %620 = vector.broadcast %619 : vector<1x128xf32> to vector<8x128xf32>
    %621 = arith.addf %618, %620 : vector<8x128xf32>
    %c0_190 = arith.constant 0 : index
    %c0_191 = arith.constant 0 : index
    %622 = vector.load %arg16[%c0_190, %c0_191] : memref<8x128xf32, #tpu.memory_space<vmem>>, vector<8x128xf32>
    tpu.vector_store %arg16[%c0_190, %c0_191], %621 {strides = array<i32>} : memref<8x128xf32, #tpu.memory_space<vmem>>, vector<8x128xf32>,
    return
  }
  func.func @transform_0(%arg0: i32) -> (i32, i32, i32) {
    %c0_i32 = arith.constant 0 : i32
    %c0_i32_0 = arith.constant 0 : i32
    %c0_i32_1 = arith.constant 0 : i32
    return %c0_i32, %arg0, %c0_i32_0 : i32, i32, i32
  }
  func.func @transform_1(%arg0: i32) -> (i32, i32) {
    %c0_i32 = arith.constant 0 : i32
    %c0_i32_0 = arith.constant 0 : i32
    %c0_i32_1 = arith.constant 0 : i32
    return %c0_i32, %c0_i32_0 : i32, i32
  }
  func.func @transform_2(%arg0: i32) -> (i32, i32) {
    %c0_i32 = arith.constant 0 : i32
    %c0_i32_0 = arith.constant 0 : i32
    %c0_i32_1 = arith.constant 0 : i32
    return %c0_i32, %c0_i32_0 : i32, i32
  }
  func.func @transform_3(%arg0: i32) -> (i32, i32) {
    %c0_i32 = arith.constant 0 : i32
    %c0_i32_0 = arith.constant 0 : i32
    %c0_i32_1 = arith.constant 0 : i32
    return %c0_i32, %c0_i32_0 : i32, i32
  }
  func.func @transform_4(%arg0: i32) -> (i32, i32) {
    %c0_i32 = arith.constant 0 : i32
    %c0_i32_0 = arith.constant 0 : i32
    %c0_i32_1 = arith.constant 0 : i32
    return %c0_i32, %c0_i32_0 : i32, i32
  }
  func.func @transform_5(%arg0: i32) -> (i32, i32) {
    %c0_i32 = arith.constant 0 : i32
    %c0_i32_0 = arith.constant 0 : i32
    %c0_i32_1 = arith.constant 0 : i32
    return %c0_i32, %c0_i32_0 : i32, i32
  }
  func.func @transform_6(%arg0: i32) -> (i32, i32) {
    %c0_i32 = arith.constant 0 : i32
    %c0_i32_0 = arith.constant 0 : i32
    %c0_i32_1 = arith.constant 0 : i32
    return %c0_i32, %c0_i32_0 : i32, i32
  }
  func.func @transform_7(%arg0: i32) -> (i32, i32) {
    %c0_i32 = arith.constant 0 : i32
    %c0_i32_0 = arith.constant 0 : i32
    %c0_i32_1 = arith.constant 0 : i32
    return %c0_i32, %c0_i32_0 : i32, i32
  }
  func.func @transform_8(%arg0: i32) -> (i32, i32) {
    %c0_i32 = arith.constant 0 : i32
    %c0_i32_0 = arith.constant 0 : i32
    %c0_i32_1 = arith.constant 0 : i32
    return %c0_i32, %c0_i32_0 : i32, i32
  }
  func.func @transform_9(%arg0: i32) -> (i32, i32) {
    %c0_i32 = arith.constant 0 : i32
    %c0_i32_0 = arith.constant 0 : i32
    %c0_i32_1 = arith.constant 0 : i32
    return %c0_i32, %c0_i32_0 : i32, i32
  }
  func.func @transform_10(%arg0: i32) -> (i32, i32) {
    %c0_i32 = arith.constant 0 : i32
    %c0_i32_0 = arith.constant 0 : i32
    %c0_i32_1 = arith.constant 0 : i32
    return %c0_i32, %c0_i32_0 : i32, i32
  }
  func.func @transform_11(%arg0: i32) -> (i32, i32) {
    %c0_i32 = arith.constant 0 : i32
    %c0_i32_0 = arith.constant 0 : i32
    %c0_i32_1 = arith.constant 0 : i32
    return %c0_i32, %c0_i32_0 : i32, i32
  }
  func.func @transform_12(%arg0: i32) -> (i32, i32) {
    %c0_i32 = arith.constant 0 : i32
    %c0_i32_0 = arith.constant 0 : i32
    %c0_i32_1 = arith.constant 0 : i32
    return %c0_i32, %c0_i32_0 : i32, i32
  }
  func.func @transform_13(%arg0: i32) -> (i32, i32, i32) {
    %c0_i32 = arith.constant 0 : i32
    %c0_i32_0 = arith.constant 0 : i32
    %c0_i32_1 = arith.constant 0 : i32
    return %c0_i32, %arg0, %c0_i32_0 : i32, i32, i32
  }
  func.func @transform_14(%arg0: i32) -> (i32, i32, i32) {
    %c0_i32 = arith.constant 0 : i32
    %c0_i32_0 = arith.constant 0 : i32
    %c0_i32_1 = arith.constant 0 : i32
    return %c0_i32, %arg0, %c0_i32_0 : i32, i32, i32
  }
  func.func @transform_15(%arg0: i32) -> (i32, i32) {
    %c0_i32 = arith.constant 0 : i32
    %c0_i32_0 = arith.constant 0 : i32
    return %arg0, %c0_i32 : i32, i32
  }
  func.func @transform_16(%arg0: i32) -> (i32, i32, i32) {
    %c0_i32 = arith.constant 0 : i32
    %c0_i32_0 = arith.constant 0 : i32
    %c0_i32_1 = arith.constant 0 : i32
    return %c0_i32, %arg0, %c0_i32_0 : i32, i32, i32
  }
  func.func @transform_17(%arg0: i32) -> (i32, i32, i32) {
    %c0_i32 = arith.constant 0 : i32
    %c0_i32_0 = arith.constant 0 : i32
    %c0_i32_1 = arith.constant 0 : i32
    return %c0_i32, %arg0, %c0_i32_0 : i32, i32, i32
  }
}

</mosaic_0001>

<bundles_post_ra>
// kernel: lstm_forward.1
= control target key start
LH: loop header
LB: loop body
LE: loop exit
PB: predicated region body
PF: predicated region fallthrough
CT: control target
= control target key end

     0   :  { %s7128_s0 = inlined_call_operand.vmem [shape: bf16[8,16,16], index: 0, kind: input, shape index: {}]   ;;  %s7129_s1 = inlined_call_operand.vmem [shape: bf16[16,512], index: 1, kind: input, shape index: {}]   ;;  %s7130_s2 = inlined_call_operand.vmem [shape: bf16[128,512], index: 2, kind: input, shape index: {}]   ;;  %s7131_s3 = inlined_call_operand.vmem [shape: bf16[128,512], index: 3, kind: input, shape index: {}]   ;;  %s7132_s4 = inlined_call_operand.vmem [shape: bf16[128,512], index: 4, kind: input, shape index: {}]   ;;  %s7133_s5 = inlined_call_operand.vmem [shape: f32[1,512], index: 5, kind: input, shape index: {}]   ;;  %s7134_s6 = inlined_call_operand.vmem [shape: f32[1,512], index: 6, kind: input, shape index: {}]   ;;  %s7135_s7 = inlined_call_operand.vmem [shape: f32[1,128], index: 7, kind: input, shape index: {}]   ;;  %s7136_s8 = inlined_call_operand.vmem [shape: f32[1,128], index: 8, kind: input, shape index: {}]   ;;  %s7137_s9 = inlined_call_operand.vmem [shape: f32[1,128], index: 9, kind: input, shape index: {}]   ;;  %s7138_s10 = inlined_call_operand.vmem [shape: f32[1,128], index: 10, kind: input, shape index: {}]   ;;  %s7139_s11 = inlined_call_operand.vmem [shape: f32[128,128], index: 11, kind: input, shape index: {}]   ;;  %s7140_s12 = inlined_call_operand.vmem [shape: f32[1,128], index: 12, kind: input, shape index: {}]   ;;  %s7141_s13 = inlined_call_operand.vmem [shape: f32[2,16,128], index: 13, kind: input, shape index: {}, may-alias: {13,14}]   ;;  %s7142_s14 = inlined_call_operand.vmem [shape: f32[2,16,128], index: 14, kind: input, shape index: {}, may-alias: {13,14}]   ;;  %s7143_s15 = inlined_call_operand.vmem [shape: f32[16,128], index: 15, kind: output, shape index: {0}]   ;;  %s7144_s16 = inlined_call_operand.hbm [shape: f32[2,16,128], index: 16, kind: output, shape index: {1}]   ;;  %s7145_s17 = inlined_call_operand.hbm [shape: f32[2,16,128], index: 17, kind: output, shape index: {2}]  }
   0x1   :  { %7169 = sst [smem:[#allocation31_spill]] %s7128_s0 }
   0x2   :  { %7170 = sst [smem:[#allocation32_spill]] %s7129_s1 }
   0x3   :  { %7171 = sst [smem:[#allocation33_spill]] %s7130_s2 }
   0x4   :  { %7172 = sst [smem:[#allocation34_spill]] %s7131_s3 }
   0x5   :  { %7173 = sst [smem:[#allocation35_spill]] %s7132_s4 }
   0x6   :  { %7174 = sst [smem:[#allocation36_spill]] %s7133_s5 }
   0x7   :  { %7175 = sst [smem:[#allocation37_spill]] %s7134_s6 }
   0x8   :  { %7176 = sst [smem:[#allocation38_spill]] %s7135_s7 }
   0x9   :  { %7177 = sst [smem:[#allocation39_spill]] %s7136_s8 }
   0xa   :  { %7178 = sst [smem:[#allocation40_spill]] %s7137_s9 }
   0xb   :  { %7179 = sst [smem:[#allocation41_spill]] %s7140_s12 }
   0xc   :  { %7180 = sst [smem:[#allocation42_spill]] %s7143_s15 }
   0xd   :  { %7181 = sst [smem:[#allocation43_spill]] %s7145_s17 }
   0xe   :  { %23 = vsyncpa [#allocation9], 0 }
   0xf   :  { %25 = vsyncpa [#allocation9 + $0x1], 0 }
  0x10   :  { %26 = vsyncpa [#allocation11], 0 }
  0x11   :  { %28 = vsyncpa [#allocation11 + $0x1], 0  ;;  %s5203_s24 = smov 0   ;;  %s5205_s25 = smov 0  }
  0x12   :  { %s5207_s26 = smov 0   ;;  %s5209_s27 = smov 0  }
  0x13 LB: > { %7182 = sst [smem:[#allocation14_spill]] %s5096_s24  ;;  %s5224_s28 = sadd.s32 4294967295, %s5108_s27   ;;  %s5108_s27 = sphi %s5209_s27, %s7254_s27   ;;  %s5104_s26 = sphi %s5207_s26, %s7258_s26   ;;  %s5100_s25 = sphi %s5205_s25, %s7257_s25   ;;  %s5096_s24 = sphi %s5203_s24, %s7256_s24  }
  0x14   : > { %s4074_s29 = sadd.s32 4294967294, %s5108_s27   ;;  %s5228_s0 = sadd.s32 1, %s5108_s27  }
  0x15   : > { %7183 = sst [smem:[#allocation15_spill]] %s5228_s0  ;;  %s41_s30 = sadd.s32 1, %s5104_s26 }
  0x16   : > { %s38_s18 = ssub.s32 %s5108_s27, %s5228_s0  ;;  %p48_p0 = scmp.ne.s32.totalorder %s5104_s26, %s5100_s25 }
  0x17   : > { %p39_p1 = scmp.eq.s32.totalorder %s38_s18, 0  ;;  %p49_p2 = scmp.eq.s32.totalorder %s5108_s27, 0 }
  0x18   : > { %p408_p3 = scmp.eq.s32.totalorder %s5224_s28, 1  ;;  %p413_p4 = scmp.ne.s32.totalorder %s5100_s25, %s5096_s24 }
  0x19   : > { %s5240_s19 = scalar_select %p39_p1, %s5104_s26, %s41_s30  }
  0x1a   : > { %p5242_p5 = por %p49_p2, %p48_p0  ;;  %p5246_p6 = por %p408_p3, %p48_p0 }
  0x1b   : > { %7184 = sst [smem:[#allocation16_spill]] %s5240_s19  ;;  %p414_p7 = scmp.eq.s32.totalorder %s4074_s29, 1 }
  0x1c   : > { %p4076_p9 = scmp.ge.s32.totalorder %s5108_s27, 2 }
  0x1d   : > { %p5250_p8 = por %p414_p7, %p413_p4 }
  0x1e   : > { %492 = sbr.rel (%p4076_p9) target bundleno = 65 (0x41), region = 64 }
  0x1f   : > { %s7187_s21 = scalar_select %p5250_p8, 1, 0 }
  0x21   : > { %7188 = sst [smem:[#allocation17_spill]] %s7187_s21 }
  0x23   : > { %495 = sbr.rel (!%p5242_p5) target bundleno = 53 (0x35), region = 68  ;;  %s497_s22 = sand.u32 (%p5242_p5), 1, %s5104_s26  }
  0x24   : > { %s4078_s23 = sshll.u32 (%p5242_p5), %s5108_s27, 2  ;;  %s4077_s30 = sshll.u32 (%p5242_p5), %s497_s22, 5 }
  0x25   : > { %s7189_s29 = sld [smem:[#allocation31_spill]] (%p5242_p5)  ;;  %s499_s21 = scalar_lea.vmem (%p5242_p5), [#allocation5], %s4077_s30 }
  0x2b   : > { %s501_s0 = scalar_lea.vmem %s7189_s29, %s4078_s23 }
  0x2c   : > { %v518_v0 = vld [vmem:[%s501_s0] sm:$0xf]  ;;  %v520_v1 = vld [vmem:[%s501_s0 + $0x8] sm:$0xf]  ;;  %v522_v2 = vld [vmem:[%s501_s0 + $0x10] sm:$0xf] }
  0x2d   : > { %519 = vst [vmem:[%s499_s21] sm:$0xf] %v518_v0  ;;  %v524_v3 = vld [vmem:[%s501_s0 + $0x18] sm:$0xf]  ;;  %v526_v4 = vld [vmem:[%s501_s0 + $0x20] sm:$0xf] }
  0x2e   : > { %521 = vst [vmem:[%s499_s21 + $0x4] sm:$0xf] %v520_v1  ;;  %v528_v5 = vld [vmem:[%s501_s0 + $0x28] sm:$0xf]  ;;  %v530_v6 = vld [vmem:[%s501_s0 + $0x30] sm:$0xf] }
  0x2f   : > { %523 = vst [vmem:[%s499_s21 + $0x8] sm:$0xf] %v522_v2  ;;  %v532_v7 = vld [vmem:[%s501_s0 + $0x38] sm:$0xf] }
  0x30   : > { %525 = vst [vmem:[%s499_s21 + $0xc] sm:$0xf] %v524_v3 }
  0x31   : > { %527 = vst [vmem:[%s499_s21 + $0x10] sm:$0xf] %v526_v4 }
  0x32   : > { %529 = vst [vmem:[%s499_s21 + $0x14] sm:$0xf] %v528_v5 }
  0x33   : > { %531 = vst [vmem:[%s499_s21 + $0x18] sm:$0xf] %v530_v6 }
  0x34   : > { %533 = vst [vmem:[%s499_s21 + $0x1c] sm:$0xf] %v532_v7 }
  0x35 PF: > { %573 = sbr.rel (!%p5242_p5) target bundleno = 59 (0x3b), region = 109  ;;  %s575_s19 = sand.u32 (%p5242_p5), 1, %s5104_s26  }
  0x36   : > { %s4080_s22 = sshll.u32 (%p5242_p5), %s5108_s27, 3  ;;  %s4079_s23 = sshll.u32 (%p5242_p5), %s575_s19, 4 }
  0x37   : > { %s579_s29 = scalar_lea.vmem (%p5242_p5), %s7141_s13, %s4080_s22  ;;  %s577_s24 = scalar_lea.vmem (%p5242_p5), [#allocation6], %s4079_s23 }
  0x38   : > { %v610_v8 = vld [vmem:[%s579_s29] sm:$0xff] (%p5242_p5)  ;;  %v612_v9 = vld [vmem:[%s579_s29 + $0x10] sm:$0xff] (%p5242_p5) }
  0x39   : > { %611 = vst [vmem:[%s577_s24] sm:$0xff] (%p5242_p5), %v610_v8 }
  0x3a   : > { %613 = vst [vmem:[%s577_s24 + $0x8] sm:$0xff] %v612_v9 }
  0x3b PF: > { %619 = sbr.rel (!%p5242_p5) target bundleno = 65 (0x41), region = 147  ;;  %s621_s0 = sand.u32 (%p5242_p5), 1, %s5104_s26  }
  0x3c   : > { %s4082_s21 = sshll.u32 (%p5242_p5), %s5108_s27, 3  ;;  %s4081_s15 = sshll.u32 (%p5242_p5), %s621_s0, 4 }
  0x3d   : > { %s625_s17 = scalar_lea.vmem (%p5242_p5), %s7142_s14, %s4082_s21  ;;  %s623_s22 = scalar_lea.vmem (%p5242_p5), [#allocation7], %s4081_s15 }
  0x3e   : > { %v656_v10 = vld [vmem:[%s625_s17] sm:$0xff] (%p5242_p5)  ;;  %v658_v11 = vld [vmem:[%s625_s17 + $0x10] sm:$0xff] (%p5242_p5) }
  0x3f   : > { %657 = vst [vmem:[%s623_s22] sm:$0xff] (%p5242_p5), %v656_v10 }
  0x40   : > { %659 = vst [vmem:[%s623_s22 + $0x8] sm:$0xff] %v658_v11 }
  0x41 PF: > { %p4083_p10 = scmp.ge.s32.totalorder %s5108_s27, 1  ;;  %p664_p11 = scmp.lt.s32.totalorder %s5108_s27, 3 }
  0x43   : > { %p665_p12 = pnand %p4083_p10, %p664_p11 }
  0x45   : > { %668 = sbr.rel (%p665_p12) target bundleno = 3077 (0xc05), region = 185 }
  0x4a   : > { %s7190_s23 = sld [smem:[#allocation32_spill]]  ;;  %s5299_s24 = sand.u32 1, %s5100_s25   ;;  %vm852_vm0 = vcmask 130048  }
  0x4b   : > { %s4084_s17 = sshll.u32 %s5299_s24, 5  ;;  %s7191_s3 = sld [smem:[#allocation34_spill]] }
  0x4c   : > { %s5320_s30 = scalar_lea.vmem [#allocation5], %s4084_s17  ;;  %s5627_s12 = sshll.u32 %s5299_s24, 4 }
  0x4d   : > { %v5323_v28 = vld [vmem:[%s5320_s30] sm:$0xff]  ;;  %v5326_v29 = vld [vmem:[%s5320_s30 + $0x18] sm:$0xff]  ;;  %v5441_v2 = vld [vmem:[%s5320_s30 + $0x8] sm:$0xff]  ;;  %s7159_s15 = scalar_lea.vmem [#allocation6], %s5627_s12  ;;  %s7192_s5 = sld [smem:[#allocation36_spill]] }
  0x4e   : > { %s7158_s29 = scalar_lea.vmem [#allocation7], %s5627_s12  ;;  %s7202_s2 = sld [smem:[#allocation33_spill]] }
  0x4f   : > { %s7208_s4 = sld [smem:[#allocation35_spill]]  ;;  %s6600_s17 = scalar_lea.vmem [#allocation10], %s5627_s12 }
  0x50   : > { %v4108_v12 = vld [vmem:[%s7190_s23] sm:$0xf]  ;;  %v4598_v13 = vld [vmem:[%s7190_s23 + $0xc] sm:$0xf0]  ;;  %v4116_v14 = vld [vmem:[%s7190_s23 + $0x8] sm:$0xf] }
  0x51   : > { %v4109_v15 = vor.u32 %v4598_v13, %v4108_v12  ;;  %v4599_v16 = vld [vmem:[%s7190_s23 + $0x14] sm:$0xf0]  ;;  %v4597_v17 = vld [vmem:[%s7190_s23 + $0xc] sm:$0xf]  ;;  %v4118_v18 = vld [vmem:[%s7190_s23 + $0x18] sm:$0xf0] }
  0x52   : > { %v4117_v19 = vor.u32 %v4599_v16, %v4116_v14  ;;  %v4121_v20 = vor.u32 %v4597_v17, %v4118_v18  ;;  %v4596_v21 = vld [vmem:[%s7190_s23 + $0x4] sm:$0xf]  ;;  %v4110_v22 = vld [vmem:[%s7190_s23 + $0x10] sm:$0xf0]  ;;  %v4252_v26 = vld [vmem:[%s7191_s3 + $0xe0] sm:$0xf] }
  0x53   : > { %872 = vmatpush.bf16.msra.mxu0 %v4109_v15  ;;  %4704 = vmatpush.bf16.msra.mxu1 %v4109_v15  ;;  %v4113_v23 = vor.u32 %v4596_v21, %v4110_v22  ;;  %v4628_v24 = vld [vmem:[%s7191_s3 + $0xe4] sm:$0xf]  ;;  %v4254_v25 = vld [vmem:[%s7191_s3 + $0xf0] sm:$0xf0]  ;;  %v4630_v27 = vld [vmem:[%s7191_s3 + $0xec] sm:$0xf0] }
  0x54   : > { %930 = vmatpush.bf16.msra.mxu2 %v4117_v19  ;;  %959 = vmatpush.bf16.msra.mxu3 %v4121_v20  ;;  %v5328_v30 = vor.u32 %v4628_v24, %v4254_v25  ;;  %v5330_v31 = vor.u32 %v4630_v27, %v4252_v26  ;;  %v4236_v32 = vld [vmem:[%s7191_s3 + $0xc0] sm:$0xf]  ;;  %v4626_v33 = vld [vmem:[%s7191_s3 + $0xcc] sm:$0xf0]  ;;  %v4629_v34 = vld [vmem:[%s7191_s3 + $0xec] sm:$0xf] }
  0x55   : > { %v4262_v35 = vld [vmem:[%s7191_s3 + $0xf8] sm:$0xf0]  ;;  %v4624_v36 = vld [vmem:[%s7191_s3 + $0xc4] sm:$0xf]  ;;  %v4238_v37 = vld [vmem:[%s7191_s3 + $0xd0] sm:$0xf0]  ;;  %v5362_v39 = vor.u32 %v4626_v33, %v4236_v32 }
  0x56   : > { %4122 = vmatmul.msk.bf16.vlgmr.msra.gmra.mxu0 %vm852_vm0, %v5323_v28  ;;  %4125 = vmatmul.msk.bf16.vlgmr.msra.gmra.mxu1 %vm852_vm0, %v5326_v29  ;;  %v5358_v38 = vor.u32 %v4629_v34, %v4262_v35  ;;  %v5364_v40 = vor.u32 %v4624_v36, %v4238_v37  ;;  %v4220_v41 = vld [vmem:[%s7191_s3 + $0xa0] sm:$0xf]  ;;  %v4625_v42 = vld [vmem:[%s7191_s3 + $0xcc] sm:$0xf]  ;;  %v4246_v43 = vld [vmem:[%s7191_s3 + $0xd8] sm:$0xf0] }
  0x57   : > { %901 = vmatpush.bf16.msrb.mxu1 %v4113_v23  ;;  %4130 = vmatmul.msk.bf16.vlgmr.msra.gmra.mxu2 %vm852_vm0, %v5323_v28  ;;  %v4622_v44 = vld [vmem:[%s7191_s3 + $0xac] sm:$0xf0]  ;;  %v5379_v45 = vor.u32 %v4625_v42, %v4246_v43  ;;  %v4260_v46 = vld [vmem:[%s7191_s3 + $0xe8] sm:$0xf]  ;;  %v4631_v47 = vld [vmem:[%s7191_s3 + $0xf4] sm:$0xf0] }
  0x58   : > { %4134 = vmatmul.msk.bf16.vlgmr.msra.gmra.mxu3 %vm852_vm0, %v5323_v28  ;;  %1182 = vmatpush.bf16.msrb.mxu0 %v5330_v31  ;;  %v5387_v48 = vor.u32 %v4631_v47, %v4260_v46  ;;  %v4620_v49 = vld [vmem:[%s7191_s3 + $0xa4] sm:$0xf]  ;;  %v4222_v50 = vld [vmem:[%s7191_s3 + $0xb0] sm:$0xf0]  ;;  %v4204_v51 = vld [vmem:[%s7191_s3 + $0x80] sm:$0xf]  ;;  %v5403_v53 = vor.u32 %v4622_v44, %v4220_v41 }
  0x59   : > { %1221 = vmatpush.bf16.msrb.mxu3 %v5358_v38  ;;  %v4618_v52 = vld [vmem:[%s7191_s3 + $0x8c] sm:$0xf0]  ;;  %v5405_v54 = vor.u32 %v4620_v49, %v4222_v50  ;;  %v4244_v55 = vld [vmem:[%s7191_s3 + $0xc8] sm:$0xf]  ;;  %v4627_v56 = vld [vmem:[%s7191_s3 + $0xd4] sm:$0xf0] }
  0x5a   : > { %v4621_v57 = vld [vmem:[%s7191_s3 + $0xac] sm:$0xf]  ;;  %1208 = vmatpush.bf16.msrb.mxu2 %v5387_v48  ;;  %v5418_v58 = vor.u32 %v4627_v56, %v4244_v55  ;;  %v4230_v59 = vld [vmem:[%s7191_s3 + $0xb8] sm:$0xf0]  ;;  %v4616_v60 = vld [vmem:[%s7191_s3 + $0x84] sm:$0xf]  ;;  %v5444_v3 = vor.u32 %v4618_v52, %v4204_v51 }
  0x5b   : > { %1195 = vmatpush.bf16.msra.mxu1 %v5328_v30  ;;  %v4206_v61 = vld [vmem:[%s7191_s3 + $0x90] sm:$0xf0]  ;;  %v5429_v62 = vor.u32 %v4621_v57, %v4230_v59  ;;  %v4228_v63 = vld [vmem:[%s7191_s3 + $0xa8] sm:$0xf]  ;;  %v4188_v0 = vld [vmem:[%s7191_s3 + $0x60] sm:$0xf] }
  0x5c   : > { %1183 = vmatpush.bf16.msrb.mxu0 %v5362_v39  ;;  %v4623_v1 = vld [vmem:[%s7191_s3 + $0xb4] sm:$0xf0]  ;;  %v4614_v4 = vld [vmem:[%s7191_s3 + $0x6c] sm:$0xf0]  ;;  %v5450_v5 = vor.u32 %v4616_v60, %v4206_v61  ;;  %v4212_v6 = vld [vmem:[%s7191_s3 + $0x88] sm:$0xf] }
  0x5d   : > { %1222 = vmatpush.bf16.msrb.mxu3 %v5379_v45  ;;  %v4617_v7 = vld [vmem:[%s7191_s3 + $0x8c] sm:$0xf]  ;;  %v5460_v8 = vor.u32 %v4623_v1, %v4228_v63  ;;  %v4214_v9 = vld [vmem:[%s7191_s3 + $0x98] sm:$0xf0]  ;;  %v4619_v10 = vld [vmem:[%s7191_s3 + $0x94] sm:$0xf0]  ;;  %v5471_v12 = vor.u32 %v4614_v4, %v4188_v0 }
  0x5e   : > { %1209 = vmatpush.bf16.msrb.mxu2 %v5418_v58  ;;  %v5468_v11 = vor.u32 %v4617_v7, %v4214_v9  ;;  %v4172_v13 = vld [vmem:[%s7191_s3 + $0x40] sm:$0xf]  ;;  %v4610_v14 = vld [vmem:[%s7191_s3 + $0x4c] sm:$0xf0]  ;;  %v5481_v15 = vor.u32 %v4619_v10, %v4212_v6  ;;  %v4613_v16 = vld [vmem:[%s7191_s3 + $0x6c] sm:$0xf] }
  0x5f   : > { %1196 = vmatpush.bf16.msra.mxu1 %v5364_v40  ;;  %v4196_v17 = vld [vmem:[%s7191_s3 + $0x68] sm:$0xf]  ;;  %v4615_v18 = vld [vmem:[%s7191_s3 + $0x74] sm:$0xf0]  ;;  %v4198_v19 = vld [vmem:[%s7191_s3 + $0x78] sm:$0xf0]  ;;  %v5510_v22 = vor.u32 %v4610_v14, %v4172_v13 }
  0x60   : > { %1184 = vmatpush.bf16.msrb.mxu0 %v5403_v53  ;;  %v4612_v20 = vld [vmem:[%s7191_s3 + $0x64] sm:$0xf]  ;;  %v5507_v21 = vor.u32 %v4613_v16, %v4198_v19  ;;  %v4156_v23 = vld [vmem:[%s7191_s3 + $0x20] sm:$0xf]  ;;  %v4606_v24 = vld [vmem:[%s7191_s3 + $0x2c] sm:$0xf0]  ;;  %v5524_v27 = vor.u32 %v4615_v18, %v4196_v17 }
  0x61   : > { %1223 = vmatpush.bf16.msrb.mxu3 %v5429_v62  ;;  %v4190_v25 = vld [vmem:[%s7191_s3 + $0x70] sm:$0xf0]  ;;  %v4182_v32 = vld [vmem:[%s7191_s3 + $0x58] sm:$0xf0]  ;;  %v4608_v33 = vld [vmem:[%s7191_s3 + $0x44] sm:$0xf]  ;;  %v5557_v44 = vor.u32 %v4606_v24, %v4156_v23 }
  0x62   : > { %1210 = vmatpush.bf16.msrb.mxu2 %v5460_v8  ;;  %v5522_v26 = vor.u32 %v4612_v20, %v4190_v25  ;;  %v4180_v34 = vld [vmem:[%s7191_s3 + $0x48] sm:$0xf]  ;;  %v4611_v35 = vld [vmem:[%s7191_s3 + $0x54] sm:$0xf0]  ;;  %v4174_v37 = vld [vmem:[%s7191_s3 + $0x50] sm:$0xf0] }
  0x63   : > { %1197 = vmatpush.bf16.msra.mxu1 %v5405_v54  ;;  %v5548_v41 = vor.u32 %v4608_v33, %v4174_v37  ;;  %v4605_v42 = vld [vmem:[%s7191_s3 + $0x2c] sm:$0xf]  ;;  %v4166_v43 = vld [vmem:[%s7191_s3 + $0x38] sm:$0xf0]  ;;  %v4140_v46 = vld [vmem:[%s7191_s3] sm:$0xf]  ;;  %v5566_v49 = vor.u32 %v4611_v35, %v4180_v34 }
  0x64   : > { %1185 = vmatpush.bf16.msrb.mxu0 %v5444_v3  ;;  %v4602_v47 = vld [vmem:[%s7191_s3 + $0xc] sm:$0xf0]  ;;  %v4164_v50 = vld [vmem:[%s7191_s3 + $0x28] sm:$0xf]  ;;  %v5572_v51 = vor.u32 %v4605_v42, %v4166_v43  ;;  %v4607_v52 = vld [vmem:[%s7191_s3 + $0x34] sm:$0xf0] }
  0x65   : > { %1224 = vmatpush.bf16.msrb.mxu3 %v5468_v11  ;;  %v4601_v55 = vld [vmem:[%s7191_s3 + $0xc] sm:$0xf]  ;;  %v4150_v56 = vld [vmem:[%s7191_s3 + $0x18] sm:$0xf0]  ;;  %v5585_v57 = vor.u32 %v4602_v47, %v4140_v46  ;;  %v5588_v59 = vor.u32 %v4607_v52, %v4164_v50  ;;  %v4634_v61 = vld [vmem:[%s5320_s30 + $0x10] sm:$0xff]  ;;  %s7209_s6 = sld [smem:[#allocation37_spill]] }
  0x66   : > { %4123 = vmatmul.msk.bf16.gmra.mxu0 %vm852_vm0, %v5441_v2  ;;  %4126 = vmatmul.msk.bf16.vlgmr.msrb.gmra.mxu1 %vm852_vm0, %v5323_v28  ;;  %v4609_v28 = vld [vmem:[%s7191_s3 + $0x4c] sm:$0xf]  ;;  %v5591_v60 = vor.u32 %v4601_v55, %v4150_v56  ;;  %v4148_v63 = vld [vmem:[%s7191_s3 + $0x8] sm:$0xf]  ;;  %v4603_v0 = vld [vmem:[%s7191_s3 + $0x14] sm:$0xf0] }
  0x67   : > { %1198 = vmatpush.bf16.msra.mxu1 %v5450_v5  ;;  %4131 = vmatmul.msk.bf16.gmra.mxu2 %vm852_vm0, %v5441_v2  ;;  %v5542_v36 = vor.u32 %v4609_v28, %v4182_v32  ;;  %v5602_v1 = vor.u32 %v4603_v0, %v4148_v63  ;;  %v4604_v4 = vld [vmem:[%s7191_s3 + $0x24] sm:$0xf]  ;;  %v4158_v6 = vld [vmem:[%s7191_s3 + $0x30] sm:$0xf0]  ;;  %s6657_s0 = scalar_lea.vmem [#allocation8], %s5627_s12  ;;  %s7223_s21 = scalar_lea.vmem [#allocation6], %s5627_s12 }
  0x68   : > { %4135 = vmatmul.msk.bf16.gmra.mxu3 %vm852_vm0, %v5441_v2  ;;  %1186 = vmatpush.bf16.msrb.mxu0 %v5471_v12  ;;  %v5616_v7 = vor.u32 %v4604_v4, %v4158_v6  ;;  %v4600_v9 = vld [vmem:[%s7191_s3 + $0x4] sm:$0xf]  ;;  %s7246_s9 = sld [smem:[#allocation40_spill]] }
  0x69   : > { %1211 = vmatpush.bf16.msrb.mxu2 %v5481_v15  ;;  %1225 = vmatpush.bf16.msrb.mxu3 %v5507_v21  ;;  %v1013_v13 = vld [vmem:[%s7159_s15] sm:$0xff]  ;;  %s7232_s15 = scalar_lea.vmem [#allocation7], %s5627_s12  ;;  %s7247_s7 = sld [smem:[#allocation38_spill]] }
  0x6a   : > { %v1021_v14 = vpack.c.bf16 %v1013_v13, %v1013_v13  ;;  %s7248_s8 = sld [smem:[#allocation39_spill]]  ;;  %s3875_s12 = scalar_lea.sflag [#allocation9], %s5299_s24 }
  0x6b   : > { %1199 = vmatpush.bf16.msra.mxu1 %v5522_v26 }
  0x6c   : > { %1187 = vmatpush.bf16.msrb.mxu0 %v5510_v22 }
  0x6d   : > { %1212 = vmatpush.bf16.msrb.mxu2 %v5524_v27  ;;  %1226 = vmatpush.bf16.msrb.mxu3 %v5542_v36 }
  0x6f   : > { %1200 = vmatpush.bf16.msra.mxu1 %v5548_v41 }
  0x70   : > { %1188 = vmatpush.bf16.msrb.mxu0 %v5557_v44 }
  0x71   : > { %1213 = vmatpush.bf16.msrb.mxu2 %v5566_v49  ;;  %1227 = vmatpush.bf16.msrb.mxu3 %v5572_v51 }
  0x73   : > { %1201 = vmatpush.bf16.msra.mxu1 %v5616_v7 }
  0x74   : > { %1189 = vmatpush.bf16.msrb.mxu0 %v5585_v57 }
  0x75   : > { %1214 = vmatpush.bf16.msrb.mxu2 %v5588_v59  ;;  %1228 = vmatpush.bf16.msrb.mxu3 %v5591_v60 }
  0x76   : > { %4124 = vmatmul.msk.bf16.gmra.mxu0 %vm852_vm0, %v4634_v61  ;;  %4127 = vmatmul.msk.bf16.gmra.mxu1 %vm852_vm0, %v5441_v2  ;;  %v4142_v2 = vld [vmem:[%s7191_s3 + $0x10] sm:$0xf0] }
  0x77   : > { %4132 = vmatmul.msk.bf16.gmra.mxu2 %vm852_vm0, %v4634_v61  ;;  %v5631_v10 = vor.u32 %v4600_v9, %v4142_v2 }
  0x78   : > { %4136 = vmatmul.msk.bf16.gmra.mxu3 %vm852_vm0, %v4634_v61  ;;  %1310 = vmatpush.bf16.msra.mxu0 %v5330_v31 }
  0x79   : > { %1349 = vmatpush.bf16.msra.mxu3 %v5358_v38  ;;  %1215 = vmatpush.bf16.msrb.mxu2 %v5602_v1 }
  0x7a   : > { %1202 = vmatpush.bf16.msra.mxu1 %v5631_v10 }
  0x7c   : > { %1311 = vmatpush.bf16.msra.mxu0 %v5362_v39 }
  0x7d   : > { %1336 = vmatpush.bf16.msra.mxu2 %v5387_v48  ;;  %1350 = vmatpush.bf16.msra.mxu3 %v5379_v45 }
  0x7e   : > { %1323 = vmatpush.bf16.msrb.mxu1 %v5328_v30 }
  0x80   : > { %1312 = vmatpush.bf16.msra.mxu0 %v5403_v53 }
  0x81   : > { %1337 = vmatpush.bf16.msra.mxu2 %v5418_v58  ;;  %1351 = vmatpush.bf16.msra.mxu3 %v5429_v62 }
  0x82   : > { %1324 = vmatpush.bf16.msrb.mxu1 %v5364_v40 }
  0x84   : > { %1313 = vmatpush.bf16.msra.mxu0 %v5444_v3 }
  0x85   : > { %1338 = vmatpush.bf16.msra.mxu2 %v5460_v8  ;;  %1352 = vmatpush.bf16.msra.mxu3 %v5468_v11 }
  0x86   : > { %4128 = vmatmul.msk.bf16.gmra.mxu1 %vm852_vm0, %v4634_v61  ;;  %1190 = vmatmul.bf16.vlgmr.msrb.gmra.mxu0 %v1021_v14 }
  0x87   : > { %4133 = vmatmul.msk.bf16.gmra.mxu2 %vm852_vm0, %v5326_v29  ;;  %1325 = vmatpush.bf16.msrb.mxu1 %v5405_v54 }
  0x88   : > { %4137 = vmatmul.msk.bf16.gmra.mxu3 %vm852_vm0, %v5326_v29  ;;  %1314 = vmatpush.bf16.msra.mxu0 %v5471_v12 }
  0x89   : > { %1339 = vmatpush.bf16.msra.mxu2 %v5481_v15  ;;  %1353 = vmatpush.bf16.msra.mxu3 %v5507_v21 }
  0x8b   : > { %1326 = vmatpush.bf16.msrb.mxu1 %v5450_v5 }
  0x8c   : > { %1315 = vmatpush.bf16.msra.mxu0 %v5510_v22 }
  0x8d   : > { %1340 = vmatpush.bf16.msra.mxu2 %v5524_v27  ;;  %1354 = vmatpush.bf16.msra.mxu3 %v5542_v36 }
  0x8f   : > { %1327 = vmatpush.bf16.msrb.mxu1 %v5522_v26 }
  0x90   : > { %1316 = vmatpush.bf16.msra.mxu0 %v5557_v44 }
  0x91   : > { %1341 = vmatpush.bf16.msra.mxu2 %v5566_v49  ;;  %1355 = vmatpush.bf16.msra.mxu3 %v5572_v51 }
  0x93   : > { %1328 = vmatpush.bf16.msrb.mxu1 %v5548_v41 }
  0x94   : > { %1317 = vmatpush.bf16.msra.mxu0 %v5585_v57 }
  0x95   : > { %1342 = vmatpush.bf16.msra.mxu2 %v5588_v59  ;;  %1356 = vmatpush.bf16.msra.mxu3 %v5591_v60 }
  0x96   : > { %4129 = vmatmul.msk.bf16.gmra.mxu1 %vm852_vm0, %v5326_v29  ;;  %v794_v29 = vld [vmem:[%s7192_s5] sm:$0xf] }
  0x97   : > { %1216 = vmatmul.bf16.vlgmr.msrb.gmra.mxu2 %v1021_v14  ;;  %1329 = vmatpush.bf16.msrb.mxu1 %v5616_v7  ;;  %v5709_v16 = vperm.slane %v794_v29, 0  ;;  %v5714_v20 = vperm.slane %v794_v29, 2  ;;  %v5716_v23 = vperm.slane %v794_v29, 3  ;;  %v5730_v61 = vperm.slane %v794_v29, 1 }
  0x98   : > { %1439 = vmatpush.bf16.msrb.mxu0 %v5330_v31  ;;  %1229 = vmatmul.bf16.vlgmr.msrb.gmra.mxu3 %v1021_v14 }
  0x99   : > { %1343 = vmatpush.bf16.msra.mxu2 %v5602_v1  ;;  %1478 = vmatpush.bf16.msrb.mxu3 %v5358_v38 }
  0x9b   : > { %1330 = vmatpush.bf16.msrb.mxu1 %v5631_v10 }
  0x9c   : > { %1440 = vmatpush.bf16.msrb.mxu0 %v5362_v39 }
  0x9d   : > { %1465 = vmatpush.bf16.msrb.mxu2 %v5387_v48  ;;  %1479 = vmatpush.bf16.msrb.mxu3 %v5379_v45 }
  0xa0   : > { %1441 = vmatpush.bf16.msrb.mxu0 %v5403_v53 }
  0xa1   : > { %1466 = vmatpush.bf16.msrb.mxu2 %v5418_v58  ;;  %1480 = vmatpush.bf16.msrb.mxu3 %v5429_v62 }
  0xa4   : > { %1442 = vmatpush.bf16.msrb.mxu0 %v5444_v3 }
  0xa5   : > { %1467 = vmatpush.bf16.msrb.mxu2 %v5460_v8  ;;  %1481 = vmatpush.bf16.msrb.mxu3 %v5468_v11 }
  0xa6   : > { %1203 = vmatmul.bf16.vlgmr.msra.gmra.mxu1 %v1021_v14 }
  0xa7   : > { %1452 = vmatpush.bf16.msra.mxu1 %v5328_v30 }
  0xa8   : > { %1443 = vmatpush.bf16.msrb.mxu0 %v5471_v12 }
  0xa9   : > { %1468 = vmatpush.bf16.msrb.mxu2 %v5481_v15  ;;  %1482 = vmatpush.bf16.msrb.mxu3 %v5507_v21 }
  0xab   : > { %1453 = vmatpush.bf16.msra.mxu1 %v5364_v40 }
  0xac   : > { %1444 = vmatpush.bf16.msrb.mxu0 %v5510_v22 }
  0xad   : > { %1469 = vmatpush.bf16.msrb.mxu2 %v5524_v27  ;;  %1483 = vmatpush.bf16.msrb.mxu3 %v5542_v36 }
  0xaf   : > { %1454 = vmatpush.bf16.msra.mxu1 %v5405_v54 }
  0xb0   : > { %1445 = vmatpush.bf16.msrb.mxu0 %v5557_v44 }
  0xb1   : > { %1470 = vmatpush.bf16.msrb.mxu2 %v5566_v49  ;;  %1484 = vmatpush.bf16.msrb.mxu3 %v5572_v51 }
  0xb3   : > { %1455 = vmatpush.bf16.msra.mxu1 %v5450_v5 }
  0xb4   : > { %1446 = vmatpush.bf16.msrb.mxu0 %v5585_v57 }
  0xb5   : > { %1471 = vmatpush.bf16.msrb.mxu2 %v5588_v59  ;;  %1485 = vmatpush.bf16.msrb.mxu3 %v5591_v60 }
  0xb7   : > { %1456 = vmatpush.bf16.msra.mxu1 %v5522_v26 }
  0xb9   : > { %1472 = vmatpush.bf16.msrb.mxu2 %v5602_v1 }
  0xbb   : > { %1457 = vmatpush.bf16.msra.mxu1 %v5548_v41 }
  0xbf   : > { %1458 = vmatpush.bf16.msra.mxu1 %v5616_v7 }
  0xc3   : > { %1459 = vmatpush.bf16.msra.mxu1 %v5631_v10 }
  0xd3   : > { %v874_v17 = vpop.f32.mrf.mxu0  ;;  %v889_v18 = vpop.f32.mrf.mxu1 }
  0xd4   : > { %v5712_v19 = vadd.f32 %v889_v18, %v5709_v16 }
  0xda   : > { %v932_v24 = vpop.f32.mrf.mxu2 }
  0xdb   : > { %v961_v25 = vpop.f32.mrf.mxu3  ;;  %v933_v28 = vadd.f32 %v932_v24, %v5714_v20  ;;  %v876_v33 = vpop.f32.mrf.mxu0 }
  0xdc   : > { %v962_v32 = vadd.f32 %v961_v25, %v5716_v23  ;;  %v5720_v34 = vpop.f32.mrf.mxu1  ;;  %v877_v56 = vadd.f32 %v876_v33, %v5709_v16 }
  0xde   : > { %v5722_v35 = vpack.c.bf16 %v962_v32, %v933_v28 }
  0xe2   : > { %v934_v37 = vpop.f32.mrf.mxu2 }
  0xe3   : > { %v963_v42 = vpop.f32.mrf.mxu3  ;;  %v935_v43 = vadd.f32 %v934_v37, %v5714_v20  ;;  %v879_v47 = vpop.f32.mrf.mxu0 }
  0xe4   : > { %v964_v46 = vadd.f32 %v963_v42, %v5716_v23  ;;  %v903_v50 = vpop.f32.mrf.mxu1  ;;  %v880_v52 = vadd.f32 %v879_v47, %v5709_v16  ;;  %v875_v47 = vadd.f32 %v874_v17, %v5709_v16 }
  0xe6   : > { %v5727_v55 = vpack.c.bf16 %v964_v46, %v935_v43 }
  0xea   : > { %v937_v63 = vpop.f32.mrf.mxu2 }
  0xeb   : > { %v966_v0 = vpop.f32.mrf.mxu3  ;;  %v938_v4 = vadd.f32 %v937_v63, %v5714_v20  ;;  %v881_v9 = vpop.f32.mrf.mxu0 }
  0xec   : > { %v967_v6 = vadd.f32 %v966_v0, %v5716_v23  ;;  %v905_v2 = vpop.f32.mrf.mxu1  ;;  %v882_v63 = vadd.f32 %v881_v9, %v5709_v16 }
  0xed   : > { %v906_v13 = vadd.f32 %v905_v2, %v5730_v61 }
  0xee   : > { %v5735_v14 = vpack.c.bf16 %v967_v6, %v938_v4 }
  0xef   : > { %v5737_v18 = vpack.c.bf16 %v906_v13, %v877_v56  ;;  %v904_v56 = vadd.f32 %v903_v50, %v5730_v61 }
  0xf2   : > { %v939_v24 = vpop.f32.mrf.mxu2 }
  0xf3   : > { %v968_v25 = vpop.f32.mrf.mxu3  ;;  %v940_v28 = vadd.f32 %v939_v24, %v5714_v20  ;;  %v884_v32 = vpop.f32.mrf.mxu0 }
  0xf4   : > { %v969_v29 = vadd.f32 %v968_v25, %v5716_v23  ;;  %v908_v33 = vpop.f32.mrf.mxu1  ;;  %v885_v37 = vadd.f32 %v884_v32, %v5709_v16 }
  0xf5   : > { %v909_v42 = vadd.f32 %v908_v33, %v5730_v61 }
  0xf6   : > { %v5743_v43 = vpack.c.bf16 %v969_v29, %v940_v28 }
  0xf7   : > { %v5745_v46 = vpack.c.bf16 %v909_v42, %v880_v52  ;;  %v5755_v52 = vpack.c.bf16 %v904_v56, %v875_v47 }
  0xf8   : > { %7193 = vst [vmem:[#allocation18_spill] sm:$0xff] %v5743_v43 }
  0xf9   : > { %v1017_v9 = vunpack.c.l.bf16 %v5755_v52 }
  0xfa   : > { %v942_v0 = vpop.f32.mrf.mxu2 }
  0xfb   : > { %v971_v4 = vpop.f32.mrf.mxu3  ;;  %v943_v6 = vadd.f32 %v942_v0, %v5714_v20  ;;  %v886_v13 = vpop.f32.mrf.mxu0 }
  0xfc   : > { %v972_v2 = vadd.f32 %v971_v4, %v5716_v23  ;;  %v910_v24 = vpop.f32.mrf.mxu1  ;;  %v887_v56 = vadd.f32 %v886_v13, %v5709_v16 }
  0xfd   : > { %v911_v25 = vadd.f32 %v910_v24, %v5730_v61 }
  0xfe   : > { %v5753_v28 = vpack.c.bf16 %v972_v2, %v943_v6 }
  0xff   : > { %v5757_v29 = vpack.c.bf16 %v911_v25, %v882_v63 }
 0x100   : > { %7194 = vst [vmem:[#allocation19_spill] sm:$0xff] %v5753_v28 }
 0x101   : > { %7195 = vst [vmem:[#allocation20_spill] sm:$0xff] %v5757_v29 }
 0x102   : > { %v944_v17 = vpop.f32.mrf.mxu2 }
 0x103   : > { %v973_v50 = vpop.f32.mrf.mxu3  ;;  %v945_v32 = vadd.f32 %v944_v17, %v5714_v20  ;;  %v1191_v0 = vpop.f32.mrf.mxu0 }
 0x104   : > { %v974_v33 = vadd.f32 %v973_v50, %v5716_v23  ;;  %v913_v42 = vpop.f32.mrf.mxu1  ;;  %v1234_v43 = vadd.f32 %v1191_v0, %v1017_v9 }
 0x105   : > { %v914_v4 = vadd.f32 %v913_v42, %v5730_v61 }
 0x106   : > { %v5763_v24 = vpack.c.bf16 %v974_v33, %v945_v32  ;;  %v4266_v47 = vmul.f32 -1.442695, %v1234_v43 }
 0x107   : > { %v5765_v6 = vpack.c.bf16 %v914_v4, %v885_v37 }
 0x108   : > { %4756 = vpow2.f32 %v4266_v47 }
 0x10a   : > { %v947_v63 = vpop.f32.mrf.mxu2 }
 0x10b   : > { %v976_v2 = vpop.f32.mrf.mxu3  ;;  %v948_v25 = vadd.f32 %v947_v63, %v5714_v20  ;;  %v1193_v28 = vpop.f32.mrf.mxu0 }
 0x10c   : > { %v977_v17 = vadd.f32 %v976_v2, %v5716_v23  ;;  %v915_v50 = vpop.f32.mrf.mxu1 }
 0x10d   : > { %v916_v29 = vadd.f32 %v915_v50, %v5730_v61  ;;  %v1020_v50 = vunpack.c.h.bf16 %v5722_v35 }
 0x10e   : > { %v5771_v42 = vpack.c.bf16 %v977_v17, %v948_v25  ;;  %v4757_v9 = vpop.eup %4756 }
 0x10f   : > { %v5773_v32 = vpack.c.bf16 %v916_v29, %v887_v56  ;;  %v1241_v37 = vadd.f32 1.0, %v4757_v9  ;;  %v1019_v29 = vunpack.c.l.bf16 %v5722_v35 }
 0x110   : > { %7196 = vst [vmem:[#allocation21_spill] sm:$0xff] %v5771_v42 }
 0x111   : > { %4758 = vrcp.f32 %v1241_v37  ;;  %vm1247_vm2 = vweird.f32 %v1241_v37 }
 0x112   : > { %v949_v43 = vpop.f32.mrf.mxu2 }
 0x113   : > { %v978_v33 = vpop.f32.mrf.mxu3  ;;  %v950_v13 = vadd.f32 %v949_v43, %v5714_v20  ;;  %v892_v20 = vadd.f32 %v5720_v34, %v5709_v16  ;;  %v1251_v43 = vand.u32 2147483647, %v1241_v37  ;;  %v1018_v34 = vunpack.c.h.bf16 %v5755_v52 }
 0x114   : > { %v979_v0 = vadd.f32 %v978_v33, %v5716_v23  ;;  %v918_v4 = vpop.f32.mrf.mxu1  ;;  %v1253_v33 = vand.u32 2147483648, %v1241_v37 }
 0x115   : > { %v919_v47 = vadd.f32 %v918_v4, %v5730_v61  ;;  %vm1252_vm4 = vcmp.eq.f32.partialorder %v1251_v43, 8.507059e+37 }
 0x116   : > { %v5778_v63 = vpack.c.bf16 %v979_v0, %v950_v13  ;;  %v1254_v35 = vor.u32 1.1754944e-38, %v1253_v33 }
 0x117   : > { %v5781_v28 = vpack.c.bf16 %v919_v47, %v5712_v19  ;;  %v4759_v2 = vpop.eup %4758 }
 0x118   : > { %7197 = vst [vmem:[#allocation22_spill] sm:$0xff] %v5778_v63  ;;  %v1243_v25 = vmul.f32 %v4759_v2, %v1241_v37  ;;  %vm1248_vm1 = vweird.f32 %v4759_v2 }
 0x119   : > { %7198 = vst [vmem:[#allocation23_spill] sm:$0xff] %v5781_v28  ;;  %vm1249_vm3 = vmor %vm1247_vm2, %vm1248_vm1 }
 0x11a   : > { %v1244_v56 = vsub.f32 1.0, %v1243_v25  ;;  %v1217_v17 = vpop.f32.mrf.mxu2 }
 0x11b   : > { %v1230_v9 = vpop.f32.mrf.mxu3  ;;  %v1236_v23 = vadd.f32 %v1217_v17, %v1019_v29 }
 0x11c   : > { %v920_v13 = vpop.f32.mrf.mxu1  ;;  %v1245_v0 = vmul.f32 %v4759_v2, %v1244_v56  ;;  %v1237_v19 = vadd.f32 %v1230_v9, %v1020_v50 }
 0x11d   : > { %v921_v4 = vadd.f32 %v920_v13, %v5730_v61  ;;  %4760 = vtanh.f32 %v1236_v23 }
 0x11e   : > { %v1246_v47 = vadd.f32 %v4759_v2, %v1245_v0  ;;  %v4268_v42 = vmul.f32 -1.442695, %v1237_v19 }
 0x11f   : > { %v5788_v25 = vpack.c.bf16 %v921_v4, %v892_v20 }
 0x120   : > { %v1250_v63 = vsel %vm1249_vm3, %v4759_v2, %v1246_v47  ;;  %4762 = vpow2.f32 %v4268_v42 }
 0x121   : > { %v1255_v16 = vsel %vm1252_vm4, %v1254_v35, %v1250_v63  ;;  %v1014_v35 = vld [vmem:[%s7158_s29] sm:$0xff]  ;;  %s4592_s29 = sshll.u32 %s5224_s28, 3 }
 0x122   : > { %v1219_v17 = vpop.f32.mrf.mxu2 }
 0x123   : > { %v1232_v29 = vpop.f32.mrf.mxu3  ;;  %v4761_v56 = vpop.eup %4760 }
 0x124   : > { %v1204_v28 = vpop.f32.mrf.mxu1  ;;  %v1297_v50 = vmul.f32 %v4761_v56, %v1255_v16 }
 0x125   : > { %v1235_v61 = vadd.f32 %v1204_v28, %v1018_v34 }
 0x126   : > { %v4763_v37 = vpop.eup %4762 }
 0x127   : > { %v4267_v9 = vmul.f32 -1.442695, %v1235_v61  ;;  %v1280_v23 = vadd.f32 1.0, %v4763_v37 }
 0x129   : > { %4764 = vpow2.f32 %v4267_v9  ;;  %v1292_v37 = vand.u32 2147483648, %v1280_v23  ;;  %vm1286_vm10 = vweird.f32 %v1280_v23 }
 0x12a   : > { %4766 = vrcp.f32 %v1280_v23 }
 0x12c   : > { %v1206_v20 = vpop.f32.mrf.mxu1 }
 0x12d   : > { %v1290_v20 = vand.u32 2147483647, %v1280_v23 }
 0x12f   : > { %v4765_v13 = vpop.eup %4764  ;;  %vm1291_vm12 = vcmp.eq.f32.partialorder %v1290_v20, 8.507059e+37 }
 0x130   : > { %v1260_v2 = vadd.f32 1.0, %v4765_v13  ;;  %v4767_v63 = vpop.eup %4766 }
 0x131   : > { %v1282_v33 = vmul.f32 %v4767_v63, %v1280_v23  ;;  %vm1287_vm9 = vweird.f32 %v4767_v63  ;;  %v1307_v23 = vunpack.c.h.bf16 %v5737_v18 }
 0x132   : > { %4768 = vrcp.f32 %v1260_v2  ;;  %v1272_v19 = vand.u32 2147483648, %v1260_v2  ;;  %v1270_v42 = vand.u32 2147483647, %v1260_v2  ;;  %vm1266_vm6 = vweird.f32 %v1260_v2  ;;  %vm1288_vm11 = vmor %vm1286_vm10, %vm1287_vm9 }
 0x133   : > { %v1283_v28 = vsub.f32 1.0, %v1282_v33 }
 0x134   : > { %v1273_v16 = vor.u32 1.1754944e-38, %v1272_v19  ;;  %vm1271_vm8 = vcmp.eq.f32.partialorder %v1270_v42, 8.507059e+37 }
 0x135   : > { %v1284_v29 = vmul.f32 %v4767_v63, %v1283_v28 }
 0x137   : > { %v1285_v9 = vadd.f32 %v4767_v63, %v1284_v29 }
 0x138   : > { %v4769_v52 = vpop.eup %4768 }
 0x139   : > { %v1262_v43 = vmul.f32 %v4769_v52, %v1260_v2  ;;  %vm1267_vm5 = vweird.f32 %v4769_v52  ;;  %v1289_v13 = vsel %vm1288_vm11, %v4767_v63, %v1285_v9  ;;  %v1293_v2 = vor.u32 1.1754944e-38, %v1292_v37 }
 0x13a   : > { %vm1268_vm7 = vmor %vm1266_vm6, %vm1267_vm5 }
 0x13b   : > { %v1263_v0 = vsub.f32 1.0, %v1262_v43  ;;  %v1294_v33 = vsel %vm1291_vm12, %v1293_v2, %v1289_v13 }
 0x13d   : > { %v1264_v4 = vmul.f32 %v4769_v52, %v1263_v0 }
 0x13f   : > { %v1265_v47 = vadd.f32 %v4769_v52, %v1264_v4 }
 0x141   : > { %v1269_v34 = vsel %vm1268_vm7, %v4769_v52, %v1265_v47 }
 0x142   : > { %v1274_v17 = vsel %vm1271_vm8, %v1273_v16, %v1269_v34 }
 0x143   : > { %v1296_v56 = vmul.f32 %v1274_v17, %v1014_v35  ;;  %v1309_v35 = vunpack.c.h.bf16 %v5727_v55 }
 0x145   : > { %v5794_v61 = vadd.f32 %v1297_v50, %v1296_v56  ;;  %v1306_v50 = vunpack.c.l.bf16 %v5737_v18 }
 0x147   : > { %4770 = vtanh.f32 %v5794_v61 }
 0x14d   : > { %v4771_v43 = vpop.eup %4770 }
 0x14e   : > { %v1300_v52 = vmul.f32 %v4771_v43, %v1294_v33 }
 0x150   : > { %v1301_v0 = vpack.c.bf16 %v1300_v52, %v1300_v52  ;;  %v1308_v52 = vunpack.c.l.bf16 %v5727_v55 }
 0x152   : > { %1302 = vst [vmem:[#allocation2] sm:$0xf] %v1301_v0  ;;  %1318 = vmatmul.bf16.vlgmr.msra.gmra.mxu0 %v1301_v0  ;;  %1331 = vmatmul.bf16.vlgmr.msrb.gmra.mxu1 %v1301_v0 }
 0x153   : > { %1344 = vmatmul.bf16.vlgmr.msra.gmra.mxu2 %v1301_v0  ;;  %1357 = vmatmul.bf16.vlgmr.msra.gmra.mxu3 %v1301_v0 }
 0x154   : > { %1568 = vmatpush.bf16.msra.mxu0 %v5330_v31  ;;  %1581 = vmatpush.bf16.msrb.mxu1 %v5328_v30 }
 0x155   : > { %1594 = vmatpush.bf16.msra.mxu2 %v5387_v48  ;;  %1607 = vmatpush.bf16.msra.mxu3 %v5358_v38 }
 0x158   : > { %1569 = vmatpush.bf16.msra.mxu0 %v5362_v39  ;;  %1582 = vmatpush.bf16.msrb.mxu1 %v5364_v40 }
 0x159   : > { %1595 = vmatpush.bf16.msra.mxu2 %v5418_v58  ;;  %1608 = vmatpush.bf16.msra.mxu3 %v5379_v45 }
 0x15c   : > { %1570 = vmatpush.bf16.msra.mxu0 %v5403_v53  ;;  %1583 = vmatpush.bf16.msrb.mxu1 %v5405_v54 }
 0x15d   : > { %1596 = vmatpush.bf16.msra.mxu2 %v5460_v8  ;;  %1609 = vmatpush.bf16.msra.mxu3 %v5429_v62 }
 0x160   : > { %1571 = vmatpush.bf16.msra.mxu0 %v5444_v3  ;;  %1584 = vmatpush.bf16.msrb.mxu1 %v5450_v5 }
 0x161   : > { %1597 = vmatpush.bf16.msra.mxu2 %v5481_v15  ;;  %1610 = vmatpush.bf16.msra.mxu3 %v5468_v11 }
 0x164   : > { %1572 = vmatpush.bf16.msra.mxu0 %v5471_v12  ;;  %1585 = vmatpush.bf16.msrb.mxu1 %v5522_v26 }
 0x165   : > { %1598 = vmatpush.bf16.msra.mxu2 %v5524_v27  ;;  %1611 = vmatpush.bf16.msra.mxu3 %v5507_v21 }
 0x168   : > { %1573 = vmatpush.bf16.msra.mxu0 %v5510_v22  ;;  %1586 = vmatpush.bf16.msrb.mxu1 %v5548_v41 }
 0x169   : > { %1599 = vmatpush.bf16.msra.mxu2 %v5566_v49  ;;  %1612 = vmatpush.bf16.msra.mxu3 %v5542_v36 }
 0x16c   : > { %1574 = vmatpush.bf16.msra.mxu0 %v5557_v44  ;;  %1587 = vmatpush.bf16.msrb.mxu1 %v5616_v7 }
 0x16d   : > { %1600 = vmatpush.bf16.msra.mxu2 %v5588_v59  ;;  %1613 = vmatpush.bf16.msra.mxu3 %v5572_v51 }
 0x170   : > { %1575 = vmatpush.bf16.msra.mxu0 %v5585_v57  ;;  %1588 = vmatpush.bf16.msrb.mxu1 %v5631_v10 }
 0x171   : > { %1601 = vmatpush.bf16.msra.mxu2 %v5602_v1  ;;  %1614 = vmatpush.bf16.msra.mxu3 %v5591_v60 }
 0x1cf   : > { %v1319_v63 = vpop.f32.mrf.mxu0  ;;  %v1332_v19 = vpop.f32.mrf.mxu1 }
 0x1d0   : > { %v1362_v4 = vadd.f32 %v1319_v63, %v1306_v50  ;;  %v1363_v42 = vadd.f32 %v1332_v19, %v1307_v23 }
 0x1d2   : > { %v4269_v28 = vmul.f32 -1.442695, %v1362_v4  ;;  %v4270_v47 = vmul.f32 -1.442695, %v1363_v42 }
 0x1d4   : > { %4772 = vpow2.f32 %v4269_v28 }
 0x1d5   : > { %4774 = vpow2.f32 %v4270_v47 }
 0x1d6   : > { %v1345_v16 = vpop.f32.mrf.mxu2  ;;  %v1358_v34 = vpop.f32.mrf.mxu3 }
 0x1d7   : > { %v1365_v29 = vadd.f32 %v1358_v34, %v1309_v35  ;;  %v1321_v17 = vpop.f32.mrf.mxu0  ;;  %v1334_v56 = vpop.f32.mrf.mxu1  ;;  %v1364_v23 = vadd.f32 %v1345_v16, %v1308_v52 }
 0x1d9   : > { %v4271_v9 = vmul.f32 -1.442695, %v1365_v29 }
 0x1da   : > { %v4773_v37 = vpop.eup %4772 }
 0x1db   : > { %v4775_v20 = vpop.eup %4774  ;;  %v1369_v13 = vadd.f32 1.0, %v4773_v37  ;;  %4776 = vpow2.f32 %v4271_v9 }
 0x1dc   : > { %v1388_v18 = vadd.f32 1.0, %v4775_v20 }
 0x1dd   : > { %4778 = vrcp.f32 %v1369_v13  ;;  %v1381_v47 = vand.u32 2147483648, %v1369_v13  ;;  %v1379_v29 = vand.u32 2147483647, %v1369_v13  ;;  %vm1375_vm15 = vweird.f32 %v1369_v13 }
 0x1de   : > { %4780 = vrcp.f32 %v1388_v18  ;;  %v1347_v2 = vpop.f32.mrf.mxu2  ;;  %v1360_v43 = vpop.f32.mrf.mxu3  ;;  %v1400_v35 = vand.u32 2147483648, %v1388_v18  ;;  %v1398_v56 = vand.u32 2147483647, %v1388_v18  ;;  %vm1394_vm0 = vweird.f32 %v1388_v18 }
 0x1df   : > { %v1382_v16 = vor.u32 1.1754944e-38, %v1381_v47  ;;  %vm1380_vm3 = vcmp.eq.f32.partialorder %v1379_v29, 8.507059e+37 }
 0x1e0   : > { %v1401_v2 = vor.u32 1.1754944e-38, %v1400_v35  ;;  %vm1399_vm4 = vcmp.eq.f32.partialorder %v1398_v56, 8.507059e+37 }
 0x1e1   : > { %v4777_v33 = vpop.eup %4776 }
 0x1e2   : > { %v1408_v0 = vadd.f32 1.0, %v4777_v33 }
 0x1e3   : > { %v4779_v50 = vpop.eup %4778 }
 0x1e4   : > { %v4781_v63 = vpop.eup %4780  ;;  %v1371_v19 = vmul.f32 %v4779_v50, %v1369_v13  ;;  %4782 = vrcp.f32 %v1408_v0  ;;  %vm1376_vm13 = vweird.f32 %v4779_v50  ;;  %v1420_v47 = vand.u32 2147483648, %v1408_v0 }
 0x1e5   : > { %v1390_v4 = vmul.f32 %v4781_v63, %v1388_v18  ;;  %4784 = vtanh.f32 %v1364_v23  ;;  %vm1395_vm14 = vweird.f32 %v4781_v63  ;;  %vm1377_vm1 = vmor %vm1375_vm15, %vm1376_vm13  ;;  %vm1414_vm6 = vweird.f32 %v1408_v0 }
 0x1e6   : > { %v1372_v42 = vsub.f32 1.0, %v1371_v19  ;;  %vm1396_vm2 = vmor %vm1394_vm0, %vm1395_vm14  ;;  %v1421_v29 = vor.u32 1.1754944e-38, %v1420_v47 }
 0x1e7   : > { %v1391_v28 = vsub.f32 1.0, %v1390_v4 }
 0x1e8   : > { %v1373_v34 = vmul.f32 %v4779_v50, %v1372_v42 }
 0x1e9   : > { %v1392_v17 = vmul.f32 %v4781_v63, %v1391_v28 }
 0x1ea   : > { %v4783_v9 = vpop.eup %4782  ;;  %v1374_v55 = vadd.f32 %v4779_v50, %v1373_v34 }
 0x1eb   : > { %v1393_v37 = vadd.f32 %v4781_v63, %v1392_v17  ;;  %v1410_v20 = vmul.f32 %v4783_v9, %v1408_v0  ;;  %v4785_v33 = vpop.eup %4784  ;;  %vm1415_vm5 = vweird.f32 %v4783_v9 }
 0x1ec   : > { %v1378_v43 = vsel %vm1377_vm1, %v4779_v50, %v1374_v55  ;;  %v1418_v50 = vand.u32 2147483647, %v1408_v0  ;;  %vm1416_vm7 = vmor %vm1414_vm6, %vm1415_vm5  ;;  %v1436_v0 = vunpack.c.h.bf16 %v5745_v46 }
 0x1ed   : > { %v1383_v52 = vsel %vm1380_vm3, %v1382_v16, %v1378_v43  ;;  %v1397_v23 = vsel %vm1396_vm2, %v4781_v63, %v1393_v37  ;;  %v1411_v19 = vsub.f32 1.0, %v1410_v20 }
 0x1ee   : > { %v1402_v4 = vsel %vm1399_vm4, %v1401_v2, %v1397_v23  ;;  %v1425_v42 = vmul.f32 %v4785_v33, %v1383_v52  ;;  %vm1419_vm8 = vcmp.eq.f32.partialorder %v1418_v50, 8.507059e+37  ;;  %v1438_v33 = vunpack.c.h.bf16 %v5735_v14 }
 0x1ef   : > { %v1424_v28 = vmul.f32 %v1402_v4, %v5794_v61  ;;  %v1412_v34 = vmul.f32 %v4783_v9, %v1411_v19  ;;  %v1435_v61 = vunpack.c.l.bf16 %v5745_v46 }
 0x1f1   : > { %v5834_v13 = vadd.f32 %v1425_v42, %v1424_v28  ;;  %v1413_v18 = vadd.f32 %v4783_v9, %v1412_v34 }
 0x1f3   : > { %4786 = vtanh.f32 %v5834_v13  ;;  %v1417_v35 = vsel %vm1416_vm7, %v4783_v9, %v1413_v18 }
 0x1f4   : > { %v1422_v17 = vsel %vm1419_vm8, %v1421_v29, %v1417_v35 }
 0x1f9   : > { %v4787_v63 = vpop.eup %4786 }
 0x1fa   : > { %v1428_v56 = vmul.f32 %v4787_v63, %v1422_v17  ;;  %v1437_v63 = vunpack.c.l.bf16 %v5735_v14 }
 0x1fc   : > { %v1429_v55 = vpack.c.bf16 %v1428_v56, %v1428_v56 }
 0x1fe   : > { %1431 = vst [vmem:[#allocation2 + $0x4] sm:$0xf] %v1429_v55  ;;  %1447 = vmatmul.bf16.vlgmr.msrb.gmra.mxu0 %v1429_v55  ;;  %1460 = vmatmul.bf16.vlgmr.msra.gmra.mxu1 %v1429_v55 }
 0x1ff   : > { %1473 = vmatmul.bf16.vlgmr.msrb.gmra.mxu2 %v1429_v55  ;;  %1486 = vmatmul.bf16.vlgmr.msrb.gmra.mxu3 %v1429_v55 }
 0x200   : > { %1697 = vmatpush.bf16.msrb.mxu0 %v5330_v31  ;;  %1710 = vmatpush.bf16.msra.mxu1 %v5328_v30 }
 0x201   : > { %1723 = vmatpush.bf16.msrb.mxu2 %v5387_v48  ;;  %1736 = vmatpush.bf16.msrb.mxu3 %v5358_v38 }
 0x204   : > { %1698 = vmatpush.bf16.msrb.mxu0 %v5362_v39  ;;  %1711 = vmatpush.bf16.msra.mxu1 %v5364_v40 }
 0x205   : > { %1724 = vmatpush.bf16.msrb.mxu2 %v5418_v58  ;;  %1737 = vmatpush.bf16.msrb.mxu3 %v5379_v45 }
 0x208   : > { %1699 = vmatpush.bf16.msrb.mxu0 %v5403_v53  ;;  %1712 = vmatpush.bf16.msra.mxu1 %v5405_v54 }
 0x209   : > { %1725 = vmatpush.bf16.msrb.mxu2 %v5460_v8  ;;  %1738 = vmatpush.bf16.msrb.mxu3 %v5429_v62 }
 0x20c   : > { %1700 = vmatpush.bf16.msrb.mxu0 %v5444_v3  ;;  %1713 = vmatpush.bf16.msra.mxu1 %v5450_v5 }
 0x20d   : > { %1726 = vmatpush.bf16.msrb.mxu2 %v5481_v15  ;;  %1739 = vmatpush.bf16.msrb.mxu3 %v5468_v11 }
 0x210   : > { %1701 = vmatpush.bf16.msrb.mxu0 %v5471_v12  ;;  %1714 = vmatpush.bf16.msra.mxu1 %v5522_v26 }
 0x211   : > { %1727 = vmatpush.bf16.msrb.mxu2 %v5524_v27  ;;  %1740 = vmatpush.bf16.msrb.mxu3 %v5507_v21 }
 0x214   : > { %1702 = vmatpush.bf16.msrb.mxu0 %v5510_v22  ;;  %1715 = vmatpush.bf16.msra.mxu1 %v5548_v41 }
 0x215   : > { %1728 = vmatpush.bf16.msrb.mxu2 %v5566_v49  ;;  %1741 = vmatpush.bf16.msrb.mxu3 %v5542_v36 }
 0x218   : > { %1703 = vmatpush.bf16.msrb.mxu0 %v5557_v44  ;;  %1716 = vmatpush.bf16.msra.mxu1 %v5616_v7 }
 0x219   : > { %1729 = vmatpush.bf16.msrb.mxu2 %v5588_v59  ;;  %1742 = vmatpush.bf16.msrb.mxu3 %v5572_v51 }
 0x21c   : > { %1704 = vmatpush.bf16.msrb.mxu0 %v5585_v57  ;;  %1717 = vmatpush.bf16.msra.mxu1 %v5631_v10 }
 0x21d   : > { %1730 = vmatpush.bf16.msrb.mxu2 %v5602_v1  ;;  %1743 = vmatpush.bf16.msrb.mxu3 %v5591_v60 }
 0x27b   : > { %v1448_v9 = vpop.f32.mrf.mxu0  ;;  %v1461_v16 = vpop.f32.mrf.mxu1 }
 0x27c   : > { %v1491_v37 = vadd.f32 %v1448_v9, %v1435_v61  ;;  %v1492_v20 = vadd.f32 %v1461_v16, %v1436_v0 }
 0x27e   : > { %v4272_v2 = vmul.f32 -1.442695, %v1491_v37  ;;  %v4273_v43 = vmul.f32 -1.442695, %v1492_v20 }
 0x280   : > { %4788 = vpow2.f32 %v4272_v2 }
 0x281   : > { %4790 = vpow2.f32 %v4273_v43 }
 0x282   : > { %v1474_v52 = vpop.f32.mrf.mxu2  ;;  %v1487_v23 = vpop.f32.mrf.mxu3 }
 0x283   : > { %v1494_v19 = vadd.f32 %v1487_v23, %v1438_v33  ;;  %v1450_v4 = vpop.f32.mrf.mxu0  ;;  %v1463_v42 = vpop.f32.mrf.mxu1  ;;  %v1493_v55 = vadd.f32 %v1474_v52, %v1437_v63 }
 0x285   : > { %v4274_v28 = vmul.f32 -1.442695, %v1494_v19 }
 0x286   : > { %v4789_v34 = vpop.eup %4788 }
 0x287   : > { %v4791_v18 = vpop.eup %4790  ;;  %v1498_v47 = vadd.f32 1.0, %v4789_v34  ;;  %4792 = vpow2.f32 %v4274_v28 }
 0x288   : > { %v1517_v46 = vadd.f32 1.0, %v4791_v18 }
 0x289   : > { %4794 = vrcp.f32 %v1498_v47  ;;  %v1510_v20 = vand.u32 2147483648, %v1498_v47  ;;  %v1508_v33 = vand.u32 2147483647, %v1498_v47  ;;  %vm1504_vm11 = vweird.f32 %v1498_v47 }
 0x28a   : > { %4796 = vrcp.f32 %v1517_v46  ;;  %v1476_v50 = vpop.f32.mrf.mxu2  ;;  %v1489_v35 = vpop.f32.mrf.mxu3  ;;  %v1529_v2 = vand.u32 2147483648, %v1517_v46  ;;  %v1527_v19 = vand.u32 2147483647, %v1517_v46  ;;  %vm1523_vm12 = vweird.f32 %v1517_v46 }
 0x28b   : > { %v1511_v52 = vor.u32 1.1754944e-38, %v1510_v20  ;;  %vm1509_vm15 = vcmp.eq.f32.partialorder %v1508_v33, 8.507059e+37 }
 0x28c   : > { %v1530_v34 = vor.u32 1.1754944e-38, %v1529_v2  ;;  %vm1528_vm0 = vcmp.eq.f32.partialorder %v1527_v19, 8.507059e+37 }
 0x28d   : > { %v4793_v29 = vpop.eup %4792 }
 0x28e   : > { %v1537_v17 = vadd.f32 1.0, %v4793_v29 }
 0x28f   : > { %v4795_v56 = vpop.eup %4794 }
 0x290   : > { %v4797_v61 = vpop.eup %4796  ;;  %v1500_v0 = vmul.f32 %v4795_v56, %v1498_v47  ;;  %4798 = vrcp.f32 %v1537_v17  ;;  %vm1505_vm9 = vweird.f32 %v4795_v56  ;;  %vm1543_vm2 = vweird.f32 %v1537_v17 }
 0x291   : > { %v1519_v9 = vmul.f32 %v4797_v61, %v1517_v46  ;;  %4800 = vtanh.f32 %v1493_v55  ;;  %vm1524_vm10 = vweird.f32 %v4797_v61  ;;  %vm1506_vm13 = vmor %vm1504_vm11, %vm1505_vm9 }
 0x292   : > { %v1501_v16 = vsub.f32 1.0, %v1500_v0  ;;  %vm1525_vm14 = vmor %vm1523_vm12, %vm1524_vm10 }
 0x293   : > { %v1520_v37 = vsub.f32 1.0, %v1519_v9 }
 0x294   : > { %v1502_v43 = vmul.f32 %v4795_v56, %v1501_v16 }
 0x295   : > { %v1521_v23 = vmul.f32 %v4797_v61, %v1520_v37  ;;  %v1549_v37 = vand.u32 2147483648, %v1537_v17 }
 0x296   : > { %v4799_v4 = vpop.eup %4798  ;;  %v1503_v14 = vadd.f32 %v4795_v56, %v1502_v43 }
 0x297   : > { %v1522_v42 = vadd.f32 %v4797_v61, %v1521_v23  ;;  %v1539_v28 = vmul.f32 %v4799_v4, %v1537_v17  ;;  %v4801_v50 = vpop.eup %4800  ;;  %vm1544_vm1 = vweird.f32 %v4799_v4  ;;  %v1550_v2 = vor.u32 1.1754944e-38, %v1549_v37 }
 0x298   : > { %v1507_v18 = vsel %vm1506_vm13, %v4795_v56, %v1503_v14  ;;  %v1547_v56 = vand.u32 2147483647, %v1537_v17  ;;  %vm1545_vm3 = vmor %vm1543_vm2, %vm1544_vm1 }
 0x299   : > { %v1512_v35 = vsel %vm1509_vm15, %v1511_v52, %v1507_v18  ;;  %v1526_v29 = vsel %vm1525_vm14, %v4797_v61, %v1522_v42  ;;  %v1540_v63 = vsub.f32 1.0, %v1539_v28  ;;  %v7200_v18 = vld [vmem:[#allocation18_spill] sm:$0xff] }
 0x29a   : > { %v1531_v55 = vsel %vm1528_vm0, %v1530_v34, %v1526_v29  ;;  %v1554_v0 = vmul.f32 %v4801_v50, %v1512_v35  ;;  %vm1548_vm4 = vcmp.eq.f32.partialorder %v1547_v56, 8.507059e+37  ;;  %v1567_v50 = vunpack.c.h.bf16 %v7200_v18 }
 0x29b   : > { %v1553_v9 = vmul.f32 %v1531_v55, %v5834_v13  ;;  %v1541_v16 = vmul.f32 %v4799_v4, %v1540_v63  ;;  %v7199_v13 = vld [vmem:[#allocation20_spill] sm:$0xff] }
 0x29c   : > { %v1564_v17 = vunpack.c.l.bf16 %v7199_v13  ;;  %v1565_v19 = vunpack.c.h.bf16 %v7199_v13 }
 0x29d   : > { %v5874_v47 = vadd.f32 %v1554_v0, %v1553_v9  ;;  %v1542_v46 = vadd.f32 %v4799_v4, %v1541_v16 }
 0x29f   : > { %4802 = vtanh.f32 %v5874_v47  ;;  %v1546_v20 = vsel %vm1545_vm3, %v4799_v4, %v1542_v46 }
 0x2a0   : > { %v1551_v43 = vsel %vm1548_vm4, %v1550_v2, %v1546_v20 }
 0x2a5   : > { %v4803_v61 = vpop.eup %4802 }
 0x2a6   : > { %v1557_v33 = vmul.f32 %v4803_v61, %v1551_v43  ;;  %v1566_v43 = vunpack.c.l.bf16 %v7200_v18 }
 0x2a8   : > { %v1558_v23 = vpack.c.bf16 %v1557_v33, %v1557_v33 }
 0x2aa   : > { %1560 = vst [vmem:[#allocation2 + $0x8] sm:$0xf] %v1558_v23  ;;  %1576 = vmatmul.bf16.vlgmr.msra.gmra.mxu0 %v1558_v23  ;;  %1589 = vmatmul.bf16.vlgmr.msrb.gmra.mxu1 %v1558_v23 }
 0x2ab   : > { %1602 = vmatmul.bf16.vlgmr.msra.gmra.mxu2 %v1558_v23  ;;  %1615 = vmatmul.bf16.vlgmr.msra.gmra.mxu3 %v1558_v23 }
 0x2ac   : > { %1826 = vmatpush.bf16.msra.mxu0 %v5330_v31  ;;  %1839 = vmatpush.bf16.msrb.mxu1 %v5328_v30 }
 0x2ad   : > { %1852 = vmatpush.bf16.msra.mxu2 %v5387_v48  ;;  %1865 = vmatpush.bf16.msra.mxu3 %v5358_v38 }
 0x2b0   : > { %1827 = vmatpush.bf16.msra.mxu0 %v5362_v39  ;;  %1840 = vmatpush.bf16.msrb.mxu1 %v5364_v40 }
 0x2b1   : > { %1853 = vmatpush.bf16.msra.mxu2 %v5418_v58  ;;  %1866 = vmatpush.bf16.msra.mxu3 %v5379_v45 }
 0x2b4   : > { %1828 = vmatpush.bf16.msra.mxu0 %v5403_v53  ;;  %1841 = vmatpush.bf16.msrb.mxu1 %v5405_v54 }
 0x2b5   : > { %1854 = vmatpush.bf16.msra.mxu2 %v5460_v8  ;;  %1867 = vmatpush.bf16.msra.mxu3 %v5429_v62 }
 0x2b8   : > { %1829 = vmatpush.bf16.msra.mxu0 %v5444_v3  ;;  %1842 = vmatpush.bf16.msrb.mxu1 %v5450_v5 }
 0x2b9   : > { %1855 = vmatpush.bf16.msra.mxu2 %v5481_v15  ;;  %1868 = vmatpush.bf16.msra.mxu3 %v5468_v11 }
 0x2bc   : > { %1830 = vmatpush.bf16.msra.mxu0 %v5471_v12  ;;  %1843 = vmatpush.bf16.msrb.mxu1 %v5522_v26 }
 0x2bd   : > { %1856 = vmatpush.bf16.msra.mxu2 %v5524_v27  ;;  %1869 = vmatpush.bf16.msra.mxu3 %v5507_v21 }
 0x2c0   : > { %1831 = vmatpush.bf16.msra.mxu0 %v5510_v22  ;;  %1844 = vmatpush.bf16.msrb.mxu1 %v5548_v41 }
 0x2c1   : > { %1857 = vmatpush.bf16.msra.mxu2 %v5566_v49  ;;  %1870 = vmatpush.bf16.msra.mxu3 %v5542_v36 }
 0x2c4   : > { %1832 = vmatpush.bf16.msra.mxu0 %v5557_v44  ;;  %1845 = vmatpush.bf16.msrb.mxu1 %v5616_v7 }
 0x2c5   : > { %1858 = vmatpush.bf16.msra.mxu2 %v5588_v59  ;;  %1871 = vmatpush.bf16.msra.mxu3 %v5572_v51 }
 0x2c8   : > { %1833 = vmatpush.bf16.msra.mxu0 %v5585_v57  ;;  %1846 = vmatpush.bf16.msrb.mxu1 %v5631_v10 }
 0x2c9   : > { %1859 = vmatpush.bf16.msra.mxu2 %v5602_v1  ;;  %1872 = vmatpush.bf16.msra.mxu3 %v5591_v60 }
 0x327   : > { %v1577_v4 = vpop.f32.mrf.mxu0  ;;  %v1590_v14 = vpop.f32.mrf.mxu1 }
 0x328   : > { %v1620_v52 = vadd.f32 %v1577_v4, %v1564_v17  ;;  %v1621_v42 = vadd.f32 %v1590_v14, %v1565_v19 }
 0x32a   : > { %v4275_v28 = vmul.f32 -1.442695, %v1620_v52  ;;  %v4276_v34 = vmul.f32 -1.442695, %v1621_v42 }
 0x32c   : > { %4804 = vpow2.f32 %v4275_v28 }
 0x32d   : > { %4806 = vpow2.f32 %v4276_v34 }
 0x32e   : > { %v1603_v35 = vpop.f32.mrf.mxu2  ;;  %v1616_v29 = vpop.f32.mrf.mxu3 }
 0x32f   : > { %v1623_v63 = vadd.f32 %v1616_v29, %v1567_v50  ;;  %v1579_v55 = vpop.f32.mrf.mxu0  ;;  %v1592_v0 = vpop.f32.mrf.mxu1  ;;  %v1622_v13 = vadd.f32 %v1603_v35, %v1566_v43 }
 0x331   : > { %v4277_v9 = vmul.f32 -1.442695, %v1623_v63 }
 0x332   : > { %v4805_v16 = vpop.eup %4804 }
 0x333   : > { %v4807_v46 = vpop.eup %4806  ;;  %v1627_v37 = vadd.f32 1.0, %v4805_v16  ;;  %4808 = vpow2.f32 %v4277_v9 }
 0x334   : > { %v1646_v56 = vadd.f32 1.0, %v4807_v46 }
 0x335   : > { %4810 = vrcp.f32 %v1627_v37  ;;  %v1639_v42 = vand.u32 2147483648, %v1627_v37  ;;  %v1637_v50 = vand.u32 2147483647, %v1627_v37  ;;  %vm1633_vm7 = vweird.f32 %v1627_v37 }
 0x336   : > { %4812 = vrcp.f32 %v1646_v56  ;;  %v1605_v20 = vpop.f32.mrf.mxu2  ;;  %v1618_v2 = vpop.f32.mrf.mxu3  ;;  %v1658_v28 = vand.u32 2147483648, %v1646_v56  ;;  %v1656_v63 = vand.u32 2147483647, %v1646_v56  ;;  %vm1652_vm8 = vweird.f32 %v1646_v56 }
 0x337   : > { %v1640_v35 = vor.u32 1.1754944e-38, %v1639_v42  ;;  %vm1638_vm11 = vcmp.eq.f32.partialorder %v1637_v50, 8.507059e+37 }
 0x338   : > { %v1659_v16 = vor.u32 1.1754944e-38, %v1658_v28  ;;  %vm1657_vm12 = vcmp.eq.f32.partialorder %v1656_v63, 8.507059e+37 }
 0x339   : > { %v4809_v61 = vpop.eup %4808 }
 0x33a   : > { %v1666_v33 = vadd.f32 1.0, %v4809_v61 }
 0x33b   : > { %v4811_v23 = vpop.eup %4810 }
 0x33c   : > { %v4813_v17 = vpop.eup %4812  ;;  %v1629_v19 = vmul.f32 %v4811_v23, %v1627_v37  ;;  %4814 = vrcp.f32 %v1666_v33  ;;  %vm1634_vm5 = vweird.f32 %v4811_v23  ;;  %vm1672_vm14 = vweird.f32 %v1666_v33 }
 0x33d   : > { %v1648_v4 = vmul.f32 %v4813_v17, %v1646_v56  ;;  %4816 = vtanh.f32 %v1622_v13  ;;  %vm1653_vm6 = vweird.f32 %v4813_v17  ;;  %vm1635_vm9 = vmor %vm1633_vm7, %vm1634_vm5 }
 0x33e   : > { %v1630_v14 = vsub.f32 1.0, %v1629_v19  ;;  %vm1654_vm10 = vmor %vm1652_vm8, %vm1653_vm6 }
 0x33f   : > { %v1649_v52 = vsub.f32 1.0, %v1648_v4 }
 0x340   : > { %v1631_v34 = vmul.f32 %v4811_v23, %v1630_v14 }
 0x341   : > { %v1650_v29 = vmul.f32 %v4813_v17, %v1649_v52  ;;  %v1678_v52 = vand.u32 2147483648, %v1666_v33 }
 0x342   : > { %v4815_v55 = vpop.eup %4814  ;;  %v1632_v18 = vadd.f32 %v4811_v23, %v1631_v34 }
 0x343   : > { %v1651_v0 = vadd.f32 %v4813_v17, %v1650_v29  ;;  %v1668_v9 = vmul.f32 %v4815_v55, %v1666_v33  ;;  %v4817_v20 = vpop.eup %4816  ;;  %vm1673_vm13 = vweird.f32 %v4815_v55  ;;  %v1679_v28 = vor.u32 1.1754944e-38, %v1678_v52 }
 0x344   : > { %v1636_v46 = vsel %vm1635_vm9, %v4811_v23, %v1632_v18  ;;  %v1676_v23 = vand.u32 2147483647, %v1666_v33  ;;  %vm1674_vm15 = vmor %vm1672_vm14, %vm1673_vm13  ;;  %v1694_v33 = vunpack.c.h.bf16 %v5765_v6 }
 0x345   : > { %v1641_v2 = vsel %vm1638_vm11, %v1640_v35, %v1636_v46  ;;  %v1655_v61 = vsel %vm1654_vm10, %v4813_v17, %v1651_v0  ;;  %v1669_v43 = vsub.f32 1.0, %v1668_v9 }
 0x346   : > { %v1660_v13 = vsel %vm1657_vm12, %v1659_v16, %v1655_v61  ;;  %v1683_v19 = vmul.f32 %v4817_v20, %v1641_v2  ;;  %vm1677_vm0 = vcmp.eq.f32.partialorder %v1676_v23, 8.507059e+37  ;;  %v7201_v16 = vld [vmem:[#allocation19_spill] sm:$0xff] }
 0x347   : > { %v1682_v4 = vmul.f32 %v1660_v13, %v5874_v47  ;;  %v1670_v14 = vmul.f32 %v4815_v55, %v1669_v43  ;;  %v1693_v47 = vunpack.c.l.bf16 %v5765_v6  ;;  %v1696_v46 = vunpack.c.h.bf16 %v7201_v16 }
 0x349   : > { %v5914_v37 = vadd.f32 %v1683_v19, %v1682_v4  ;;  %v1671_v56 = vadd.f32 %v4815_v55, %v1670_v14 }
 0x34b   : > { %4818 = vtanh.f32 %v5914_v37  ;;  %v1675_v42 = vsel %vm1674_vm15, %v4815_v55, %v1671_v56 }
 0x34c   : > { %v1680_v34 = vsel %vm1677_vm0, %v1679_v28, %v1675_v42  ;;  %v1695_v28 = vunpack.c.l.bf16 %v7201_v16 }
 0x351   : > { %v4819_v17 = vpop.eup %4818 }
 0x352   : > { %v1686_v50 = vmul.f32 %v4819_v17, %v1680_v34 }
 0x354   : > { %v1687_v29 = vpack.c.bf16 %v1686_v50, %v1686_v50 }
 0x356   : > { %1689 = vst [vmem:[#allocation2 + $0xc] sm:$0xf] %v1687_v29  ;;  %1705 = vmatmul.bf16.vlgmr.msrb.gmra.mxu0 %v1687_v29  ;;  %1718 = vmatmul.bf16.vlgmr.msra.gmra.mxu1 %v1687_v29 }
 0x357   : > { %1731 = vmatmul.bf16.vlgmr.msrb.gmra.mxu2 %v1687_v29  ;;  %1744 = vmatmul.bf16.vlgmr.msrb.gmra.mxu3 %v1687_v29 }
 0x358   : > { %1955 = vmatpush.bf16.msrb.mxu0 %v5330_v31  ;;  %1968 = vmatpush.bf16.msra.mxu1 %v5328_v30 }
 0x359   : > { %1981 = vmatpush.bf16.msrb.mxu2 %v5387_v48  ;;  %1994 = vmatpush.bf16.msrb.mxu3 %v5358_v38 }
 0x35c   : > { %1956 = vmatpush.bf16.msrb.mxu0 %v5362_v39  ;;  %1969 = vmatpush.bf16.msra.mxu1 %v5364_v40 }
 0x35d   : > { %1982 = vmatpush.bf16.msrb.mxu2 %v5418_v58  ;;  %1995 = vmatpush.bf16.msrb.mxu3 %v5379_v45 }
 0x360   : > { %1957 = vmatpush.bf16.msrb.mxu0 %v5403_v53  ;;  %1970 = vmatpush.bf16.msra.mxu1 %v5405_v54 }
 0x361   : > { %1983 = vmatpush.bf16.msrb.mxu2 %v5460_v8  ;;  %1996 = vmatpush.bf16.msrb.mxu3 %v5429_v62 }
 0x364   : > { %1958 = vmatpush.bf16.msrb.mxu0 %v5444_v3  ;;  %1971 = vmatpush.bf16.msra.mxu1 %v5450_v5 }
 0x365   : > { %1984 = vmatpush.bf16.msrb.mxu2 %v5481_v15  ;;  %1997 = vmatpush.bf16.msrb.mxu3 %v5468_v11 }
 0x368   : > { %1959 = vmatpush.bf16.msrb.mxu0 %v5471_v12  ;;  %1972 = vmatpush.bf16.msra.mxu1 %v5522_v26 }
 0x369   : > { %1985 = vmatpush.bf16.msrb.mxu2 %v5524_v27  ;;  %1998 = vmatpush.bf16.msrb.mxu3 %v5507_v21 }
 0x36c   : > { %1960 = vmatpush.bf16.msrb.mxu0 %v5510_v22  ;;  %1973 = vmatpush.bf16.msra.mxu1 %v5548_v41 }
 0x36d   : > { %1986 = vmatpush.bf16.msrb.mxu2 %v5566_v49  ;;  %1999 = vmatpush.bf16.msrb.mxu3 %v5542_v36 }
 0x370   : > { %1961 = vmatpush.bf16.msrb.mxu0 %v5557_v44  ;;  %1974 = vmatpush.bf16.msra.mxu1 %v5616_v7 }
 0x371   : > { %1987 = vmatpush.bf16.msrb.mxu2 %v5588_v59  ;;  %2000 = vmatpush.bf16.msrb.mxu3 %v5572_v51 }
 0x374   : > { %1962 = vmatpush.bf16.msrb.mxu0 %v5585_v57  ;;  %1975 = vmatpush.bf16.msra.mxu1 %v5631_v10 }
 0x375   : > { %1988 = vmatpush.bf16.msrb.mxu2 %v5602_v1  ;;  %2001 = vmatpush.bf16.msrb.mxu3 %v5591_v60 }
 0x3d3   : > { %v1706_v63 = vpop.f32.mrf.mxu0  ;;  %v1719_v55 = vpop.f32.mrf.mxu1 }
 0x3d4   : > { %v1749_v18 = vadd.f32 %v1706_v63, %v1693_v47  ;;  %v1750_v35 = vadd.f32 %v1719_v55, %v1694_v33 }
 0x3d6   : > { %v4278_v0 = vmul.f32 -1.442695, %v1749_v18  ;;  %v4279_v9 = vmul.f32 -1.442695, %v1750_v35 }
 0x3d8   : > { %4820 = vpow2.f32 %v4278_v0 }
 0x3d9   : > { %4822 = vpow2.f32 %v4279_v9 }
 0x3da   : > { %v1732_v20 = vpop.f32.mrf.mxu2  ;;  %v1745_v2 = vpop.f32.mrf.mxu3 }
 0x3db   : > { %v1752_v61 = vadd.f32 %v1745_v2, %v1696_v46  ;;  %v1708_v43 = vpop.f32.mrf.mxu0  ;;  %v1721_v13 = vpop.f32.mrf.mxu1  ;;  %v1751_v50 = vadd.f32 %v1732_v20, %v1695_v28 }
 0x3dd   : > { %v4280_v19 = vmul.f32 -1.442695, %v1752_v61 }
 0x3de   : > { %v4821_v4 = vpop.eup %4820 }
 0x3df   : > { %v4823_v14 = vpop.eup %4822  ;;  %v1756_v56 = vadd.f32 1.0, %v4821_v4  ;;  %4824 = vpow2.f32 %v4280_v19 }
 0x3e0   : > { %v1775_v6 = vadd.f32 1.0, %v4823_v14 }
 0x3e1   : > { %4826 = vrcp.f32 %v1756_v56  ;;  %v1768_v18 = vand.u32 2147483648, %v1756_v56  ;;  %v1766_v9 = vand.u32 2147483647, %v1756_v56  ;;  %vm1762_vm3 = vweird.f32 %v1756_v56 }
 0x3e2   : > { %4828 = vrcp.f32 %v1775_v6  ;;  %v1734_v52 = vpop.f32.mrf.mxu2  ;;  %v1747_v23 = vpop.f32.mrf.mxu3  ;;  %v1787_v35 = vand.u32 2147483648, %v1775_v6  ;;  %v1785_v2 = vand.u32 2147483647, %v1775_v6  ;;  %vm1781_vm4 = vweird.f32 %v1775_v6 }
 0x3e3   : > { %v1769_v20 = vor.u32 1.1754944e-38, %v1768_v18  ;;  %vm1767_vm7 = vcmp.eq.f32.partialorder %v1766_v9, 8.507059e+37 }
 0x3e4   : > { %v1788_v19 = vor.u32 1.1754944e-38, %v1787_v35  ;;  %vm1786_vm8 = vcmp.eq.f32.partialorder %v1785_v2, 8.507059e+37 }
 0x3e5   : > { %v4825_v42 = vpop.eup %4824 }
 0x3e6   : > { %v1795_v17 = vadd.f32 1.0, %v4825_v42 }
 0x3e7   : > { %v4827_v34 = vpop.eup %4826 }
 0x3e8   : > { %v4829_v29 = vpop.eup %4828  ;;  %v1758_v47 = vmul.f32 %v4827_v34, %v1756_v56  ;;  %4830 = vrcp.f32 %v1795_v17  ;;  %vm1763_vm1 = vweird.f32 %v4827_v34  ;;  %vm1801_vm10 = vweird.f32 %v1795_v17 }
 0x3e9   : > { %v1777_v33 = vmul.f32 %v4829_v29, %v1775_v6  ;;  %4832 = vtanh.f32 %v1751_v50  ;;  %vm1782_vm2 = vweird.f32 %v4829_v29  ;;  %vm1764_vm5 = vmor %vm1762_vm3, %vm1763_vm1 }
 0x3ea   : > { %v1759_v63 = vsub.f32 1.0, %v1758_v47  ;;  %vm1783_vm6 = vmor %vm1781_vm4, %vm1782_vm2 }
 0x3eb   : > { %v1778_v55 = vsub.f32 1.0, %v1777_v33 }
 0x3ec   : > { %v1760_v0 = vmul.f32 %v4827_v34, %v1759_v63  ;;  %v1807_v63 = vand.u32 2147483648, %v1795_v17 }
 0x3ed   : > { %v1779_v46 = vmul.f32 %v4829_v29, %v1778_v55 }
 0x3ee   : > { %v4831_v61 = vpop.eup %4830  ;;  %v1761_v16 = vadd.f32 %v4827_v34, %v1760_v0  ;;  %v1808_v18 = vor.u32 1.1754944e-38, %v1807_v63 }
 0x3ef   : > { %v1780_v43 = vadd.f32 %v4829_v29, %v1779_v46  ;;  %v1797_v13 = vmul.f32 %v4831_v61, %v1795_v17  ;;  %v4833_v14 = vpop.eup %4832  ;;  %vm1802_vm9 = vweird.f32 %v4831_v61 }
 0x3f0   : > { %v1765_v4 = vsel %vm1764_vm5, %v4827_v34, %v1761_v16  ;;  %v1805_v34 = vand.u32 2147483647, %v1795_v17  ;;  %vm1803_vm11 = vmor %vm1801_vm10, %vm1802_vm9 }
 0x3f1   : > { %v1770_v52 = vsel %vm1767_vm7, %v1769_v20, %v1765_v4  ;;  %v1784_v23 = vsel %vm1783_vm6, %v4829_v29, %v1780_v43  ;;  %v1798_v42 = vsub.f32 1.0, %v1797_v13 }
 0x3f2   : > { %v1789_v28 = vsel %vm1786_vm8, %v1788_v19, %v1784_v23  ;;  %v1812_v50 = vmul.f32 %v4833_v14, %v1770_v52  ;;  %vm1806_vm12 = vcmp.eq.f32.partialorder %v1805_v34, 8.507059e+37 }
 0x3f3   : > { %v1811_v47 = vmul.f32 %v1789_v28, %v5914_v37  ;;  %v1799_v33 = vmul.f32 %v4831_v61, %v1798_v42 }
 0x3f5   : > { %v5954_v56 = vadd.f32 %v1812_v50, %v1811_v47  ;;  %v1800_v6 = vadd.f32 %v4831_v61, %v1799_v33 }
 0x3f7   : > { %4834 = vtanh.f32 %v5954_v56  ;;  %v1804_v55 = vsel %vm1803_vm11, %v4831_v61, %v1800_v6 }
 0x3f8   : > { %v1809_v35 = vsel %vm1806_vm12, %v1808_v18, %v1804_v55 }
 0x3fd   : > { %v4835_v29 = vpop.eup %4834 }
 0x3fe   : > { %v1815_v0 = vmul.f32 %v4835_v29, %v1809_v35 }
 0x400   : > { %v1816_v9 = vpack.c.bf16 %v1815_v0, %v1815_v0 }
 0x402   : > { %1818 = vst [vmem:[#allocation2 + $0x10] sm:$0xf] %v1816_v9  ;;  %1834 = vmatmul.bf16.vlgmr.msra.gmra.mxu0 %v1816_v9  ;;  %1847 = vmatmul.bf16.vlgmr.msrb.gmra.mxu1 %v1816_v9 }
 0x403   : > { %1860 = vmatmul.bf16.vlgmr.msra.gmra.mxu2 %v1816_v9  ;;  %1873 = vmatmul.bf16.vlgmr.msra.gmra.mxu3 %v1816_v9 }
 0x404   : > { %2084 = vmatpush.bf16.msra.mxu0 %v5330_v31  ;;  %2097 = vmatpush.bf16.msrb.mxu1 %v5328_v30  ;;  %v1822_v30 = vunpack.c.l.bf16 %v5773_v32  ;;  %v1823_v31 = vunpack.c.h.bf16 %v5773_v32 }
 0x405   : > { %2110 = vmatpush.bf16.msra.mxu2 %v5387_v48  ;;  %2123 = vmatpush.bf16.msra.mxu3 %v5358_v38 }
 0x408   : > { %2085 = vmatpush.bf16.msra.mxu0 %v5362_v39  ;;  %2098 = vmatpush.bf16.msrb.mxu1 %v5364_v40 }
 0x409   : > { %2111 = vmatpush.bf16.msra.mxu2 %v5418_v58  ;;  %2124 = vmatpush.bf16.msra.mxu3 %v5379_v45 }
 0x40c   : > { %2086 = vmatpush.bf16.msra.mxu0 %v5403_v53  ;;  %2099 = vmatpush.bf16.msrb.mxu1 %v5405_v54  ;;  %v1825_v54 = vunpack.c.h.bf16 %v5763_v24 }
 0x40d   : > { %2112 = vmatpush.bf16.msra.mxu2 %v5460_v8  ;;  %2125 = vmatpush.bf16.msra.mxu3 %v5429_v62 }
 0x410   : > { %2087 = vmatpush.bf16.msra.mxu0 %v5444_v3  ;;  %2100 = vmatpush.bf16.msrb.mxu1 %v5450_v5 }
 0x411   : > { %2113 = vmatpush.bf16.msra.mxu2 %v5481_v15  ;;  %2126 = vmatpush.bf16.msra.mxu3 %v5468_v11 }
 0x414   : > { %2088 = vmatpush.bf16.msra.mxu0 %v5471_v12  ;;  %2101 = vmatpush.bf16.msrb.mxu1 %v5522_v26 }
 0x415   : > { %2114 = vmatpush.bf16.msra.mxu2 %v5524_v27  ;;  %2127 = vmatpush.bf16.msra.mxu3 %v5507_v21 }
 0x418   : > { %2089 = vmatpush.bf16.msra.mxu0 %v5510_v22  ;;  %2102 = vmatpush.bf16.msrb.mxu1 %v5548_v41  ;;  %v1824_v41 = vunpack.c.l.bf16 %v5763_v24 }
 0x419   : > { %2115 = vmatpush.bf16.msra.mxu2 %v5566_v49  ;;  %2128 = vmatpush.bf16.msra.mxu3 %v5542_v36 }
 0x41c   : > { %2090 = vmatpush.bf16.msra.mxu0 %v5557_v44  ;;  %2103 = vmatpush.bf16.msrb.mxu1 %v5616_v7 }
 0x41d   : > { %2116 = vmatpush.bf16.msra.mxu2 %v5588_v59  ;;  %2129 = vmatpush.bf16.msra.mxu3 %v5572_v51 }
 0x420   : > { %2091 = vmatpush.bf16.msra.mxu0 %v5585_v57  ;;  %2104 = vmatpush.bf16.msrb.mxu1 %v5631_v10 }
 0x421   : > { %2117 = vmatpush.bf16.msra.mxu2 %v5602_v1  ;;  %2130 = vmatpush.bf16.msra.mxu3 %v5591_v60 }
 0x47f   : > { %v1835_v38 = vpop.f32.mrf.mxu0  ;;  %v1848_v39 = vpop.f32.mrf.mxu1 }
 0x480   : > { %v1878_v40 = vadd.f32 %v1835_v38, %v1822_v30  ;;  %v1879_v45 = vadd.f32 %v1848_v39, %v1823_v31  ;;  %v4666_v30 = vld [vmem:[%s7202_s2 + $0xec] sm:$0xf0]  ;;  %v4664_v31 = vld [vmem:[%s7202_s2 + $0xe4] sm:$0xf]  ;;  %v7203_v38 = vld [vmem:[#allocation23_spill] sm:$0xff] }
 0x481   : > { %v1951_v39 = vunpack.c.l.bf16 %v7203_v38 }
 0x482   : > { %v4281_v48 = vmul.f32 -1.442695, %v1878_v40  ;;  %v4282_v53 = vmul.f32 -1.442695, %v1879_v45  ;;  %v1952_v40 = vunpack.c.h.bf16 %v7203_v38 }
 0x484   : > { %4836 = vpow2.f32 %v4281_v48  ;;  %v4422_v48 = vld [vmem:[%s7202_s2 + $0xf0] sm:$0xf0] }
 0x485   : > { %4838 = vpow2.f32 %v4282_v53  ;;  %v4428_v53 = vld [vmem:[%s7202_s2 + $0xe8] sm:$0xf] }
 0x486   : > { %v1861_v58 = vpop.f32.mrf.mxu2  ;;  %v1874_v62 = vpop.f32.mrf.mxu3 }
 0x487   : > { %v1881_v3 = vadd.f32 %v1874_v62, %v1825_v54  ;;  %v1837_v5 = vpop.f32.mrf.mxu0  ;;  %v1850_v8 = vpop.f32.mrf.mxu1  ;;  %v1880_v51 = vadd.f32 %v1861_v58, %v1824_v41  ;;  %v4667_v54 = vld [vmem:[%s7202_s2 + $0xf4] sm:$0xf0] }
 0x488   : > { %v4429_v5 = vor.u32 %v4667_v54, %v4428_v53  ;;  %v4665_v8 = vld [vmem:[%s7202_s2 + $0xec] sm:$0xf] }
 0x489   : > { %v4283_v11 = vmul.f32 -1.442695, %v1881_v3  ;;  %v4425_v3 = vor.u32 %v4664_v31, %v4422_v48  ;;  %v4356_v48 = vld [vmem:[%s7202_s2 + $0x60] sm:$0xf] }
 0x48a   : > { %v4837_v12 = vpop.eup %4836 }
 0x48b   : > { %v4839_v15 = vpop.eup %4838  ;;  %v1885_v21 = vadd.f32 1.0, %v4837_v12  ;;  %4840 = vpow2.f32 %v4283_v11  ;;  %v4430_v11 = vld [vmem:[%s7202_s2 + $0xf8] sm:$0xf0] }
 0x48c   : > { %v1904_v22 = vadd.f32 1.0, %v4839_v15 }
 0x48d   : > { %4842 = vrcp.f32 %v1885_v21  ;;  %v1897_v10 = vand.u32 2147483648, %v1885_v21  ;;  %v1895_v17 = vand.u32 2147483647, %v1885_v21  ;;  %vm1891_vm15 = vweird.f32 %v1885_v21 }
 0x48e   : > { %4844 = vrcp.f32 %v1904_v22  ;;  %v1863_v26 = vpop.f32.mrf.mxu2  ;;  %v1876_v27 = vpop.f32.mrf.mxu3  ;;  %v1916_v32 = vand.u32 2147483648, %v1904_v22  ;;  %v1914_v2 = vand.u32 2147483647, %v1904_v22  ;;  %vm1910_vm0 = vweird.f32 %v1904_v22 }
 0x48f   : > { %v1898_v16 = vor.u32 1.1754944e-38, %v1897_v10  ;;  %vm1896_vm3 = vcmp.eq.f32.partialorder %v1895_v17, 8.507059e+37  ;;  %v4662_v26 = vld [vmem:[%s7202_s2 + $0xcc] sm:$0xf0]  ;;  %v4660_v27 = vld [vmem:[%s7202_s2 + $0xc4] sm:$0xf] }
 0x490   : > { %v1917_v13 = vor.u32 1.1754944e-38, %v1916_v32  ;;  %vm1915_vm4 = vcmp.eq.f32.partialorder %v1914_v2, 8.507059e+37  ;;  %v4388_v10 = vld [vmem:[%s7202_s2 + $0xa0] sm:$0xf]  ;;  %v4658_v32 = vld [vmem:[%s7202_s2 + $0xac] sm:$0xf0] }
 0x491   : > { %v4841_v36 = vpop.eup %4840  ;;  %v4389_v2 = vor.u32 %v4658_v32, %v4388_v10  ;;  %v4348_v10 = vld [vmem:[%s7202_s2 + $0x48] sm:$0xf]  ;;  %v4647_v32 = vld [vmem:[%s7202_s2 + $0x54] sm:$0xf0] }
 0x492   : > { %v1924_v44 = vadd.f32 1.0, %v4841_v36 }
 0x493   : > { %v4843_v49 = vpop.eup %4842 }
 0x494   : > { %v4845_v57 = vpop.eup %4844  ;;  %v1887_v59 = vmul.f32 %v4843_v49, %v1885_v21  ;;  %4846 = vrcp.f32 %v1924_v44  ;;  %vm1892_vm13 = vweird.f32 %v4843_v49  ;;  %v1936_v63 = vand.u32 2147483648, %v1924_v44 }
 0x495   : > { %v1906_v60 = vmul.f32 %v4845_v57, %v1904_v22  ;;  %4848 = vtanh.f32 %v1880_v51  ;;  %vm1911_vm14 = vweird.f32 %v4845_v57  ;;  %vm1893_vm1 = vmor %vm1891_vm15, %vm1892_vm13  ;;  %vm1930_vm6 = vweird.f32 %v1924_v44  ;;  %v4404_v22 = vld [vmem:[%s7202_s2 + $0xc0] sm:$0xf] }
 0x496   : > { %v1888_v1 = vsub.f32 1.0, %v1887_v59  ;;  %vm1912_vm2 = vmor %vm1910_vm0, %vm1911_vm14  ;;  %v1934_v34 = vand.u32 2147483647, %v1924_v44  ;;  %v1937_v18 = vor.u32 1.1754944e-38, %v1936_v63  ;;  %v4433_v21 = vor.u32 %v4665_v8, %v4430_v11  ;;  %v4663_v59 = vld [vmem:[%s7202_s2 + $0xd4] sm:$0xf0] }
 0x497   : > { %v1907_v7 = vsub.f32 1.0, %v1906_v60  ;;  %v4661_v60 = vld [vmem:[%s7202_s2 + $0xcc] sm:$0xf]  ;;  %v4652_v63 = vld [vmem:[%s7202_s2 + $0x84] sm:$0xf] }
 0x498   : > { %v1889_v37 = vmul.f32 %v4843_v49, %v1888_v1  ;;  %vm1935_vm8 = vcmp.eq.f32.partialorder %v1934_v34, 8.507059e+37  ;;  %v4358_v8 = vld [vmem:[%s7202_s2 + $0x70] sm:$0xf0] }
 0x499   : > { %v1908_v46 = vmul.f32 %v4845_v57, %v1907_v7  ;;  %v4414_v7 = vld [vmem:[%s7202_s2 + $0xd8] sm:$0xf0] }
 0x49a   : > { %v4847_v61 = vpop.eup %4846  ;;  %v1890_v24 = vadd.f32 %v4843_v49, %v1889_v37  ;;  %v7204_v37 = vld [vmem:[#allocation21_spill] sm:$0xff] }
 0x49b   : > { %v1909_v20 = vadd.f32 %v4845_v57, %v1908_v46  ;;  %v1926_v43 = vmul.f32 %v4847_v61, %v1924_v44  ;;  %v4849_v4 = vpop.eup %4848  ;;  %vm1931_vm5 = vweird.f32 %v4847_v61  ;;  %v4405_v44 = vor.u32 %v4662_v26, %v4404_v22 }
 0x49c   : > { %v1894_v19 = vsel %vm1893_vm1, %v4843_v49, %v1890_v24  ;;  %vm1932_vm7 = vmor %vm1930_vm6, %vm1931_vm5  ;;  %v4406_v49 = vld [vmem:[%s7202_s2 + $0xd0] sm:$0xf0]  ;;  %v1954_v17 = vunpack.c.h.bf16 %v7204_v37  ;;  %v4417_v46 = vor.u32 %v4661_v60, %v4414_v7 }
 0x49d   : > { %v1899_v14 = vsel %vm1896_vm3, %v1898_v16, %v1894_v19  ;;  %v1913_v52 = vsel %vm1912_vm2, %v4845_v57, %v1909_v20  ;;  %v1927_v23 = vsub.f32 1.0, %v1926_v43  ;;  %v4409_v51 = vor.u32 %v4660_v27, %v4406_v49  ;;  %v4412_v57 = vld [vmem:[%s7202_s2 + $0xc8] sm:$0xf]  ;;  %v4390_v24 = vld [vmem:[%s7202_s2 + $0xb0] sm:$0xf0] }
 0x49e   : > { %v1918_v42 = vsel %vm1915_vm4, %v1917_v13, %v1913_v52  ;;  %v1941_v28 = vmul.f32 %v4849_v4, %v1899_v14  ;;  %v4413_v1 = vor.u32 %v4663_v59, %v4412_v57  ;;  %v4396_v16 = vld [vmem:[%s7202_s2 + $0xa8] sm:$0xf]  ;;  %v4659_v19 = vld [vmem:[%s7202_s2 + $0xb4] sm:$0xf0]  ;;  %v4657_v4 = vld [vmem:[%s7202_s2 + $0xac] sm:$0xf] }
 0x49f   : > { %v1940_v50 = vmul.f32 %v1918_v42, %v5954_v56  ;;  %v1928_v47 = vmul.f32 %v4847_v61, %v1927_v23  ;;  %v4420_v56 = vld [vmem:[%s7202_s2 + $0xe0] sm:$0xf]  ;;  %v4398_v14 = vld [vmem:[%s7202_s2 + $0xb8] sm:$0xf0]  ;;  %v4646_v57 = vld [vmem:[%s7202_s2 + $0x4c] sm:$0xf0] }
 0x4a0   : > { %v4421_v45 = vor.u32 %v4666_v30, %v4420_v56  ;;  %v4382_v56 = vld [vmem:[%s7202_s2 + $0x98] sm:$0xf0]  ;;  %v4644_v59 = vld [vmem:[%s7202_s2 + $0x44] sm:$0xf]  ;;  %v4342_v7 = vld [vmem:[%s7202_s2 + $0x50] sm:$0xf0] }
 0x4a1   : > { %v5994_v33 = vadd.f32 %v1941_v28, %v1940_v50  ;;  %v1929_v6 = vadd.f32 %v4847_v61, %v1928_v47  ;;  %v4397_v28 = vor.u32 %v4659_v19, %v4396_v16  ;;  %v4401_v50 = vor.u32 %v4657_v4, %v4398_v14  ;;  %v4372_v47 = vld [vmem:[%s7202_s2 + $0x80] sm:$0xf] }
 0x4a2   : > { %v4345_v19 = vor.u32 %v4644_v59, %v4342_v7  ;;  %v4349_v4 = vor.u32 %v4647_v32, %v4348_v10 }
 0x4a3   : > { %4850 = vtanh.f32 %v5994_v33  ;;  %v1933_v55 = vsel %vm1932_vm7, %v4847_v61, %v1929_v6  ;;  %v4656_v61 = vld [vmem:[%s7202_s2 + $0xa4] sm:$0xf]  ;;  %v4654_v6 = vld [vmem:[%s7202_s2 + $0x8c] sm:$0xf0] }
 0x4a4   : > { %v1938_v35 = vsel %vm1935_vm8, %v1937_v18, %v1933_v55  ;;  %v4393_v13 = vor.u32 %v4656_v61, %v4390_v24  ;;  %v4373_v34 = vor.u32 %v4654_v6, %v4372_v47  ;;  %v4374_v55 = vld [vmem:[%s7202_s2 + $0x90] sm:$0xf0]  ;;  %v4380_v18 = vld [vmem:[%s7202_s2 + $0x88] sm:$0xf]  ;;  %v4324_v61 = vld [vmem:[%s7202_s2 + $0x20] sm:$0xf] }
 0x4a5   : > { %v4332_v6 = vld [vmem:[%s7202_s2 + $0x28] sm:$0xf] }
 0x4a9   : > { %v4851_v29 = vpop.eup %4850 }
 0x4aa   : > { %v1944_v0 = vmul.f32 %v4851_v29, %v1938_v35  ;;  %v4655_v29 = vld [vmem:[%s7202_s2 + $0x94] sm:$0xf0] }
 0x4ab   : > { %v4381_v31 = vor.u32 %v4655_v29, %v4380_v18  ;;  %v4641_v18 = vld [vmem:[%s7202_s2 + $0x2c] sm:$0xf]  ;;  %v4334_v29 = vld [vmem:[%s7202_s2 + $0x38] sm:$0xf0] }
 0x4ac   : > { %v1945_v9 = vpack.c.bf16 %v1944_v0, %v1944_v0  ;;  %v4377_v0 = vor.u32 %v4652_v63, %v4374_v55  ;;  %v4643_v55 = vld [vmem:[%s7202_s2 + $0x34] sm:$0xf0] }
 0x4ae   : > { %1947 = vst [vmem:[#allocation2 + $0x14] sm:$0xf] %v1945_v9  ;;  %1963 = vmatmul.bf16.vlgmr.msrb.gmra.mxu0 %v1945_v9  ;;  %1976 = vmatmul.bf16.vlgmr.msra.gmra.mxu1 %v1945_v9 }
 0x4af   : > { %1989 = vmatmul.bf16.vlgmr.msrb.gmra.mxu2 %v1945_v9  ;;  %2002 = vmatmul.bf16.vlgmr.msrb.gmra.mxu3 %v1945_v9  ;;  %v4653_v9 = vld [vmem:[%s7202_s2 + $0x8c] sm:$0xf] }
 0x4b0   : > { %2474 = vmatpush.bf16.msrb.mxu0 %v4421_v45  ;;  %2503 = vmatpush.bf16.msra.mxu1 %v4425_v3 }
 0x4b1   : > { %2532 = vmatpush.bf16.msrb.mxu2 %v4429_v5  ;;  %2561 = vmatpush.bf16.msrb.mxu3 %v4433_v21  ;;  %v4648_v5 = vld [vmem:[%s7202_s2 + $0x64] sm:$0xf]  ;;  %v4651_v21 = vld [vmem:[%s7202_s2 + $0x74] sm:$0xf0] }
 0x4b4   : > { %2475 = vmatpush.bf16.msrb.mxu0 %v4405_v44  ;;  %2504 = vmatpush.bf16.msra.mxu1 %v4409_v51  ;;  %v4340_v44 = vld [vmem:[%s7202_s2 + $0x40] sm:$0xf] }
 0x4b5   : > { %2533 = vmatpush.bf16.msrb.mxu2 %v4413_v1  ;;  %2562 = vmatpush.bf16.msrb.mxu3 %v4417_v46  ;;  %v4341_v1 = vor.u32 %v4646_v57, %v4340_v44  ;;  %v4645_v46 = vld [vmem:[%s7202_s2 + $0x4c] sm:$0xf] }
 0x4b8   : > { %2476 = vmatpush.bf16.msrb.mxu0 %v4389_v2  ;;  %2505 = vmatpush.bf16.msra.mxu1 %v4393_v13  ;;  %v4350_v2 = vld [vmem:[%s7202_s2 + $0x58] sm:$0xf0] }
 0x4b9   : > { %2534 = vmatpush.bf16.msrb.mxu2 %v4397_v28  ;;  %2563 = vmatpush.bf16.msrb.mxu3 %v4401_v50  ;;  %v4353_v14 = vor.u32 %v4645_v46, %v4350_v2  ;;  %v4700_v2 = vld [vmem:[#allocation2] sm:$0xff] }
 0x4bc   : > { %2477 = vmatpush.bf16.msrb.mxu0 %v4373_v34  ;;  %2506 = vmatpush.bf16.msra.mxu1 %v4377_v0  ;;  %v4333_v0 = vor.u32 %v4643_v55, %v4332_v6 }
 0x4bd   : > { %2535 = vmatpush.bf16.msrb.mxu2 %v4381_v31  ;;  %v4636_v31 = vld [vmem:[%s7202_s2 + $0x4] sm:$0xf] }
 0x52b   : > { %v1964_v58 = vpop.f32.mrf.mxu0  ;;  %v1977_v62 = vpop.f32.mrf.mxu1 }
 0x52c   : > { %v2007_v12 = vadd.f32 %v1964_v58, %v1951_v39  ;;  %v2008_v15 = vadd.f32 %v1977_v62, %v1952_v40  ;;  %v4385_v40 = vor.u32 %v4653_v9, %v4382_v56  ;;  %v4650_v58 = vld [vmem:[%s7202_s2 + $0x6c] sm:$0xf0]  ;;  %v1953_v62 = vunpack.c.l.bf16 %v7204_v37  ;;  %v4308_v56 = vld [vmem:[%s7202_s2] sm:$0xf] }
 0x52d   : > { %v4357_v3 = vor.u32 %v4650_v58, %v4356_v48  ;;  %v4337_v9 = vor.u32 %v4641_v18, %v4334_v29  ;;  %v4639_v58 = vld [vmem:[%s7202_s2 + $0x14] sm:$0xf0]  ;;  %v4552_v18 = vld [vmem:[%s7208_s4 + $0xf0] sm:$0xf0]  ;;  %v4697_v29 = vld [vmem:[%s7208_s4 + $0xec] sm:$0xf] }
 0x52e   : > { %v4284_v36 = vmul.f32 -1.442695, %v2007_v12  ;;  %v4285_v41 = vmul.f32 -1.442695, %v2008_v15  ;;  %2564 = vmatpush.bf16.msrb.mxu3 %v4385_v40  ;;  %v4361_v12 = vor.u32 %v4648_v5, %v4358_v8  ;;  %v4364_v15 = vld [vmem:[%s7202_s2 + $0x68] sm:$0xf] }
 0x52f   : > { %2478 = vmatpush.bf16.msrb.mxu0 %v4357_v3  ;;  %v4365_v27 = vor.u32 %v4651_v21, %v4364_v15 }
 0x530   : > { %4852 = vpow2.f32 %v4284_v36  ;;  %v4649_v36 = vld [vmem:[%s7202_s2 + $0x6c] sm:$0xf]  ;;  %2507 = vmatpush.bf16.msra.mxu1 %v4361_v12  ;;  %v4318_v12 = vld [vmem:[%s7202_s2 + $0x18] sm:$0xf0] }
 0x531   : > { %4854 = vpow2.f32 %v4285_v41  ;;  %v4366_v41 = vld [vmem:[%s7202_s2 + $0x78] sm:$0xf0]  ;;  %2536 = vmatpush.bf16.msrb.mxu2 %v4365_v27 }
 0x532   : > { %v1990_v20 = vpop.f32.mrf.mxu2  ;;  %v2003_v43 = vpop.f32.mrf.mxu3  ;;  %v4369_v51 = vor.u32 %v4649_v36, %v4366_v41 }
 0x533   : > { %v2010_v52 = vadd.f32 %v2003_v43, %v1954_v17  ;;  %v1966_v23 = vpop.f32.mrf.mxu0  ;;  %v1979_v42 = vpop.f32.mrf.mxu1  ;;  %v2009_v26 = vadd.f32 %v1990_v20, %v1953_v62  ;;  %2479 = vmatpush.bf16.msrb.mxu0 %v4341_v1  ;;  %v4642_v43 = vld [vmem:[%s7202_s2 + $0x2c] sm:$0xf0] }
 0x534   : > { %2565 = vmatpush.bf16.msrb.mxu3 %v4369_v51  ;;  %v4326_v23 = vld [vmem:[%s7202_s2 + $0x30] sm:$0xf0]  ;;  %v4325_v47 = vor.u32 %v4642_v43, %v4324_v61  ;;  %2508 = vmatpush.bf16.msra.mxu1 %v4345_v19  ;;  %v4701_v61 = vld [vmem:[#allocation2 + $0x8] sm:$0xff] }
 0x535   : > { %v4286_v35 = vmul.f32 -1.442695, %v2010_v52  ;;  %v4640_v52 = vld [vmem:[%s7202_s2 + $0x24] sm:$0xf]  ;;  %2537 = vmatpush.bf16.msrb.mxu2 %v4349_v4 }
 0x536   : > { %v4853_v30 = vpop.eup %4852  ;;  %v4329_v34 = vor.u32 %v4640_v52, %v4326_v23  ;;  %v7207_v52 = vld [vmem:[#allocation22_spill] sm:$0xff] }
 0x537   : > { %v4855_v38 = vpop.eup %4854  ;;  %v6096_v39 = vadd.f32 1.0, %v4853_v30  ;;  %4856 = vpow2.f32 %v4286_v35  ;;  %2480 = vmatpush.bf16.msrb.mxu0 %v4325_v47  ;;  %v4638_v30 = vld [vmem:[%s7202_s2 + $0xc] sm:$0xf0]  ;;  %v2083_v23 = vunpack.c.h.bf16 %v7207_v52  ;;  %v4696_v47 = vld [vmem:[%s7208_s4 + $0xe4] sm:$0xf] }
 0x538   : > { %v6098_v45 = vadd.f32 1.0, %v4855_v38  ;;  %2566 = vmatpush.bf16.msrb.mxu3 %v4353_v14  ;;  %v4309_v48 = vor.u32 %v4638_v30, %v4308_v56  ;;  %2509 = vmatpush.bf16.msra.mxu1 %v4329_v34  ;;  %v4558_v56 = vld [vmem:[%s7208_s4 + $0xe8] sm:$0xf]  ;;  %v4699_v30 = vld [vmem:[%s7208_s4 + $0xf4] sm:$0xf0] }
 0x539   : > { %4858 = vrcp.f32 %v6096_v39  ;;  %v2024_v11 = vand.u32 2147483647, %v6096_v39  ;;  %v2026_v20 = vand.u32 2147483648, %v6096_v39  ;;  %vm2020_vm13 = vweird.f32 %v6096_v39  ;;  %2538 = vmatpush.bf16.msrb.mxu2 %v4333_v0 }
 0x53a   : > { %4860 = vrcp.f32 %v6098_v45  ;;  %v1992_v53 = vpop.f32.mrf.mxu2  ;;  %v2005_v54 = vpop.f32.mrf.mxu3  ;;  %v2045_v16 = vand.u32 2147483648, %v6098_v45  ;;  %v2043_v50 = vand.u32 2147483647, %v6098_v45  ;;  %vm2039_vm12 = vweird.f32 %v6098_v45 }
 0x53b   : > { %vm6177_vm9 = vcmp.eq.f32.partialorder %v2024_v11, 8.507059e+37  ;;  %v4310_v53 = vld [vmem:[%s7202_s2 + $0x10] sm:$0xf0]  ;;  %v4316_v54 = vld [vmem:[%s7202_s2 + $0x8] sm:$0xf]  ;;  %v2027_v5 = vor.u32 1.1754944e-38, %v2026_v20  ;;  %2481 = vmatpush.bf16.msrb.mxu0 %v4309_v48  ;;  %v6267_v0 = vor.u32 %v4696_v47, %v4552_v18 }
 0x53c   : > { %v2046_v3 = vor.u32 1.1754944e-38, %v2045_v16  ;;  %v4637_v11 = vld [vmem:[%s7202_s2 + $0xc] sm:$0xf]  ;;  %vm2044_vm0 = vcmp.eq.f32.partialorder %v2043_v50, 8.507059e+37  ;;  %v4313_v21 = vor.u32 %v4636_v31, %v4310_v53  ;;  %2567 = vmatpush.bf16.msrb.mxu3 %v4337_v9  ;;  %v2081_v16 = vunpack.c.h.bf16 %v5788_v25  ;;  %v4550_v50 = vld [vmem:[%s7208_s4 + $0xe0] sm:$0xf] }
 0x53d   : > { %v4857_v22 = vpop.eup %4856  ;;  %v4321_v41 = vor.u32 %v4637_v11, %v4318_v12  ;;  %v4534_v53 = vld [vmem:[%s7208_s4 + $0xc0] sm:$0xf]  ;;  %v4512_v47 = vld [vmem:[%s7208_s4 + $0x98] sm:$0xf0]  ;;  %v4691_v18 = vld [vmem:[%s7208_s4 + $0xb4] sm:$0xf0] }
 0x53e   : > { %v6131_v49 = vadd.f32 1.0, %v4857_v22  ;;  %v4317_v22 = vor.u32 %v4639_v58, %v4316_v54  ;;  %2510 = vmatpush.bf16.msra.mxu1 %v4313_v21  ;;  %v4694_v54 = vld [vmem:[%s7208_s4 + $0xcc] sm:$0xf0]  ;;  %v4692_v58 = vld [vmem:[%s7208_s4 + $0xc4] sm:$0xf] }
 0x53f   : > { %v6139_v60 = vpop.eup %4858  ;;  %v4542_v21 = vld [vmem:[%s7208_s4 + $0xc8] sm:$0xf] }
 0x540   : > { %v6150_v37 = vpop.eup %4860  ;;  %v2016_v17 = vmul.f32 %v6139_v60, %v6096_v39  ;;  %4862 = vrcp.f32 %v6131_v49  ;;  %vm2021_vm10 = vweird.f32 %v6139_v60  ;;  %2539 = vmatpush.bf16.msrb.mxu2 %v4317_v22  ;;  %2568 = vmatpush.bf16.msrb.mxu3 %v4321_v41  ;;  %v2065_v1 = vand.u32 2147483648, %v6131_v49  ;;  %v4695_v22 = vld [vmem:[%s7208_s4 + $0xd4] sm:$0xf0] }
 0x541   : > { %v2035_v24 = vmul.f32 %v6150_v37, %v6098_v45  ;;  %4864 = vtanh.f32 %v2009_v26  ;;  %vm2040_vm11 = vweird.f32 %v6150_v37  ;;  %vm2022_vm14 = vmor %vm2020_vm13, %vm2021_vm10  ;;  %vm2059_vm2 = vweird.f32 %v6131_v49 }
 0x542   : > { %v2017_v13 = vsub.f32 1.0, %v2016_v17  ;;  %vm2041_vm15 = vmor %vm2039_vm12, %vm2040_vm11  ;;  %v2063_v7 = vand.u32 2147483647, %v6131_v49  ;;  %v2066_v32 = vor.u32 1.1754944e-38, %v2065_v1 }
 0x543   : > { %v2036_v42 = vsub.f32 1.0, %v2035_v24  ;;  %v2080_v24 = vunpack.c.l.bf16 %v5788_v25  ;;  %v4698_v25 = vld [vmem:[%s7208_s4 + $0xec] sm:$0xf0] }
 0x544   : > { %v2018_v63 = vmul.f32 %v6139_v60, %v2017_v13  ;;  %vm2064_vm4 = vcmp.eq.f32.partialorder %v2063_v7, 8.507059e+37  ;;  %v6256_v55 = vor.u32 %v4698_v25, %v4550_v50  ;;  %v4685_v25 = vld [vmem:[%s7208_s4 + $0x8c] sm:$0xf] }
 0x545   : > { %v2037_v35 = vmul.f32 %v6150_v37, %v2036_v42 }
 0x546   : > { %v4863_v38 = vpop.eup %4862  ;;  %v2019_v40 = vadd.f32 %v6139_v60, %v2018_v63 }
 0x547   : > { %v4865_v62 = vpop.eup %4864  ;;  %v2038_v39 = vadd.f32 %v6150_v37, %v2037_v35  ;;  %v2055_v8 = vmul.f32 %v4863_v38, %v6131_v49  ;;  %vm2060_vm1 = vweird.f32 %v4863_v38  ;;  %v4702_v49 = vld [vmem:[#allocation2 + $0x10] sm:$0xff]  ;;  %v4560_v35 = vld [vmem:[%s7208_s4 + $0xf8] sm:$0xf0] }
 0x548   : > { %v2023_v15 = vsel %vm2022_vm14, %v6139_v60, %v2019_v40  ;;  %vm2061_vm3 = vmor %vm2059_vm2, %vm2060_vm1  ;;  %v6269_v9 = vor.u32 %v4697_v29, %v4560_v35  ;;  %v6281_v40 = vor.u32 %v4699_v30, %v4558_v56  ;;  %v4486_v29 = vld [vmem:[%s7208_s4 + $0x60] sm:$0xf]  ;;  %v4682_v35 = vld [vmem:[%s7208_s4 + $0x6c] sm:$0xf0] }
 0x549   : > { %v2028_v26 = vsel %vm6177_vm9, %v2027_v5, %v2023_v15  ;;  %v2042_v27 = vsel %vm2041_vm15, %v6150_v37, %v2038_v39  ;;  %v2056_v36 = vsub.f32 1.0, %v2055_v8  ;;  %v6296_v5 = vor.u32 %v4694_v54, %v4534_v53  ;;  %v4536_v39 = vld [vmem:[%s7208_s4 + $0xd0] sm:$0xf0]  ;;  %v4693_v8 = vld [vmem:[%s7208_s4 + $0xcc] sm:$0xf] }
 0x54a   : > { %v2047_v44 = vsel %vm2044_vm0, %v2046_v3, %v2042_v27  ;;  %v2070_v51 = vmul.f32 %v4865_v62, %v2028_v26  ;;  %v6307_v12 = vor.u32 %v4692_v58, %v4536_v39  ;;  %v4544_v15 = vld [vmem:[%s7208_s4 + $0xd8] sm:$0xf0]  ;;  %v6430_v58 = vor.u32 %v4685_v25, %v4512_v47  ;;  %v4488_v39 = vld [vmem:[%s7208_s4 + $0x70] sm:$0xf0] }
 0x54b   : > { %v2069_v45 = vmul.f32 %v2047_v44, %v5994_v33  ;;  %v2057_v57 = vmul.f32 %v4863_v38, %v2056_v36  ;;  %v6337_v7 = vor.u32 %v4693_v8, %v4544_v15  ;;  %v4681_v8 = vld [vmem:[%s7208_s4 + $0x6c] sm:$0xf] }
 0x54d   : > { %v6238_v59 = vadd.f32 %v2070_v51, %v2069_v45  ;;  %v2058_v60 = vadd.f32 %v4863_v38, %v2057_v57  ;;  %v4518_v51 = vld [vmem:[%s7208_s4 + $0xa0] sm:$0xf]  ;;  %v2082_v45 = vunpack.c.l.bf16 %v7207_v52  ;;  %v4684_v52 = vld [vmem:[%s7208_s4 + $0x84] sm:$0xf] }
 0x54f   : > { %4866 = vtanh.f32 %v6238_v59  ;;  %v2062_v10 = vsel %vm2061_vm3, %v4863_v38, %v2058_v60  ;;  %v2272_v38 = vld [vmem:[%s7209_s6] sm:$0xf] }
 0x550   : > { %v2067_v37 = vsel %vm2064_vm4, %v2066_v32, %v2062_v10  ;;  %v6321_v36 = vperm.slane %v2272_v38, 0  ;;  %v6323_v41 = vperm.slane %v2272_v38, 1  ;;  %v6326_v44 = vperm.slane %v2272_v38, 2  ;;  %v4690_v10 = vld [vmem:[%s7208_s4 + $0xac] sm:$0xf0] }
 0x551   : > { %v4688_v32 = vld [vmem:[%s7208_s4 + $0xa4] sm:$0xf] }
 0x552   : > { %7210 = vst [vmem:[#allocation20_spill] sm:$0xff] %v6321_v36 }
 0x553   : > { %7211 = vst [vmem:[#allocation18_spill] sm:$0xff] %v6323_v41 }
 0x554   : > { %7212 = vst [vmem:[#allocation19_spill] sm:$0xff] %v6326_v44 }
 0x555   : > { %v4867_v33 = vpop.eup %4866 }
 0x556   : > { %v2073_v17 = vmul.f32 %v4867_v33, %v2067_v37  ;;  %v6345_v33 = vor.u32 %v4695_v22, %v4542_v21 }
 0x558   : > { %v2074_v46 = vpack.c.bf16 %v2073_v17, %v2073_v17  ;;  %v6348_v17 = vperm.slane %v2272_v38, 3 }
 0x55a   : > { %2076 = vst [vmem:[#allocation2 + $0x18] sm:$0xf] %v2074_v46  ;;  %2092 = vmatmul.bf16.vlgmr.msra.gmra.mxu0 %v2074_v46  ;;  %2105 = vmatmul.bf16.vlgmr.msrb.gmra.mxu1 %v2074_v46 }
 0x55b   : > { %2118 = vmatmul.bf16.vlgmr.msra.gmra.mxu2 %v2074_v46  ;;  %2131 = vmatmul.bf16.vlgmr.msra.gmra.mxu3 %v2074_v46  ;;  %7213 = vst [vmem:[#allocation23_spill] sm:$0xff] %v6348_v17  ;;  %v4520_v46 = vld [vmem:[%s7208_s4 + $0xb0] sm:$0xf0] }
 0x55c   : > { %2793 = vmatpush.bf16.msra.mxu0 %v6256_v55  ;;  %2806 = vmatpush.bf16.msrb.mxu1 %v6267_v0 }
 0x55d   : > { %2832 = vmatpush.bf16.msra.mxu3 %v6269_v9  ;;  %2819 = vmatpush.bf16.msra.mxu2 %v6281_v40 }
 0x560   : > { %2794 = vmatpush.bf16.msra.mxu0 %v6296_v5  ;;  %2807 = vmatpush.bf16.msrb.mxu1 %v6307_v12 }
 0x561   : > { %2833 = vmatpush.bf16.msra.mxu3 %v6337_v7  ;;  %2820 = vmatpush.bf16.msra.mxu2 %v6345_v33 }
 0x56a   : > { %2482 = vmatmul.bf16.vlgmr.msrb.gmra.mxu0 %v4700_v2  ;;  %2511 = vmatmul.bf16.vlgmr.msra.gmra.mxu1 %v4700_v2 }
 0x56b   : > { %2540 = vmatmul.bf16.vlgmr.msrb.gmra.mxu2 %v4700_v2  ;;  %2569 = vmatmul.bf16.vlgmr.msrb.gmra.mxu3 %v4700_v2  ;;  %v4689_v2 = vld [vmem:[%s7208_s4 + $0xac] sm:$0xf] }
 0x57a   : > { %2487 = vmatmul.bf16.gmra.mxu0 %v4701_v61  ;;  %2516 = vmatmul.bf16.gmra.mxu1 %v4701_v61 }
 0x57b   : > { %2545 = vmatmul.bf16.gmra.mxu2 %v4701_v61  ;;  %2574 = vmatmul.bf16.gmra.mxu3 %v4701_v61 }
 0x58a   : > { %2492 = vmatmul.bf16.gmra.mxu0 %v4702_v49  ;;  %2521 = vmatmul.bf16.gmra.mxu1 %v4702_v49 }
 0x58b   : > { %2550 = vmatmul.bf16.gmra.mxu2 %v4702_v49  ;;  %2579 = vmatmul.bf16.gmra.mxu3 %v4702_v49 }
 0x5d7   : > { %v2093_v20 = vpop.f32.mrf.mxu0  ;;  %v2106_v43 = vpop.f32.mrf.mxu1 }
 0x5d8   : > { %v2136_v13 = vadd.f32 %v2093_v20, %v2080_v24  ;;  %v2137_v19 = vadd.f32 %v2106_v43, %v2081_v16  ;;  %v6357_v24 = vor.u32 %v4690_v10, %v4518_v51  ;;  %v6359_v16 = vor.u32 %v4688_v32, %v4520_v46  ;;  %v4528_v20 = vld [vmem:[%s7208_s4 + $0xb8] sm:$0xf0]  ;;  %v4502_v43 = vld [vmem:[%s7208_s4 + $0x80] sm:$0xf]  ;;  %v4687_v46 = vld [vmem:[%s7208_s4 + $0x94] sm:$0xf0] }
 0x5da   : > { %v4287_v4 = vmul.f32 -1.442695, %v2136_v13  ;;  %v4288_v14 = vmul.f32 -1.442695, %v2137_v19  ;;  %v4686_v13 = vld [vmem:[%s7208_s4 + $0x8c] sm:$0xf0]  ;;  %2795 = vmatpush.bf16.msra.mxu0 %v6357_v24  ;;  %2808 = vmatpush.bf16.msrb.mxu1 %v6359_v16 }
 0x5dc   : > { %4868 = vpow2.f32 %v4287_v4 }
 0x5dd   : > { %4870 = vpow2.f32 %v4288_v14  ;;  %v6374_v14 = vor.u32 %v4689_v2, %v4528_v20  ;;  %v4470_v2 = vld [vmem:[%s7208_s4 + $0x40] sm:$0xf] }
 0x5de   : > { %v2119_v42 = vpop.f32.mrf.mxu2  ;;  %v2132_v28 = vpop.f32.mrf.mxu3 }
 0x5df   : > { %v2139_v6 = vadd.f32 %v2132_v28, %v2083_v23  ;;  %v2095_v63 = vpop.f32.mrf.mxu0  ;;  %v2108_v34 = vpop.f32.mrf.mxu1  ;;  %v2138_v49 = vadd.f32 %v2119_v42, %v2082_v45  ;;  %v4504_v23 = vld [vmem:[%s7208_s4 + $0x90] sm:$0xf0]  ;;  %v6386_v28 = vor.u32 %v4686_v13, %v4502_v43  ;;  %2834 = vmatpush.bf16.msra.mxu3 %v6374_v14  ;;  %v6450_v45 = vor.u32 %v4682_v35, %v4486_v29  ;;  %v4678_v13 = vld [vmem:[%s7208_s4 + $0x4c] sm:$0xf0] }
 0x5e0   : > { %v6388_v50 = vor.u32 %v4684_v52, %v4504_v23  ;;  %v4472_v52 = vld [vmem:[%s7208_s4 + $0x50] sm:$0xf0] }
 0x5e1   : > { %v4289_v31 = vmul.f32 -1.442695, %v2139_v6  ;;  %v4526_v6 = vld [vmem:[%s7208_s4 + $0xa8] sm:$0xf]  ;;  %2796 = vmatpush.bf16.msra.mxu0 %v6386_v28 }
 0x5e2   : > { %v4869_v48 = vpop.eup %4868  ;;  %2809 = vmatpush.bf16.msrb.mxu1 %v6388_v50 }
 0x5e3   : > { %v4871_v62 = vpop.eup %4870  ;;  %v6294_v3 = vadd.f32 1.0, %v4869_v48  ;;  %4872 = vpow2.f32 %v4289_v31  ;;  %v4680_v31 = vld [vmem:[%s7208_s4 + $0x64] sm:$0xf]  ;;  %2835 = vmatpush.bf16.msra.mxu3 %v6430_v58 }
 0x5e4   : > { %v6305_v11 = vadd.f32 1.0, %v4871_v62  ;;  %v6432_v62 = vor.u32 %v4691_v18, %v4526_v6  ;;  %v4677_v6 = vld [vmem:[%s7208_s4 + $0x4c] sm:$0xf]  ;;  %v4494_v18 = vld [vmem:[%s7208_s4 + $0x68] sm:$0xf] }
 0x5e5   : > { %4874 = vrcp.f32 %v6294_v3  ;;  %v2153_v57 = vand.u32 2147483647, %v6294_v3  ;;  %v2155_v37 = vand.u32 2147483648, %v6294_v3  ;;  %vm2149_vm6 = vweird.f32 %v6294_v3  ;;  %2797 = vmatpush.bf16.msra.mxu0 %v6450_v45 }
 0x5e6   : > { %4876 = vrcp.f32 %v6305_v11  ;;  %v2121_v26 = vpop.f32.mrf.mxu2  ;;  %v2134_v27 = vpop.f32.mrf.mxu3  ;;  %v2174_v19 = vand.u32 2147483648, %v6305_v11  ;;  %v2172_v30 = vand.u32 2147483647, %v6305_v11  ;;  %2821 = vmatpush.bf16.msra.mxu2 %v6432_v62  ;;  %vm2168_vm10 = vweird.f32 %v6305_v11 }
 0x5e7   : > { %v6333_v60 = vpop.f32.mrf.mxu0  ;;  %v6335_v1 = vpop.f32.mrf.mxu1  ;;  %vm6422_vm7 = vcmp.eq.f32.partialorder %v2153_v57, 8.507059e+37  ;;  %v2156_v26 = vor.u32 1.1754944e-38, %v2155_v37  ;;  %v4496_v57 = vld [vmem:[%s7208_s4 + $0x78] sm:$0xf0]  ;;  %v4510_v37 = vld [vmem:[%s7208_s4 + $0x88] sm:$0xf] }
 0x5e8   : > { %v2175_v21 = vor.u32 1.1754944e-38, %v2174_v19  ;;  %v6473_v20 = vor.u32 %v4681_v8, %v4496_v57  ;;  %v6475_v43 = vor.u32 %v4687_v46, %v4510_v37  ;;  %v4676_v19 = vld [vmem:[%s7208_s4 + $0x44] sm:$0xf]  ;;  %vm2173_vm12 = vcmp.eq.f32.partialorder %v2172_v30, 8.507059e+37  ;;  %v4679_v37 = vld [vmem:[%s7208_s4 + $0x54] sm:$0xf0] }
 0x5e9   : > { %v4873_v61 = vpop.eup %4872  ;;  %v4672_v57 = vld [vmem:[%s7208_s4 + $0x24] sm:$0xf] }
 0x5ea   : > { %v6372_v4 = vadd.f32 1.0, %v4873_v61  ;;  %2822 = vmatpush.bf16.msra.mxu2 %v6475_v43  ;;  %2836 = vmatpush.bf16.msra.mxu3 %v6473_v20 }
 0x5eb   : > { %v6382_v42 = vpop.eup %4874 }
 0x5ec   : > { %v6399_v63 = vpop.eup %4876  ;;  %v2145_v34 = vmul.f32 %v6382_v42, %v6294_v3  ;;  %vm2150_vm5 = vweird.f32 %v6382_v42  ;;  %4878 = vrcp.f32 %v6372_v4  ;;  %vm2188_vm14 = vweird.f32 %v6372_v4 }
 0x5ed   : > { %v2164_v56 = vmul.f32 %v6399_v63, %v6305_v11  ;;  %4880 = vtanh.f32 %v2138_v49  ;;  %vm6444_vm8 = vmor %vm2149_vm6, %vm2150_vm5  ;;  %vm2169_vm9 = vweird.f32 %v6399_v63  ;;  %v6471_v49 = vor.u32 %v4680_v31, %v4488_v39  ;;  %v4454_v39 = vld [vmem:[%s7208_s4 + $0x20] sm:$0xf]  ;;  %v4674_v11 = vld [vmem:[%s7208_s4 + $0x2c] sm:$0xf0] }
 0x5ee   : > { %v2146_v38 = vsub.f32 1.0, %v2145_v34  ;;  %v6426_v53 = vpop.f32.mrf.mxu2  ;;  %v6428_v54 = vpop.f32.mrf.mxu3  ;;  %v4480_v34 = vld [vmem:[%s7208_s4 + $0x58] sm:$0xf0]  ;;  %v6506_v31 = vor.u32 %v4678_v13, %v4470_v2  ;;  %vm6519_vm11 = vmor %vm2168_vm10, %vm2169_vm9  ;;  %v4673_v13 = vld [vmem:[%s7208_s4 + $0x2c] sm:$0xf] }
 0x5ef   : > { %v2165_v15 = vsub.f32 1.0, %v2164_v56  ;;  %v2485_v27 = vpop.f32.mrf.mxu0  ;;  %v2514_v51 = vpop.f32.mrf.mxu1  ;;  %2810 = vmatpush.bf16.msrb.mxu1 %v6471_v49  ;;  %v6543_v22 = vor.u32 %v4677_v6, %v4480_v34 }
 0x5f0   : > { %v2147_v3 = vmul.f32 %v6382_v42, %v2146_v38  ;;  %v2486_v10 = vadd.f32 %v2485_v27, %v6321_v36  ;;  %v2515_v32 = vadd.f32 %v2514_v51, %v6323_v41  ;;  %v4683_v38 = vld [vmem:[%s7208_s4 + $0x74] sm:$0xf0]  ;;  %v6527_v27 = vor.u32 %v4676_v19, %v4472_v52  ;;  %v4464_v19 = vld [vmem:[%s7208_s4 + $0x38] sm:$0xf0]  ;;  %2798 = vmatpush.bf16.msra.mxu0 %v6506_v31 }
 0x5f1   : > { %v2166_v61 = vmul.f32 %v6399_v63, %v2165_v15  ;;  %v6529_v51 = vor.u32 %v4683_v38, %v4494_v18  ;;  %v4675_v38 = vld [vmem:[%s7208_s4 + $0x34] sm:$0xf0]  ;;  %2837 = vmatpush.bf16.msra.mxu3 %v6543_v22  ;;  %v6581_v8 = vor.u32 %v4673_v13, %v4464_v19 }
 0x5f2   : > { %v6486_v23 = vpop.eup %4878  ;;  %v2148_v25 = vadd.f32 %v6382_v42, %v2147_v3  ;;  %v6489_v47 = vpack.c.bf16 %v2515_v32, %v2486_v10  ;;  %v4456_v3 = vld [vmem:[%s7208_s4 + $0x30] sm:$0xf0]  ;;  %v4478_v32 = vld [vmem:[%s7208_s4 + $0x48] sm:$0xf] }
 0x5f3   : > { %v4881_v29 = vpop.eup %4880  ;;  %v2167_v35 = vadd.f32 %v6399_v63, %v2166_v61  ;;  %v2184_v56 = vmul.f32 %v6486_v23, %v6372_v4  ;;  %v6551_v61 = vor.u32 %v4674_v11, %v4454_v39  ;;  %2811 = vmatpush.bf16.msrb.mxu1 %v6527_v27  ;;  %2823 = vmatpush.bf16.msra.mxu2 %v6529_v51  ;;  %vm2189_vm13 = vweird.f32 %v6486_v23 }
 0x5f4   : > { %v2152_v15 = vsel %vm6444_vm8, %v6382_v42, %v2148_v25  ;;  %vm6623_vm15 = vmor %vm2188_vm14, %vm2189_vm13 }
 0x5f5   : > { %v2157_v10 = vsel %vm6422_vm7, %v2156_v26, %v2152_v15  ;;  %v2171_v42 = vsel %vm6519_vm11, %v6399_v63, %v2167_v35  ;;  %v2185_v30 = vsub.f32 1.0, %v2184_v56  ;;  %v6553_v63 = vor.u32 %v4672_v57, %v4456_v3  ;;  %v4462_v56 = vld [vmem:[%s7208_s4 + $0x28] sm:$0xf]  ;;  %v4438_v15 = vld [vmem:[%s7208_s4] sm:$0xf]  ;;  %2799 = vmatpush.bf16.msra.mxu0 %v6551_v61  ;;  %2838 = vmatpush.bf16.msra.mxu3 %v6581_v8 }
 0x5f6   : > { %v2176_v46 = vsel %vm2173_vm12, %v2175_v21, %v2171_v42  ;;  %v2199_v48 = vmul.f32 %v4881_v29, %v2157_v10  ;;  %v2543_v26 = vpop.f32.mrf.mxu2  ;;  %v2572_v2 = vpop.f32.mrf.mxu3  ;;  %v4670_v57 = vld [vmem:[%s7208_s4 + $0xc] sm:$0xf0]  ;;  %v4668_v3 = vld [vmem:[%s7208_s4 + $0x4] sm:$0xf]  ;;  %v6619_v13 = vor.u32 %v4675_v38, %v4462_v56 }
 0x5f7   : > { %v2198_v52 = vmul.f32 %v2176_v46, %v6238_v59  ;;  %v2186_v25 = vmul.f32 %v6486_v23, %v2185_v30  ;;  %v2544_v21 = vadd.f32 %v2543_v26, %v6326_v44  ;;  %v2573_v6 = vadd.f32 %v2572_v2, %v6348_v17  ;;  %v2488_v34 = vpop.f32.mrf.mxu0  ;;  %v2517_v18 = vpop.f32.mrf.mxu1  ;;  %v4440_v30 = vld [vmem:[%s7208_s4 + $0x10] sm:$0xf0]  ;;  %v4669_v46 = vld [vmem:[%s7208_s4 + $0xc] sm:$0xf]  ;;  %2812 = vmatpush.bf16.msrb.mxu1 %v6553_v63 }
 0x5f8   : > { %v2489_v29 = vadd.f32 %v2488_v34, %v6321_v36  ;;  %v2518_v35 = vadd.f32 %v2517_v18, %v6323_v41  ;;  %v6570_v59 = vor.u32 %v4679_v37, %v4478_v32  ;;  %v2194_v32 = vand.u32 2147483648, %v6372_v4 }
 0x5f9   : > { %v2200_v39 = vadd.f32 %v2199_v48, %v2198_v52  ;;  %v6578_v11 = vpack.c.bf16 %v2573_v6, %v2544_v21  ;;  %v2187_v10 = vadd.f32 %v6486_v23, %v2186_v25  ;;  %v6605_v37 = vor.u32 %v4670_v57, %v4438_v15  ;;  %v4448_v48 = vld [vmem:[%s7208_s4 + $0x18] sm:$0xf0]  ;;  %v4671_v52 = vld [vmem:[%s7208_s4 + $0x14] sm:$0xf0] }
 0x5fa   : > { %v6594_v42 = vpack.c.bf16 %v2518_v35, %v2489_v29  ;;  %v2192_v26 = vand.u32 2147483647, %v6372_v4  ;;  %2824 = vmatpush.bf16.msra.mxu2 %v6570_v59  ;;  %v6617_v2 = vor.u32 %v4668_v3, %v4440_v30  ;;  %v4446_v4 = vld [vmem:[%s7208_s4 + $0x8] sm:$0xf]  ;;  %v6634_v25 = vor.u32 %v4669_v46, %v4448_v48  ;;  %s5034_s4 = scalar_lea.hbm %s7144_s16, 32 }
 0x5fb   : > { %4882 = vtanh.f32 %v2200_v39  ;;  %2207 = vst [vmem:[%s6600_s17] sm:$0xff] %v2200_v39  ;;  %v2191_v21 = vsel %vm6623_vm15, %v6486_v23, %v2187_v10  ;;  %v2195_v18 = vor.u32 1.1754944e-38, %v2194_v32  ;;  %2800 = vmatpush.bf16.msra.mxu0 %v6605_v37  ;;  %v6646_v23 = vor.u32 %v4671_v52, %v4446_v4 }
 0x5fc   : > { %vm2193_vm0 = vcmp.eq.f32.partialorder %v2192_v26, 8.507059e+37  ;;  %2813 = vmatpush.bf16.msrb.mxu1 %v6617_v2  ;;  %2839 = vmatpush.bf16.msra.mxu3 %v6634_v25 }
 0x5fd   : > { %v2196_v3 = vsel %vm2193_vm0, %v2195_v18, %v2191_v21 }
 0x5fe   : > { %v2546_v6 = vpop.f32.mrf.mxu2  ;;  %v2575_v34 = vpop.f32.mrf.mxu3  ;;  %2825 = vmatpush.bf16.msra.mxu2 %v6619_v13 }
 0x5ff   : > { %v2547_v29 = vadd.f32 %v2546_v6, %v6326_v44  ;;  %v2576_v35 = vadd.f32 %v2575_v34, %v6348_v17  ;;  %v2490_v56 = vpop.f32.mrf.mxu0  ;;  %v2519_v38 = vpop.f32.mrf.mxu1  ;;  %2919 = vmatpush.bf16.msrb.mxu0 %v6256_v55 }
 0x600   : > { %v2491_v39 = vadd.f32 %v2490_v56, %v6321_v36  ;;  %v2520_v15 = vadd.f32 %v2519_v38, %v6323_v41  ;;  %2932 = vmatpush.bf16.msra.mxu1 %v6267_v0  ;;  %2958 = vmatpush.bf16.msrb.mxu3 %v6269_v9 }
 0x601   : > { %v4883_v57 = vpop.eup %4882  ;;  %v6648_v10 = vpack.c.bf16 %v2576_v35, %v2547_v29 }
 0x602   : > { %v2202_v30 = vmul.f32 %v4883_v57, %v2196_v3  ;;  %v6652_v32 = vpack.c.bf16 %v2520_v15, %v2491_v39  ;;  %2826 = vmatpush.bf16.msra.mxu2 %v6646_v23  ;;  %v4434_v3 = vld [vmem:[%s7223_s21 + $0x8] sm:$0xff]  ;;  %s3893_s21 = scalar_lea.hbm %s7144_s16, %s4592_s29 }
 0x603   : > { %2920 = vmatpush.bf16.msrb.mxu0 %v6296_v5  ;;  %s3896_s2 = sshll.u32 %s3893_s21, 4  ;;  %s3897_s2 = int_to_ptr.hbm [resolvable:$true] %s3896_s2 }
 0x604   : > { %v2203_v46 = vpack.c.bf16 %v2202_v30, %v2202_v30  ;;  %2206 = vst [vmem:[%s6657_s0] sm:$0xff] %v2202_v30  ;;  %2933 = vmatpush.bf16.msra.mxu1 %v6307_v12  ;;  %2959 = vmatpush.bf16.msrb.mxu3 %v6337_v7  ;;  %v2632_v30 = vpack.c.bf16 %v4434_v3, %v4434_v3  ;;  %s5028_s19 = sshra.s32 %s3897_s2, 4  ;;  %s5029_s19 = int_to_ptr.hbm [resolvable:$true] %s5028_s19 }
 0x605   : > { %s5030_s3 = scalar_lea.hbm %s5029_s19, 16  ;;  %p5035_p2 = scmp.lt.s32.totalorder %s5029_s19, %s7144_s16 }
 0x606   : > { %2945 = vmatpush.bf16.msrb.mxu2 %v6281_v40  ;;  %2205 = vst [vmem:[#allocation2 + $0x1c] sm:$0xf] %v2203_v46  ;;  %v2548_v48 = vpop.f32.mrf.mxu2  ;;  %v2577_v26 = vpop.f32.mrf.mxu3  ;;  %p5031_p13 = scmp.ne.s32.totalorder %s5029_s19, %s5030_s3  ;;  %p5036_p3 = scmp.lt.s32.totalorder %s5034_s4, %s5030_s3 }
 0x607   : > { %v2549_v19 = vadd.f32 %v2548_v48, %v6326_v44  ;;  %v2578_v4 = vadd.f32 %v2577_v26, %v6348_v17  ;;  %v2493_v52 = vpop.f32.mrf.mxu0  ;;  %v2522_v21 = vpop.f32.mrf.mxu1  ;;  %2921 = vmatpush.bf16.msrb.mxu0 %v6357_v24 }
 0x608   : > { %v2494_v6 = vadd.f32 %v2493_v52, %v6321_v36  ;;  %v2523_v34 = vadd.f32 %v2522_v21, %v6323_v41  ;;  %2934 = vmatpush.bf16.msra.mxu1 %v6359_v16  ;;  %2960 = vmatpush.bf16.msrb.mxu3 %v6374_v14  ;;  %p5032_p0 = pnand %p5031_p13, %p5246_p6  ;;  %p5037_p4 = por %p5036_p3, %p5035_p2 }
 0x609   : > { %v6669_v18 = vpack.c.bf16 %v2578_v4, %v2549_v19 }
 0x60a   : > { %2946 = vmatpush.bf16.msrb.mxu2 %v6345_v33  ;;  %v6673_v29 = vpack.c.bf16 %v2523_v34, %v2494_v6  ;;  %p5033_p1 = pneg %p5032_p0 }
 0x60b   : > { %2922 = vmatpush.bf16.msrb.mxu0 %v6386_v28 }
 0x60c   : > { %2935 = vmatpush.bf16.msra.mxu1 %v6388_v50  ;;  %2961 = vmatpush.bf16.msrb.mxu3 %v6430_v58  ;;  %p5038_p5 = pnand %p5037_p4, %p5033_p1 }
 0x60d   : > { %v4703_v35 = vld [vmem:[#allocation2 + $0x18] sm:$0xff] }
 0x60e   : > { %2947 = vmatpush.bf16.msrb.mxu2 %v6432_v62  ;;  %v2551_v56 = vpop.f32.mrf.mxu2  ;;  %v2580_v38 = vpop.f32.mrf.mxu3  ;;  %2497 = vmatmul.bf16.gmra.mxu0 %v4703_v35 }
 0x60f   : > { %v2552_v39 = vadd.f32 %v2551_v56, %v6326_v44  ;;  %v2581_v15 = vadd.f32 %v2580_v38, %v6348_v17  ;;  %2526 = vmatmul.bf16.gmra.mxu1 %v4703_v35  ;;  %2555 = vmatmul.bf16.gmra.mxu2 %v4703_v35  ;;  %v6736_v46 = vpop.f32.mrf.mxu0  ;;  %v6738_v48 = vpop.f32.mrf.mxu1  ;;  %v2513_v56 = vadd.f32 %v6335_v1, %v6323_v41 }
 0x610   : > { %2584 = vmatmul.bf16.gmra.mxu3 %v4703_v35  ;;  %2923 = vmatpush.bf16.msrb.mxu0 %v6450_v45  ;;  %7224 = vst [vmem:[#allocation22_spill] sm:$0xff] %v6736_v46  ;;  %v2484_v35 = vadd.f32 %v6333_v60, %v6321_v36  ;;  %v2542_v60 = vadd.f32 %v6426_v53, %v6326_v44 }
 0x611   : > { %v6683_v57 = vpack.c.bf16 %v2581_v15, %v2552_v39  ;;  %2936 = vmatpush.bf16.msra.mxu1 %v6471_v49  ;;  %2962 = vmatpush.bf16.msrb.mxu3 %v6473_v20  ;;  %7225 = vst [vmem:[#allocation24_spill] sm:$0xff] %v6738_v48  ;;  %v2571_v1 = vadd.f32 %v6428_v54, %v6348_v17 }
 0x612   : > { %2948 = vmatpush.bf16.msrb.mxu2 %v6475_v43 }
 0x613   : > { %7222 = vst [vmem:[#allocation21_spill] sm:$0xff] %v6683_v57 }
 0x614   : > { %2924 = vmatpush.bf16.msrb.mxu0 %v6506_v31 }
 0x615   : > { %2937 = vmatpush.bf16.msra.mxu1 %v6527_v27  ;;  %2963 = vmatpush.bf16.msrb.mxu3 %v6543_v22 }
 0x616   : > { %2949 = vmatpush.bf16.msrb.mxu2 %v6529_v51  ;;  %v6740_v26 = vpop.f32.mrf.mxu2  ;;  %v6742_v19 = vpop.f32.mrf.mxu3 }
 0x617   : > { %7226 = vst [vmem:[#allocation25_spill] sm:$0xff] %v6740_v26 }
 0x618   : > { %2925 = vmatpush.bf16.msrb.mxu0 %v6551_v61  ;;  %7227 = vst [vmem:[#allocation26_spill] sm:$0xff] %v6742_v19 }
 0x619   : > { %2938 = vmatpush.bf16.msra.mxu1 %v6553_v63  ;;  %2964 = vmatpush.bf16.msrb.mxu3 %v6581_v8 }
 0x61a   : > { %2950 = vmatpush.bf16.msrb.mxu2 %v6570_v59 }
 0x61c   : > { %2926 = vmatpush.bf16.msrb.mxu0 %v6605_v37 }
 0x61d   : > { %2939 = vmatpush.bf16.msra.mxu1 %v6617_v2  ;;  %2965 = vmatpush.bf16.msrb.mxu3 %v6634_v25 }
 0x61e   : > { %2951 = vmatpush.bf16.msrb.mxu2 %v6619_v13  ;;  %2801 = vmatmul.bf16.vlgmr.msra.gmra.mxu0 %v2632_v30 }
 0x61f   : > { %2814 = vmatmul.bf16.vlgmr.msrb.gmra.mxu1 %v2632_v30  ;;  %2827 = vmatmul.bf16.vlgmr.msra.gmra.mxu2 %v2632_v30 }
 0x620   : > { %2840 = vmatmul.bf16.vlgmr.msra.gmra.mxu3 %v2632_v30  ;;  %3045 = vmatpush.bf16.msra.mxu0 %v6256_v55 }
 0x621   : > { %3058 = vmatpush.bf16.msrb.mxu1 %v6267_v0  ;;  %3084 = vmatpush.bf16.msra.mxu3 %v6269_v9 }
 0x622   : > { %2952 = vmatpush.bf16.msrb.mxu2 %v6646_v23 }
 0x624   : > { %3046 = vmatpush.bf16.msra.mxu0 %v6296_v5 }
 0x625   : > { %3059 = vmatpush.bf16.msrb.mxu1 %v6307_v12  ;;  %3085 = vmatpush.bf16.msra.mxu3 %v6337_v7 }
 0x626   : > { %3071 = vmatpush.bf16.msra.mxu2 %v6281_v40 }
 0x628   : > { %3047 = vmatpush.bf16.msra.mxu0 %v6357_v24 }
 0x629   : > { %3060 = vmatpush.bf16.msrb.mxu1 %v6359_v16  ;;  %3086 = vmatpush.bf16.msra.mxu3 %v6374_v14 }
 0x62a   : > { %3072 = vmatpush.bf16.msra.mxu2 %v6345_v33 }
 0x62c   : > { %3048 = vmatpush.bf16.msra.mxu0 %v6386_v28 }
 0x62d   : > { %3061 = vmatpush.bf16.msrb.mxu1 %v6388_v50  ;;  %3087 = vmatpush.bf16.msra.mxu3 %v6430_v58 }
 0x62e   : > { %3073 = vmatpush.bf16.msra.mxu2 %v6432_v62 }
 0x630   : > { %3049 = vmatpush.bf16.msra.mxu0 %v6450_v45 }
 0x631   : > { %3062 = vmatpush.bf16.msrb.mxu1 %v6471_v49  ;;  %3088 = vmatpush.bf16.msra.mxu3 %v6473_v20 }
 0x632   : > { %3074 = vmatpush.bf16.msra.mxu2 %v6475_v43 }
 0x634   : > { %3050 = vmatpush.bf16.msra.mxu0 %v6506_v31 }
 0x635   : > { %3063 = vmatpush.bf16.msrb.mxu1 %v6527_v27  ;;  %3089 = vmatpush.bf16.msra.mxu3 %v6543_v22 }
 0x636   : > { %3075 = vmatpush.bf16.msra.mxu2 %v6529_v51 }
 0x638   : > { %3051 = vmatpush.bf16.msra.mxu0 %v6551_v61 }
 0x639   : > { %3064 = vmatpush.bf16.msrb.mxu1 %v6553_v63  ;;  %3090 = vmatpush.bf16.msra.mxu3 %v6581_v8 }
 0x63a   : > { %3076 = vmatpush.bf16.msra.mxu2 %v6570_v59 }
 0x63c   : > { %3052 = vmatpush.bf16.msra.mxu0 %v6605_v37 }
 0x63d   : > { %3065 = vmatpush.bf16.msrb.mxu1 %v6617_v2  ;;  %3091 = vmatpush.bf16.msra.mxu3 %v6634_v25 }
 0x63e   : > { %3077 = vmatpush.bf16.msra.mxu2 %v6619_v13 }
 0x642   : > { %3078 = vmatpush.bf16.msra.mxu2 %v6646_v23 }
 0x68b   : > { %v2498_v4 = vpop.f32.mrf.mxu0 }
 0x68c   : > { %v2527_v52 = vpop.f32.mrf.mxu1  ;;  %v2499_v21 = vadd.f32 %v2498_v4, %v6321_v36 }
 0x68d   : > { %v2528_v6 = vadd.f32 %v2527_v52, %v6323_v41 }
 0x68f   : > { %v6746_v34 = vpack.c.bf16 %v2528_v6, %v2499_v21  ;;  %v2590_v6 = vpack.c.bf16 %v2513_v56, %v2484_v35  ;;  %v2591_v56 = vpack.c.bf16 %v2571_v1, %v2542_v60 }
 0x691   : > { %7228 = vst [vmem:[#allocation27_spill] sm:$0xff] %v6746_v34  ;;  %v2629_v48 = vunpack.c.h.bf16 %v2590_v6  ;;  %v2631_v54 = vunpack.c.h.bf16 %v2591_v56  ;;  %v2630_v1 = vunpack.c.l.bf16 %v2591_v56 }
 0x692   : > { %v2556_v38 = vpop.f32.mrf.mxu2 }
 0x693   : > { %v2585_v39 = vpop.f32.mrf.mxu3  ;;  %v2557_v15 = vadd.f32 %v2556_v38, %v6326_v44  ;;  %v2500_v30 = vpop.f32.mrf.mxu0 }
 0x694   : > { %v2586_v3 = vadd.f32 %v2585_v39, %v6348_v17  ;;  %v2529_v19 = vpop.f32.mrf.mxu1  ;;  %v2501_v4 = vadd.f32 %v2500_v30, %v6321_v36  ;;  %v2628_v39 = vunpack.c.l.bf16 %v2590_v6 }
 0x695   : > { %v2530_v52 = vadd.f32 %v2529_v19, %v6323_v41 }
 0x696   : > { %v6756_v21 = vpack.c.bf16 %v2586_v3, %v2557_v15 }
 0x697   : > { %v6758_v34 = vpack.c.bf16 %v2530_v52, %v2501_v4 }
 0x698   : > { %7229 = vst [vmem:[#allocation28_spill] sm:$0xff] %v6756_v21 }
 0x699   : > { %7230 = vst [vmem:[#allocation29_spill] sm:$0xff] %v6758_v34 }
 0x69a   : > { %v2558_v38 = vpop.f32.mrf.mxu2 }
 0x69b   : > { %v2587_v26 = vpop.f32.mrf.mxu3  ;;  %v2559_v46 = vadd.f32 %v2558_v38, %v6326_v44  ;;  %v2802_v19 = vpop.f32.mrf.mxu0 }
 0x69c   : > { %v2588_v30 = vadd.f32 %v2587_v26, %v6348_v17  ;;  %v2815_v15 = vpop.f32.mrf.mxu1  ;;  %v2845_v3 = vadd.f32 %v2802_v19, %v2628_v39 }
 0x69d   : > { %v2846_v35 = vadd.f32 %v2815_v15, %v2629_v48 }
 0x69e   : > { %v6766_v4 = vpack.c.bf16 %v2588_v30, %v2559_v46  ;;  %v4564_v52 = vmul.f32 -1.442695, %v2845_v3 }
 0x69f   : > { %v4565_v53 = vmul.f32 -1.442695, %v2846_v35 }
 0x6a0   : > { %7231 = vst [vmem:[#allocation30_spill] sm:$0xff] %v6766_v4  ;;  %4884 = vpow2.f32 %v4564_v52 }
 0x6a1   : > { %4886 = vpow2.f32 %v4565_v53 }
 0x6a2   : > { %v2828_v34 = vpop.f32.mrf.mxu2 }
 0x6a3   : > { %v2841_v21 = vpop.f32.mrf.mxu3  ;;  %v2804_v6 = vpop.f32.mrf.mxu0  ;;  %v2847_v15 = vadd.f32 %v2828_v34, %v2630_v1  ;;  %v4435_v1 = vld [vmem:[%s7232_s15 + $0x8] sm:$0xff]  ;;  %s3894_s15 = sshll.u32 %s6657_s0, 4  ;;  %s3895_s15 = int_to_ptr.vmem [resolvable:$true] %s3894_s15 }
 0x6a4   : > { %v2848_v41 = vadd.f32 %v2841_v21, %v2631_v54  ;;  %v2817_v36 = vpop.f32.mrf.mxu1 }
 0x6a6   : > { %v4566_v38 = vmul.f32 -1.442695, %v2848_v41  ;;  %v4885_v44 = vpop.eup %4884 }
 0x6a7   : > { %v4887_v26 = vpop.eup %4886  ;;  %v2852_v17 = vadd.f32 1.0, %v4885_v44 }
 0x6a8   : > { %4888 = vpow2.f32 %v4566_v38  ;;  %v2871_v39 = vadd.f32 1.0, %v4887_v26 }
 0x6a9   : > { %4890 = vrcp.f32 %v2852_v17  ;;  %v2864_v52 = vand.u32 2147483648, %v2852_v17  ;;  %v2862_v54 = vand.u32 2147483647, %v2852_v17  ;;  %vm2858_vm3 = vweird.f32 %v2852_v17 }
 0x6aa   : > { %4892 = vrcp.f32 %v2871_v39  ;;  %v2830_v48 = vpop.f32.mrf.mxu2  ;;  %v2883_v44 = vand.u32 2147483648, %v2871_v39  ;;  %v2881_v38 = vand.u32 2147483647, %v2871_v39  ;;  %vm2877_vm4 = vweird.f32 %v2871_v39 }
 0x6ab   : > { %v2843_v46 = vpop.f32.mrf.mxu3  ;;  %v2865_v34 = vor.u32 1.1754944e-38, %v2864_v52  ;;  %vm2863_vm7 = vcmp.eq.f32.partialorder %v2862_v54, 8.507059e+37 }
 0x6ac   : > { %vm2882_vm8 = vcmp.eq.f32.partialorder %v2881_v38, 8.507059e+37 }
 0x6ae   : > { %v4889_v60 = vpop.eup %4888 }
 0x6af   : > { %v2891_v30 = vadd.f32 1.0, %v4889_v60  ;;  %v4891_v19 = vpop.eup %4890  ;;  %v2884_v60 = vor.u32 1.1754944e-38, %v2883_v44 }
 0x6b0   : > { %v4893_v3 = vpop.eup %4892  ;;  %v2854_v35 = vmul.f32 %v4891_v19, %v2852_v17  ;;  %vm2859_vm1 = vweird.f32 %v4891_v19 }
 0x6b1   : > { %4894 = vrcp.f32 %v2891_v30  ;;  %v2873_v21 = vmul.f32 %v4893_v3, %v2871_v39  ;;  %vm2878_vm2 = vweird.f32 %v4893_v3  ;;  %vm2860_vm5 = vmor %vm2858_vm3, %vm2859_vm1  ;;  %v2903_v44 = vand.u32 2147483648, %v2891_v30 }
 0x6b2   : > { %v2855_v36 = vsub.f32 1.0, %v2854_v35  ;;  %4896 = vtanh.f32 %v2847_v15  ;;  %vm2879_vm6 = vmor %vm2877_vm4, %vm2878_vm2  ;;  %vm2897_vm10 = vweird.f32 %v2891_v30 }
 0x6b3   : > { %v2874_v41 = vsub.f32 1.0, %v2873_v21  ;;  %v2904_v54 = vor.u32 1.1754944e-38, %v2903_v44 }
 0x6b4   : > { %v2856_v53 = vmul.f32 %v4891_v19, %v2855_v36 }
 0x6b5   : > { %v2875_v6 = vmul.f32 %v4893_v3, %v2874_v41 }
 0x6b6   : > { %v2857_v26 = vadd.f32 %v4891_v19, %v2856_v53 }
 0x6b7   : > { %v4895_v56 = vpop.eup %4894  ;;  %v2876_v46 = vadd.f32 %v4893_v3, %v2875_v6  ;;  %v2901_v6 = vand.u32 2147483647, %v2891_v30 }
 0x6b8   : > { %v2893_v48 = vmul.f32 %v4895_v56, %v2891_v30  ;;  %v2861_v15 = vsel %vm2860_vm5, %v4891_v19, %v2857_v26  ;;  %v4897_v35 = vpop.eup %4896  ;;  %vm2898_vm9 = vweird.f32 %v4895_v56 }
 0x6b9   : > { %v2866_v21 = vsel %vm2863_vm7, %v2865_v34, %v2861_v15  ;;  %v2880_v36 = vsel %vm2879_vm6, %v4893_v3, %v2876_v46  ;;  %vm2899_vm11 = vmor %vm2897_vm10, %vm2898_vm9  ;;  %vm2902_vm12 = vcmp.eq.f32.partialorder %v2901_v6, 8.507059e+37  ;;  %v2917_v15 = vunpack.c.h.bf16 %v6578_v11 }
 0x6ba   : > { %v2894_v41 = vsub.f32 1.0, %v2893_v48  ;;  %v2885_v4 = vsel %vm2882_vm8, %v2884_v60, %v2880_v36  ;;  %v2908_v57 = vmul.f32 %v4897_v35, %v2866_v21 }
 0x6bb   : > { %v2907_v53 = vmul.f32 %v4435_v1, %v2885_v4  ;;  %v2915_v4 = vunpack.c.h.bf16 %v6489_v47 }
 0x6bc   : > { %v2895_v17 = vmul.f32 %v4895_v56, %v2894_v41 }
 0x6bd   : > { %v6770_v39 = vadd.f32 %v2908_v57, %v2907_v53  ;;  %v2914_v57 = vunpack.c.l.bf16 %v6489_v47 }
 0x6be   : > { %v2896_v52 = vadd.f32 %v4895_v56, %v2895_v17 }
 0x6bf   : > { %4898 = vtanh.f32 %v6770_v39 }
 0x6c0   : > { %v2900_v19 = vsel %vm2899_vm11, %v4895_v56, %v2896_v52 }
 0x6c1   : > { %v2905_v38 = vsel %vm2902_vm12, %v2904_v54, %v2900_v19 }
 0x6c5   : > { %v4899_v3 = vpop.eup %4898 }
 0x6c6   : > { %v2911_v26 = vmul.f32 %v4899_v3, %v2905_v38  ;;  %v2916_v38 = vunpack.c.l.bf16 %v6578_v11 }
 0x6c8   : > { %v2918_v34 = vpack.c.bf16 %v2911_v26, %v2911_v26 }
 0x6ca   : > { %2927 = vmatmul.bf16.vlgmr.msrb.gmra.mxu0 %v2918_v34  ;;  %2940 = vmatmul.bf16.vlgmr.msra.gmra.mxu1 %v2918_v34 }
 0x6cb   : > { %2953 = vmatmul.bf16.vlgmr.msrb.gmra.mxu2 %v2918_v34  ;;  %2966 = vmatmul.bf16.vlgmr.msrb.gmra.mxu3 %v2918_v34 }
 0x6cc   : > { %3171 = vmatpush.bf16.msrb.mxu0 %v6256_v55  ;;  %3184 = vmatpush.bf16.msra.mxu1 %v6267_v0 }
 0x6cd   : > { %3197 = vmatpush.bf16.msrb.mxu2 %v6281_v40  ;;  %3210 = vmatpush.bf16.msrb.mxu3 %v6269_v9 }
 0x6d0   : > { %3172 = vmatpush.bf16.msrb.mxu0 %v6296_v5  ;;  %3185 = vmatpush.bf16.msra.mxu1 %v6307_v12 }
 0x6d1   : > { %3198 = vmatpush.bf16.msrb.mxu2 %v6345_v33  ;;  %3211 = vmatpush.bf16.msrb.mxu3 %v6337_v7 }
 0x6d4   : > { %3173 = vmatpush.bf16.msrb.mxu0 %v6357_v24  ;;  %3186 = vmatpush.bf16.msra.mxu1 %v6359_v16 }
 0x6d5   : > { %3199 = vmatpush.bf16.msrb.mxu2 %v6432_v62  ;;  %3212 = vmatpush.bf16.msrb.mxu3 %v6374_v14 }
 0x6d8   : > { %3174 = vmatpush.bf16.msrb.mxu0 %v6386_v28  ;;  %3187 = vmatpush.bf16.msra.mxu1 %v6388_v50 }
 0x6d9   : > { %3200 = vmatpush.bf16.msrb.mxu2 %v6475_v43  ;;  %3213 = vmatpush.bf16.msrb.mxu3 %v6430_v58 }
 0x6dc   : > { %3175 = vmatpush.bf16.msrb.mxu0 %v6450_v45  ;;  %3188 = vmatpush.bf16.msra.mxu1 %v6471_v49 }
 0x6dd   : > { %3201 = vmatpush.bf16.msrb.mxu2 %v6529_v51  ;;  %3214 = vmatpush.bf16.msrb.mxu3 %v6473_v20 }
 0x6e0   : > { %3176 = vmatpush.bf16.msrb.mxu0 %v6506_v31  ;;  %3189 = vmatpush.bf16.msra.mxu1 %v6527_v27 }
 0x6e1   : > { %3202 = vmatpush.bf16.msrb.mxu2 %v6570_v59  ;;  %3215 = vmatpush.bf16.msrb.mxu3 %v6543_v22 }
 0x6e4   : > { %3177 = vmatpush.bf16.msrb.mxu0 %v6551_v61  ;;  %3190 = vmatpush.bf16.msra.mxu1 %v6553_v63 }
 0x6e5   : > { %3203 = vmatpush.bf16.msrb.mxu2 %v6619_v13  ;;  %3216 = vmatpush.bf16.msrb.mxu3 %v6581_v8 }
 0x6e8   : > { %3178 = vmatpush.bf16.msrb.mxu0 %v6605_v37  ;;  %3191 = vmatpush.bf16.msra.mxu1 %v6617_v2 }
 0x6e9   : > { %3204 = vmatpush.bf16.msrb.mxu2 %v6646_v23  ;;  %3217 = vmatpush.bf16.msrb.mxu3 %v6634_v25 }
 0x747   : > { %v2928_v30 = vpop.f32.mrf.mxu0  ;;  %v2941_v56 = vpop.f32.mrf.mxu1 }
 0x748   : > { %v2971_v46 = vadd.f32 %v2928_v30, %v2914_v57  ;;  %v2972_v48 = vadd.f32 %v2941_v56, %v2915_v4 }
 0x74a   : > { %v4567_v60 = vmul.f32 -1.442695, %v2971_v46  ;;  %v4568_v1 = vmul.f32 -1.442695, %v2972_v48 }
 0x74c   : > { %4900 = vpow2.f32 %v4567_v60 }
 0x74d   : > { %4902 = vpow2.f32 %v4568_v1 }
 0x74e   : > { %v2954_v35 = vpop.f32.mrf.mxu2  ;;  %v2967_v21 = vpop.f32.mrf.mxu3 }
 0x74f   : > { %v2974_v36 = vadd.f32 %v2967_v21, %v2917_v15  ;;  %v2930_v41 = vpop.f32.mrf.mxu0  ;;  %v2943_v53 = vpop.f32.mrf.mxu1  ;;  %v2973_v57 = vadd.f32 %v2954_v35, %v2916_v38 }
 0x751   : > { %v4569_v17 = vmul.f32 -1.442695, %v2974_v36 }
 0x752   : > { %v4901_v52 = vpop.eup %4900 }
 0x753   : > { %v4903_v44 = vpop.eup %4902  ;;  %v2978_v6 = vadd.f32 1.0, %v4901_v52  ;;  %4904 = vpow2.f32 %v4569_v17 }
 0x754   : > { %v2997_v47 = vadd.f32 1.0, %v4903_v44 }
 0x755   : > { %4906 = vrcp.f32 %v2978_v6  ;;  %v2990_v60 = vand.u32 2147483648, %v2978_v6  ;;  %v2988_v21 = vand.u32 2147483647, %v2978_v6  ;;  %vm2984_vm15 = vweird.f32 %v2978_v6 }
 0x756   : > { %4908 = vrcp.f32 %v2997_v47  ;;  %v2956_v19 = vpop.f32.mrf.mxu2  ;;  %v2969_v54 = vpop.f32.mrf.mxu3  ;;  %v3009_v1 = vand.u32 2147483648, %v2997_v47  ;;  %v3007_v41 = vand.u32 2147483647, %v2997_v47  ;;  %vm3003_vm0 = vweird.f32 %v2997_v47 }
 0x757   : > { %v2991_v35 = vor.u32 1.1754944e-38, %v2990_v60  ;;  %vm2989_vm3 = vcmp.eq.f32.partialorder %v2988_v21, 8.507059e+37 }
 0x758   : > { %v3010_v44 = vor.u32 1.1754944e-38, %v3009_v1  ;;  %vm3008_vm4 = vcmp.eq.f32.partialorder %v3007_v41, 8.507059e+37 }
 0x759   : > { %v4905_v3 = vpop.eup %4904 }
 0x75a   : > { %v3017_v26 = vadd.f32 1.0, %v4905_v3 }
 0x75b   : > { %v4907_v34 = vpop.eup %4906 }
 0x75c   : > { %v4909_v4 = vpop.eup %4908  ;;  %v2980_v30 = vmul.f32 %v4907_v34, %v2978_v6  ;;  %4910 = vrcp.f32 %v3017_v26  ;;  %vm2985_vm13 = vweird.f32 %v4907_v34  ;;  %v3029_v60 = vand.u32 2147483648, %v3017_v26 }
 0x75d   : > { %v2999_v56 = vmul.f32 %v4909_v4, %v2997_v47  ;;  %4912 = vtanh.f32 %v2973_v57  ;;  %vm3004_vm14 = vweird.f32 %v4909_v4  ;;  %vm2986_vm1 = vmor %vm2984_vm15, %vm2985_vm13  ;;  %vm3023_vm6 = vweird.f32 %v3017_v26 }
 0x75e   : > { %v2981_v46 = vsub.f32 1.0, %v2980_v30  ;;  %vm3005_vm2 = vmor %vm3003_vm0, %vm3004_vm14 }
 0x75f   : > { %v3000_v48 = vsub.f32 1.0, %v2999_v56 }
 0x760   : > { %v2982_v15 = vmul.f32 %v4907_v34, %v2981_v46 }
 0x761   : > { %v3001_v36 = vmul.f32 %v4909_v4, %v3000_v48 }
 0x762   : > { %v4911_v53 = vpop.eup %4910  ;;  %v2983_v11 = vadd.f32 %v4907_v34, %v2982_v15  ;;  %v3030_v15 = vor.u32 1.1754944e-38, %v3029_v60 }
 0x763   : > { %v3002_v17 = vadd.f32 %v4909_v4, %v3001_v36  ;;  %v3019_v52 = vmul.f32 %v4911_v53, %v3017_v26  ;;  %v4913_v54 = vpop.eup %4912  ;;  %vm3024_vm5 = vweird.f32 %v4911_v53 }
 0x764   : > { %v2987_v19 = vsel %vm2986_vm1, %v4907_v34, %v2983_v11  ;;  %v3027_v34 = vand.u32 2147483647, %v3017_v26  ;;  %vm3025_vm7 = vmor %vm3023_vm6, %vm3024_vm5  ;;  %v3041_v26 = vunpack.c.h.bf16 %v6594_v42 }
 0x765   : > { %v2992_v3 = vsel %vm2989_vm3, %v2991_v35, %v2987_v19  ;;  %v3006_v38 = vsel %vm3005_vm2, %v4909_v4, %v3002_v17  ;;  %v3020_v57 = vsub.f32 1.0, %v3019_v52  ;;  %v3043_v19 = vunpack.c.h.bf16 %v6648_v10 }
 0x766   : > { %v3011_v30 = vsel %vm3008_vm4, %v3010_v44, %v3006_v38  ;;  %v3034_v56 = vmul.f32 %v4913_v54, %v2992_v3  ;;  %vm3028_vm8 = vcmp.eq.f32.partialorder %v3027_v34, 8.507059e+37 }
 0x767   : > { %v3033_v46 = vmul.f32 %v3011_v30, %v6770_v39  ;;  %v3021_v48 = vmul.f32 %v4911_v53, %v3020_v57  ;;  %v3040_v39 = vunpack.c.l.bf16 %v6594_v42 }
 0x769   : > { %v6810_v6 = vadd.f32 %v3034_v56, %v3033_v46  ;;  %v3022_v47 = vadd.f32 %v4911_v53, %v3021_v48 }
 0x76b   : > { %4914 = vtanh.f32 %v6810_v6  ;;  %v3026_v1 = vsel %vm3025_vm7, %v4911_v53, %v3022_v47 }
 0x76c   : > { %v3031_v21 = vsel %vm3028_vm8, %v3030_v15, %v3026_v1  ;;  %v3042_v15 = vunpack.c.l.bf16 %v6648_v10 }
 0x771   : > { %v4915_v4 = vpop.eup %4914 }
 0x772   : > { %v3037_v36 = vmul.f32 %v4915_v4, %v3031_v21 }
 0x774   : > { %v3044_v41 = vpack.c.bf16 %v3037_v36, %v3037_v36 }
 0x776   : > { %3053 = vmatmul.bf16.vlgmr.msra.gmra.mxu0 %v3044_v41  ;;  %3066 = vmatmul.bf16.vlgmr.msrb.gmra.mxu1 %v3044_v41 }
 0x777   : > { %3079 = vmatmul.bf16.vlgmr.msra.gmra.mxu2 %v3044_v41  ;;  %3092 = vmatmul.bf16.vlgmr.msra.gmra.mxu3 %v3044_v41 }
 0x778   : > { %3297 = vmatpush.bf16.msra.mxu0 %v6256_v55  ;;  %3310 = vmatpush.bf16.msrb.mxu1 %v6267_v0 }
 0x779   : > { %3323 = vmatpush.bf16.msra.mxu2 %v6281_v40  ;;  %3336 = vmatpush.bf16.msra.mxu3 %v6269_v9 }
 0x77c   : > { %3298 = vmatpush.bf16.msra.mxu0 %v6296_v5  ;;  %3311 = vmatpush.bf16.msrb.mxu1 %v6307_v12 }
 0x77d   : > { %3324 = vmatpush.bf16.msra.mxu2 %v6345_v33  ;;  %3337 = vmatpush.bf16.msra.mxu3 %v6337_v7 }
 0x780   : > { %3299 = vmatpush.bf16.msra.mxu0 %v6357_v24  ;;  %3312 = vmatpush.bf16.msrb.mxu1 %v6359_v16 }
 0x781   : > { %3325 = vmatpush.bf16.msra.mxu2 %v6432_v62  ;;  %3338 = vmatpush.bf16.msra.mxu3 %v6374_v14 }
 0x784   : > { %3300 = vmatpush.bf16.msra.mxu0 %v6386_v28  ;;  %3313 = vmatpush.bf16.msrb.mxu1 %v6388_v50 }
 0x785   : > { %3326 = vmatpush.bf16.msra.mxu2 %v6475_v43  ;;  %3339 = vmatpush.bf16.msra.mxu3 %v6430_v58 }
 0x788   : > { %3301 = vmatpush.bf16.msra.mxu0 %v6450_v45  ;;  %3314 = vmatpush.bf16.msrb.mxu1 %v6471_v49 }
 0x789   : > { %3327 = vmatpush.bf16.msra.mxu2 %v6529_v51  ;;  %3340 = vmatpush.bf16.msra.mxu3 %v6473_v20 }
 0x78c   : > { %3302 = vmatpush.bf16.msra.mxu0 %v6506_v31  ;;  %3315 = vmatpush.bf16.msrb.mxu1 %v6527_v27 }
 0x78d   : > { %3328 = vmatpush.bf16.msra.mxu2 %v6570_v59  ;;  %3341 = vmatpush.bf16.msra.mxu3 %v6543_v22 }
 0x790   : > { %3303 = vmatpush.bf16.msra.mxu0 %v6551_v61  ;;  %3316 = vmatpush.bf16.msrb.mxu1 %v6553_v63 }
 0x791   : > { %3329 = vmatpush.bf16.msra.mxu2 %v6619_v13  ;;  %3342 = vmatpush.bf16.msra.mxu3 %v6581_v8 }
 0x794   : > { %3304 = vmatpush.bf16.msra.mxu0 %v6605_v37  ;;  %3317 = vmatpush.bf16.msrb.mxu1 %v6617_v2 }
 0x795   : > { %3330 = vmatpush.bf16.msra.mxu2 %v6646_v23  ;;  %3343 = vmatpush.bf16.msra.mxu3 %v6634_v25 }
 0x7f3   : > { %v3054_v53 = vpop.f32.mrf.mxu0  ;;  %v3067_v11 = vpop.f32.mrf.mxu1 }
 0x7f4   : > { %v3097_v35 = vadd.f32 %v3054_v53, %v3040_v39  ;;  %v3098_v17 = vadd.f32 %v3067_v11, %v3041_v26 }
 0x7f6   : > { %v4570_v52 = vmul.f32 -1.442695, %v3097_v35  ;;  %v4571_v44 = vmul.f32 -1.442695, %v3098_v17 }
 0x7f8   : > { %4916 = vpow2.f32 %v4570_v52 }
 0x7f9   : > { %4918 = vpow2.f32 %v4571_v44 }
 0x7fa   : > { %v3080_v54 = vpop.f32.mrf.mxu2  ;;  %v3093_v3 = vpop.f32.mrf.mxu3 }
 0x7fb   : > { %v3100_v38 = vadd.f32 %v3093_v3, %v3043_v19  ;;  %v3056_v57 = vpop.f32.mrf.mxu0  ;;  %v3069_v30 = vpop.f32.mrf.mxu1  ;;  %v3099_v36 = vadd.f32 %v3080_v54, %v3042_v15 }
 0x7fd   : > { %v4572_v56 = vmul.f32 -1.442695, %v3100_v38 }
 0x7fe   : > { %v4917_v46 = vpop.eup %4916 }
 0x7ff   : > { %v4919_v48 = vpop.eup %4918  ;;  %v3104_v47 = vadd.f32 1.0, %v4917_v46  ;;  %4920 = vpow2.f32 %v4572_v56 }
 0x800   : > { %v3123_v42 = vadd.f32 1.0, %v4919_v48 }
 0x801   : > { %4922 = vrcp.f32 %v3104_v47  ;;  %v3116_v35 = vand.u32 2147483648, %v3104_v47  ;;  %v3114_v44 = vand.u32 2147483647, %v3104_v47  ;;  %vm3110_vm11 = vweird.f32 %v3104_v47 }
 0x802   : > { %4924 = vrcp.f32 %v3123_v42  ;;  %v3082_v60 = vpop.f32.mrf.mxu2  ;;  %v3095_v34 = vpop.f32.mrf.mxu3  ;;  %v3135_v17 = vand.u32 2147483648, %v3123_v42  ;;  %v3133_v3 = vand.u32 2147483647, %v3123_v42  ;;  %vm3129_vm12 = vweird.f32 %v3123_v42 }
 0x803   : > { %v3117_v54 = vor.u32 1.1754944e-38, %v3116_v35  ;;  %vm3115_vm15 = vcmp.eq.f32.partialorder %v3114_v44, 8.507059e+37 }
 0x804   : > { %v3136_v56 = vor.u32 1.1754944e-38, %v3135_v17  ;;  %vm3134_vm0 = vcmp.eq.f32.partialorder %v3133_v3, 8.507059e+37 }
 0x805   : > { %v4921_v1 = vpop.eup %4920 }
 0x806   : > { %v3143_v4 = vadd.f32 1.0, %v4921_v1 }
 0x807   : > { %v4923_v21 = vpop.eup %4922 }
 0x808   : > { %v4925_v41 = vpop.eup %4924  ;;  %v3106_v39 = vmul.f32 %v4923_v21, %v3104_v47  ;;  %4926 = vrcp.f32 %v3143_v4  ;;  %vm3111_vm9 = vweird.f32 %v4923_v21  ;;  %vm3149_vm2 = vweird.f32 %v3143_v4 }
 0x809   : > { %v3125_v26 = vmul.f32 %v4925_v41, %v3123_v42  ;;  %4928 = vtanh.f32 %v3099_v36  ;;  %vm3130_vm10 = vweird.f32 %v4925_v41  ;;  %vm3112_vm13 = vmor %vm3110_vm11, %vm3111_vm9 }
 0x80a   : > { %v3107_v53 = vsub.f32 1.0, %v3106_v39  ;;  %vm3131_vm14 = vmor %vm3129_vm12, %vm3130_vm10 }
 0x80b   : > { %v3126_v11 = vsub.f32 1.0, %v3125_v26 }
 0x80c   : > { %v3108_v52 = vmul.f32 %v4923_v21, %v3107_v53  ;;  %v3155_v53 = vand.u32 2147483648, %v3143_v4 }
 0x80d   : > { %v3127_v19 = vmul.f32 %v4925_v41, %v3126_v11 }
 0x80e   : > { %v4927_v38 = vpop.eup %4926  ;;  %v3109_v10 = vadd.f32 %v4923_v21, %v3108_v52  ;;  %v3156_v35 = vor.u32 1.1754944e-38, %v3155_v53 }
 0x80f   : > { %v3128_v57 = vadd.f32 %v4925_v41, %v3127_v19  ;;  %v3145_v30 = vmul.f32 %v4927_v38, %v3143_v4  ;;  %v4929_v48 = vpop.eup %4928  ;;  %vm3150_vm1 = vweird.f32 %v4927_v38 }
 0x810   : > { %v3113_v46 = vsel %vm3112_vm13, %v4923_v21, %v3109_v10  ;;  %v3153_v21 = vand.u32 2147483647, %v3143_v4  ;;  %vm3151_vm3 = vmor %vm3149_vm2, %vm3150_vm1  ;;  %v3167_v4 = vunpack.c.h.bf16 %v6652_v32 }
 0x811   : > { %v3118_v60 = vsel %vm3115_vm15, %v3117_v54, %v3113_v46  ;;  %v3132_v34 = vsel %vm3131_vm14, %v4925_v41, %v3128_v57  ;;  %v3146_v1 = vsub.f32 1.0, %v3145_v30  ;;  %v3169_v30 = vunpack.c.h.bf16 %v6669_v18 }
 0x812   : > { %v3137_v15 = vsel %vm3134_vm0, %v3136_v56, %v3132_v34  ;;  %v3160_v36 = vmul.f32 %v4929_v48, %v3118_v60  ;;  %vm3154_vm4 = vcmp.eq.f32.partialorder %v3153_v21, 8.507059e+37  ;;  %v3168_v21 = vunpack.c.l.bf16 %v6669_v18 }
 0x813   : > { %v3159_v39 = vmul.f32 %v3137_v15, %v6810_v6  ;;  %v3147_v26 = vmul.f32 %v4927_v38, %v3146_v1  ;;  %v3166_v6 = vunpack.c.l.bf16 %v6652_v32 }
 0x815   : > { %v6850_v47 = vadd.f32 %v3160_v36, %v3159_v39  ;;  %v3148_v42 = vadd.f32 %v4927_v38, %v3147_v26 }
 0x817   : > { %4930 = vtanh.f32 %v6850_v47  ;;  %v3152_v11 = vsel %vm3151_vm3, %v4927_v38, %v3148_v42 }
 0x818   : > { %v3157_v17 = vsel %vm3154_vm4, %v3156_v35, %v3152_v11 }
 0x81d   : > { %v4931_v41 = vpop.eup %4930 }
 0x81e   : > { %v3163_v52 = vmul.f32 %v4931_v41, %v3157_v17 }
 0x820   : > { %v3170_v44 = vpack.c.bf16 %v3163_v52, %v3163_v52 }
 0x822   : > { %3179 = vmatmul.bf16.vlgmr.msrb.gmra.mxu0 %v3170_v44  ;;  %3192 = vmatmul.bf16.vlgmr.msra.gmra.mxu1 %v3170_v44 }
 0x823   : > { %3205 = vmatmul.bf16.vlgmr.msrb.gmra.mxu2 %v3170_v44  ;;  %3218 = vmatmul.bf16.vlgmr.msrb.gmra.mxu3 %v3170_v44 }
 0x824   : > { %3423 = vmatpush.bf16.msrb.mxu0 %v6256_v55  ;;  %3436 = vmatpush.bf16.msra.mxu1 %v6267_v0 }
 0x825   : > { %3449 = vmatpush.bf16.msrb.mxu2 %v6281_v40  ;;  %3462 = vmatpush.bf16.msrb.mxu3 %v6269_v9 }
 0x828   : > { %3424 = vmatpush.bf16.msrb.mxu0 %v6296_v5  ;;  %3437 = vmatpush.bf16.msra.mxu1 %v6307_v12 }
 0x829   : > { %3450 = vmatpush.bf16.msrb.mxu2 %v6345_v33  ;;  %3463 = vmatpush.bf16.msrb.mxu3 %v6337_v7 }
 0x82c   : > { %3425 = vmatpush.bf16.msrb.mxu0 %v6357_v24  ;;  %3438 = vmatpush.bf16.msra.mxu1 %v6359_v16 }
 0x82d   : > { %3451 = vmatpush.bf16.msrb.mxu2 %v6432_v62  ;;  %3464 = vmatpush.bf16.msrb.mxu3 %v6374_v14 }
 0x830   : > { %3426 = vmatpush.bf16.msrb.mxu0 %v6386_v28  ;;  %3439 = vmatpush.bf16.msra.mxu1 %v6388_v50 }
 0x831   : > { %3452 = vmatpush.bf16.msrb.mxu2 %v6475_v43  ;;  %3465 = vmatpush.bf16.msrb.mxu3 %v6430_v58 }
 0x834   : > { %3427 = vmatpush.bf16.msrb.mxu0 %v6450_v45  ;;  %3440 = vmatpush.bf16.msra.mxu1 %v6471_v49 }
 0x835   : > { %3453 = vmatpush.bf16.msrb.mxu2 %v6529_v51  ;;  %3466 = vmatpush.bf16.msrb.mxu3 %v6473_v20 }
 0x838   : > { %3428 = vmatpush.bf16.msrb.mxu0 %v6506_v31  ;;  %3441 = vmatpush.bf16.msra.mxu1 %v6527_v27 }
 0x839   : > { %3454 = vmatpush.bf16.msrb.mxu2 %v6570_v59  ;;  %3467 = vmatpush.bf16.msrb.mxu3 %v6543_v22 }
 0x83c   : > { %3429 = vmatpush.bf16.msrb.mxu0 %v6551_v61  ;;  %3442 = vmatpush.bf16.msra.mxu1 %v6553_v63 }
 0x83d   : > { %3455 = vmatpush.bf16.msrb.mxu2 %v6619_v13  ;;  %3468 = vmatpush.bf16.msrb.mxu3 %v6581_v8 }
 0x840   : > { %3430 = vmatpush.bf16.msrb.mxu0 %v6605_v37  ;;  %3443 = vmatpush.bf16.msra.mxu1 %v6617_v2 }
 0x841   : > { %3456 = vmatpush.bf16.msrb.mxu2 %v6646_v23  ;;  %3469 = vmatpush.bf16.msrb.mxu3 %v6634_v25 }
 0x89f   : > { %v3180_v19 = vpop.f32.mrf.mxu0  ;;  %v3193_v3 = vpop.f32.mrf.mxu1 }
 0x8a0   : > { %v3223_v38 = vadd.f32 %v3180_v19, %v3166_v6  ;;  %v3224_v10 = vadd.f32 %v3193_v3, %v3167_v4 }
 0x8a2   : > { %v4573_v54 = vmul.f32 -1.442695, %v3223_v38  ;;  %v4574_v57 = vmul.f32 -1.442695, %v3224_v10 }
 0x8a4   : > { %4932 = vpow2.f32 %v4573_v54 }
 0x8a5   : > { %4934 = vpow2.f32 %v4574_v57 }
 0x8a6   : > { %v3206_v56 = vpop.f32.mrf.mxu2  ;;  %v3219_v46 = vpop.f32.mrf.mxu3 }
 0x8a7   : > { %v3226_v48 = vadd.f32 %v3219_v46, %v3169_v30  ;;  %v3182_v60 = vpop.f32.mrf.mxu0  ;;  %v3195_v34 = vpop.f32.mrf.mxu1  ;;  %v3225_v41 = vadd.f32 %v3206_v56, %v3168_v21 }
 0x8a9   : > { %v4575_v1 = vmul.f32 -1.442695, %v3226_v48 }
 0x8aa   : > { %v4933_v15 = vpop.eup %4932 }
 0x8ab   : > { %v4935_v36 = vpop.eup %4934  ;;  %v3230_v39 = vadd.f32 1.0, %v4933_v15  ;;  %4936 = vpow2.f32 %v4575_v1 }
 0x8ac   : > { %v3249_v32 = vadd.f32 1.0, %v4935_v36 }
 0x8ad   : > { %4938 = vrcp.f32 %v3230_v39  ;;  %v3242_v19 = vand.u32 2147483648, %v3230_v39  ;;  %v3240_v10 = vand.u32 2147483647, %v3230_v39  ;;  %vm3236_vm7 = vweird.f32 %v3230_v39 }
 0x8ae   : > { %4940 = vrcp.f32 %v3249_v32  ;;  %v3208_v26 = vpop.f32.mrf.mxu2  ;;  %v3221_v42 = vpop.f32.mrf.mxu3  ;;  %v3261_v3 = vand.u32 2147483648, %v3249_v32  ;;  %v3259_v57 = vand.u32 2147483647, %v3249_v32  ;;  %vm3255_vm8 = vweird.f32 %v3249_v32 }
 0x8af   : > { %v3243_v56 = vor.u32 1.1754944e-38, %v3242_v19  ;;  %vm3241_vm11 = vcmp.eq.f32.partialorder %v3240_v10, 8.507059e+37 }
 0x8b0   : > { %v3262_v60 = vor.u32 1.1754944e-38, %v3261_v3  ;;  %vm3260_vm12 = vcmp.eq.f32.partialorder %v3259_v57, 8.507059e+37 }
 0x8b1   : > { %v4937_v53 = vpop.eup %4936 }
 0x8b2   : > { %v3269_v11 = vadd.f32 1.0, %v4937_v53 }
 0x8b3   : > { %v4939_v35 = vpop.eup %4938 }
 0x8b4   : > { %v4941_v17 = vpop.eup %4940  ;;  %v3232_v52 = vmul.f32 %v4939_v35, %v3230_v39  ;;  %4942 = vrcp.f32 %v3269_v11  ;;  %vm3237_vm5 = vweird.f32 %v4939_v35  ;;  %vm3275_vm14 = vweird.f32 %v3269_v11 }
 0x8b5   : > { %v3251_v44 = vmul.f32 %v4941_v17, %v3249_v32  ;;  %4944 = vtanh.f32 %v3225_v41  ;;  %vm3256_vm6 = vweird.f32 %v4941_v17  ;;  %vm3238_vm9 = vmor %vm3236_vm7, %vm3237_vm5 }
 0x8b6   : > { %v3233_v6 = vsub.f32 1.0, %v3232_v52  ;;  %vm3257_vm10 = vmor %vm3255_vm8, %vm3256_vm6  ;;  %v3281_v52 = vand.u32 2147483648, %v3269_v11 }
 0x8b7   : > { %v3252_v4 = vsub.f32 1.0, %v3251_v44 }
 0x8b8   : > { %v3234_v38 = vmul.f32 %v4939_v35, %v3233_v6  ;;  %v3282_v6 = vor.u32 1.1754944e-38, %v3281_v52 }
 0x8b9   : > { %v3253_v54 = vmul.f32 %v4941_v17, %v3252_v4 }
 0x8ba   : > { %v4943_v30 = vpop.eup %4942  ;;  %v3235_v18 = vadd.f32 %v4939_v35, %v3234_v38 }
 0x8bb   : > { %v3254_v46 = vadd.f32 %v4941_v17, %v3253_v54  ;;  %v3271_v48 = vmul.f32 %v4943_v30, %v3269_v11  ;;  %v4945_v1 = vpop.eup %4944  ;;  %vm3276_vm13 = vweird.f32 %v4943_v30 }
 0x8bc   : > { %v3239_v34 = vsel %vm3238_vm9, %v4939_v35, %v3235_v18  ;;  %v3279_v35 = vand.u32 2147483647, %v3269_v11  ;;  %vm3277_vm15 = vmor %vm3275_vm14, %vm3276_vm13  ;;  %v3293_v11 = vunpack.c.h.bf16 %v6673_v29 }
 0x8bd   : > { %v3244_v15 = vsel %vm3241_vm11, %v3243_v56, %v3239_v34  ;;  %v3258_v36 = vsel %vm3257_vm10, %v4941_v17, %v3254_v46  ;;  %v3272_v26 = vsub.f32 1.0, %v3271_v48  ;;  %v7233_v56 = vld [vmem:[#allocation21_spill] sm:$0xff] }
 0x8be   : > { %v3263_v42 = vsel %vm3260_vm12, %v3262_v60, %v3258_v36  ;;  %v3286_v53 = vmul.f32 %v4945_v1, %v3244_v15  ;;  %vm3280_vm0 = vcmp.eq.f32.partialorder %v3279_v35, 8.507059e+37  ;;  %v3295_v46 = vunpack.c.h.bf16 %v7233_v56 }
 0x8bf   : > { %v3285_v21 = vmul.f32 %v3263_v42, %v6850_v47  ;;  %v3273_v41 = vmul.f32 %v4943_v30, %v3272_v26  ;;  %v3292_v47 = vunpack.c.l.bf16 %v6673_v29  ;;  %v3294_v52 = vunpack.c.l.bf16 %v7233_v56 }
 0x8c1   : > { %v6890_v39 = vadd.f32 %v3286_v53, %v3285_v21  ;;  %v3274_v32 = vadd.f32 %v4943_v30, %v3273_v41 }
 0x8c3   : > { %4946 = vtanh.f32 %v6890_v39  ;;  %v3278_v44 = vsel %vm3277_vm15, %v4943_v30, %v3274_v32 }
 0x8c4   : > { %v3283_v4 = vsel %vm3280_vm0, %v3282_v6, %v3278_v44 }
 0x8c9   : > { %v4947_v17 = vpop.eup %4946 }
 0x8ca   : > { %v3289_v19 = vmul.f32 %v4947_v17, %v3283_v4 }
 0x8cc   : > { %v3296_v3 = vpack.c.bf16 %v3289_v19, %v3289_v19 }
 0x8ce   : > { %3305 = vmatmul.bf16.vlgmr.msra.gmra.mxu0 %v3296_v3  ;;  %3318 = vmatmul.bf16.vlgmr.msrb.gmra.mxu1 %v3296_v3 }
 0x8cf   : > { %3331 = vmatmul.bf16.vlgmr.msra.gmra.mxu2 %v3296_v3  ;;  %3344 = vmatmul.bf16.vlgmr.msra.gmra.mxu3 %v3296_v3 }
 0x8d0   : > { %3549 = vmatpush.bf16.msra.mxu0 %v6256_v55  ;;  %3562 = vmatpush.bf16.msrb.mxu1 %v6267_v0 }
 0x8d1   : > { %3575 = vmatpush.bf16.msra.mxu2 %v6281_v40  ;;  %3588 = vmatpush.bf16.msra.mxu3 %v6269_v9 }
 0x8d4   : > { %3550 = vmatpush.bf16.msra.mxu0 %v6296_v5  ;;  %3563 = vmatpush.bf16.msrb.mxu1 %v6307_v12 }
 0x8d5   : > { %3576 = vmatpush.bf16.msra.mxu2 %v6345_v33  ;;  %3589 = vmatpush.bf16.msra.mxu3 %v6337_v7 }
 0x8d8   : > { %3551 = vmatpush.bf16.msra.mxu0 %v6357_v24  ;;  %3564 = vmatpush.bf16.msrb.mxu1 %v6359_v16 }
 0x8d9   : > { %3577 = vmatpush.bf16.msra.mxu2 %v6432_v62  ;;  %3590 = vmatpush.bf16.msra.mxu3 %v6374_v14 }
 0x8dc   : > { %3552 = vmatpush.bf16.msra.mxu0 %v6386_v28  ;;  %3565 = vmatpush.bf16.msrb.mxu1 %v6388_v50 }
 0x8dd   : > { %3578 = vmatpush.bf16.msra.mxu2 %v6475_v43  ;;  %3591 = vmatpush.bf16.msra.mxu3 %v6430_v58 }
 0x8e0   : > { %3553 = vmatpush.bf16.msra.mxu0 %v6450_v45  ;;  %3566 = vmatpush.bf16.msrb.mxu1 %v6471_v49 }
 0x8e1   : > { %3579 = vmatpush.bf16.msra.mxu2 %v6529_v51  ;;  %3592 = vmatpush.bf16.msra.mxu3 %v6473_v20 }
 0x8e4   : > { %3554 = vmatpush.bf16.msra.mxu0 %v6506_v31  ;;  %3567 = vmatpush.bf16.msrb.mxu1 %v6527_v27 }
 0x8e5   : > { %3580 = vmatpush.bf16.msra.mxu2 %v6570_v59  ;;  %3593 = vmatpush.bf16.msra.mxu3 %v6543_v22 }
 0x8e8   : > { %3555 = vmatpush.bf16.msra.mxu0 %v6551_v61  ;;  %3568 = vmatpush.bf16.msrb.mxu1 %v6553_v63 }
 0x8e9   : > { %3581 = vmatpush.bf16.msra.mxu2 %v6619_v13  ;;  %3594 = vmatpush.bf16.msra.mxu3 %v6581_v8 }
 0x8ec   : > { %3556 = vmatpush.bf16.msra.mxu0 %v6605_v37  ;;  %3569 = vmatpush.bf16.msrb.mxu1 %v6617_v2 }
 0x8ed   : > { %3582 = vmatpush.bf16.msra.mxu2 %v6646_v23  ;;  %3595 = vmatpush.bf16.msra.mxu3 %v6634_v25 }
 0x94b   : > { %v3306_v38 = vpop.f32.mrf.mxu0  ;;  %v3319_v10 = vpop.f32.mrf.mxu1 }
 0x94c   : > { %v3349_v54 = vadd.f32 %v3306_v38, %v3292_v47  ;;  %v3350_v57 = vadd.f32 %v3319_v10, %v3293_v11 }
 0x94e   : > { %v4576_v30 = vmul.f32 -1.442695, %v3349_v54  ;;  %v4577_v18 = vmul.f32 -1.442695, %v3350_v57 }
 0x950   : > { %4948 = vpow2.f32 %v4576_v30 }
 0x951   : > { %4950 = vpow2.f32 %v4577_v18 }
 0x952   : > { %v3332_v48 = vpop.f32.mrf.mxu2  ;;  %v3345_v60 = vpop.f32.mrf.mxu3 }
 0x953   : > { %v3352_v34 = vadd.f32 %v3345_v60, %v3295_v46  ;;  %v3308_v1 = vpop.f32.mrf.mxu0  ;;  %v3321_v15 = vpop.f32.mrf.mxu1  ;;  %v3351_v6 = vadd.f32 %v3332_v48, %v3294_v52 }
 0x955   : > { %v4578_v36 = vmul.f32 -1.442695, %v3352_v34 }
 0x956   : > { %v4949_v26 = vpop.eup %4948 }
 0x957   : > { %v4951_v42 = vpop.eup %4950  ;;  %v3356_v53 = vadd.f32 1.0, %v4949_v26  ;;  %4952 = vpow2.f32 %v4578_v36 }
 0x958   : > { %v3375_v29 = vadd.f32 1.0, %v4951_v42 }
 0x959   : > { %4954 = vrcp.f32 %v3356_v53  ;;  %v3368_v11 = vand.u32 2147483648, %v3356_v53  ;;  %v3366_v54 = vand.u32 2147483647, %v3356_v53  ;;  %vm3362_vm3 = vweird.f32 %v3356_v53 }
 0x95a   : > { %4956 = vrcp.f32 %v3375_v29  ;;  %v3334_v21 = vpop.f32.mrf.mxu2  ;;  %v3347_v41 = vpop.f32.mrf.mxu3  ;;  %v3387_v38 = vand.u32 2147483648, %v3375_v29  ;;  %v3385_v30 = vand.u32 2147483647, %v3375_v29  ;;  %vm3381_vm4 = vweird.f32 %v3375_v29 }
 0x95b   : > { %v3369_v46 = vor.u32 1.1754944e-38, %v3368_v11  ;;  %vm3367_vm7 = vcmp.eq.f32.partialorder %v3366_v54, 8.507059e+37 }
 0x95c   : > { %v3388_v34 = vor.u32 1.1754944e-38, %v3387_v38  ;;  %vm3386_vm8 = vcmp.eq.f32.partialorder %v3385_v30, 8.507059e+37 }
 0x95d   : > { %v4953_v32 = vpop.eup %4952 }
 0x95e   : > { %v3395_v35 = vadd.f32 1.0, %v4953_v32 }
 0x95f   : > { %v4955_v44 = vpop.eup %4954 }
 0x960   : > { %v4957_v17 = vpop.eup %4956  ;;  %v3358_v4 = vmul.f32 %v4955_v44, %v3356_v53  ;;  %4958 = vrcp.f32 %v3395_v35  ;;  %vm3363_vm1 = vweird.f32 %v4955_v44  ;;  %vm3401_vm10 = vweird.f32 %v3395_v35 }
 0x961   : > { %v3377_v19 = vmul.f32 %v4957_v17, %v3375_v29  ;;  %4960 = vtanh.f32 %v3351_v6  ;;  %vm3382_vm2 = vweird.f32 %v4957_v17  ;;  %vm3364_vm5 = vmor %vm3362_vm3, %vm3363_vm1  ;;  %v3407_v6 = vand.u32 2147483648, %v3395_v35 }
 0x962   : > { %v3359_v3 = vsub.f32 1.0, %v3358_v4  ;;  %vm3383_vm6 = vmor %vm3381_vm4, %vm3382_vm2 }
 0x963   : > { %v3378_v47 = vsub.f32 1.0, %v3377_v19  ;;  %v3408_v19 = vor.u32 1.1754944e-38, %v3407_v6 }
 0x964   : > { %v3360_v10 = vmul.f32 %v4955_v44, %v3359_v3 }
 0x965   : > { %v3379_v57 = vmul.f32 %v4957_v17, %v3378_v47 }
 0x966   : > { %v4959_v18 = vpop.eup %4958  ;;  %v3361_v56 = vadd.f32 %v4955_v44, %v3360_v10 }
 0x967   : > { %v3380_v48 = vadd.f32 %v4957_v17, %v3379_v57  ;;  %v3397_v60 = vmul.f32 %v4959_v18, %v3395_v35  ;;  %v4961_v15 = vpop.eup %4960  ;;  %vm3402_vm9 = vweird.f32 %v4959_v18 }
 0x968   : > { %v3365_v1 = vsel %vm3364_vm5, %v4955_v44, %v3361_v56  ;;  %v3405_v44 = vand.u32 2147483647, %v3395_v35  ;;  %vm3403_vm11 = vmor %vm3401_vm10, %vm3402_vm9 }
 0x969   : > { %v3370_v36 = vsel %vm3367_vm7, %v3369_v46, %v3365_v1  ;;  %v3384_v26 = vsel %vm3383_vm6, %v4957_v17, %v3380_v48  ;;  %v3398_v42 = vsub.f32 1.0, %v3397_v60 }
 0x96a   : > { %v3389_v21 = vsel %vm3386_vm8, %v3388_v34, %v3384_v26  ;;  %v3412_v41 = vmul.f32 %v4961_v15, %v3370_v36  ;;  %vm3406_vm12 = vcmp.eq.f32.partialorder %v3405_v44, 8.507059e+37 }
 0x96b   : > { %v3411_v32 = vmul.f32 %v3389_v21, %v6890_v39  ;;  %v3399_v52 = vmul.f32 %v4959_v18, %v3398_v42 }
 0x96d   : > { %v6930_v53 = vadd.f32 %v3412_v41, %v3411_v32  ;;  %v3400_v29 = vadd.f32 %v4959_v18, %v3399_v52 }
 0x96f   : > { %4962 = vtanh.f32 %v6930_v53  ;;  %v3404_v4 = vsel %vm3403_vm11, %v4959_v18, %v3400_v29 }
 0x970   : > { %v3409_v3 = vsel %vm3406_vm12, %v3408_v19, %v3404_v4 }
 0x975   : > { %v4963_v17 = vpop.eup %4962 }
 0x976   : > { %v3415_v47 = vmul.f32 %v4963_v17, %v3409_v3 }
 0x978   : > { %v3422_v11 = vpack.c.bf16 %v3415_v47, %v3415_v47 }
 0x97a   : > { %3431 = vmatmul.bf16.vlgmr.msrb.gmra.mxu0 %v3422_v11  ;;  %3444 = vmatmul.bf16.vlgmr.msra.gmra.mxu1 %v3422_v11 }
 0x97b   : > { %3457 = vmatmul.bf16.vlgmr.msrb.gmra.mxu2 %v3422_v11  ;;  %3470 = vmatmul.bf16.vlgmr.msrb.gmra.mxu3 %v3422_v11 }
 0x97c   : > { %3675 = vmatpush.bf16.msrb.mxu0 %v6256_v55  ;;  %3688 = vmatpush.bf16.msra.mxu1 %v6267_v0  ;;  %v7234_v55 = vld [vmem:[#allocation20_spill] sm:$0xff]  ;;  %v7235_v0 = vld [vmem:[#allocation22_spill] sm:$0xff] }
 0x97d   : > { %3701 = vmatpush.bf16.msrb.mxu2 %v6281_v40  ;;  %3714 = vmatpush.bf16.msrb.mxu3 %v6269_v9  ;;  %v2496_v9 = vadd.f32 %v7235_v0, %v7234_v55  ;;  %v7236_v40 = vld [vmem:[#allocation18_spill] sm:$0xff] }
 0x980   : > { %3676 = vmatpush.bf16.msrb.mxu0 %v6296_v5  ;;  %3689 = vmatpush.bf16.msra.mxu1 %v6307_v12  ;;  %v7237_v5 = vld [vmem:[#allocation24_spill] sm:$0xff] }
 0x981   : > { %3702 = vmatpush.bf16.msrb.mxu2 %v6345_v33  ;;  %3715 = vmatpush.bf16.msrb.mxu3 %v6337_v7  ;;  %v2525_v12 = vadd.f32 %v7237_v5, %v7236_v40  ;;  %v7238_v33 = vld [vmem:[#allocation19_spill] sm:$0xff] }
 0x983   : > { %v2600_v7 = vpack.c.bf16 %v2525_v12, %v2496_v9 }
 0x984   : > { %3677 = vmatpush.bf16.msrb.mxu0 %v6357_v24  ;;  %3690 = vmatpush.bf16.msra.mxu1 %v6359_v16  ;;  %v7239_v24 = vld [vmem:[#allocation25_spill] sm:$0xff] }
 0x985   : > { %3703 = vmatpush.bf16.msrb.mxu2 %v6432_v62  ;;  %3716 = vmatpush.bf16.msrb.mxu3 %v6374_v14  ;;  %v2554_v16 = vadd.f32 %v7239_v24, %v7238_v33  ;;  %v7240_v14 = vld [vmem:[#allocation23_spill] sm:$0xff]  ;;  %v3419_v62 = vunpack.c.h.bf16 %v2600_v7 }
 0x988   : > { %3678 = vmatpush.bf16.msrb.mxu0 %v6386_v28  ;;  %3691 = vmatpush.bf16.msra.mxu1 %v6388_v50  ;;  %v7241_v28 = vld [vmem:[#allocation26_spill] sm:$0xff] }
 0x989   : > { %3704 = vmatpush.bf16.msrb.mxu2 %v6475_v43  ;;  %3717 = vmatpush.bf16.msrb.mxu3 %v6430_v58  ;;  %v2583_v50 = vadd.f32 %v7241_v28, %v7240_v14  ;;  %v3418_v58 = vunpack.c.l.bf16 %v2600_v7 }
 0x98c   : > { %3679 = vmatpush.bf16.msrb.mxu0 %v6450_v45  ;;  %3692 = vmatpush.bf16.msra.mxu1 %v6471_v49 }
 0x98d   : > { %3705 = vmatpush.bf16.msrb.mxu2 %v6529_v51  ;;  %3718 = vmatpush.bf16.msrb.mxu3 %v6473_v20 }
 0x990   : > { %3680 = vmatpush.bf16.msrb.mxu0 %v6506_v31  ;;  %3693 = vmatpush.bf16.msra.mxu1 %v6527_v27  ;;  %v2601_v31 = vpack.c.bf16 %v2583_v50, %v2554_v16 }
 0x991   : > { %3706 = vmatpush.bf16.msrb.mxu2 %v6570_v59  ;;  %3719 = vmatpush.bf16.msrb.mxu3 %v6543_v22 }
 0x992   : > { %v3421_v22 = vunpack.c.h.bf16 %v2601_v31  ;;  %v3420_v54 = vunpack.c.l.bf16 %v2601_v31 }
 0x994   : > { %3681 = vmatpush.bf16.msrb.mxu0 %v6551_v61  ;;  %3694 = vmatpush.bf16.msra.mxu1 %v6553_v63 }
 0x995   : > { %3707 = vmatpush.bf16.msrb.mxu2 %v6619_v13  ;;  %3720 = vmatpush.bf16.msrb.mxu3 %v6581_v8 }
 0x998   : > { %3682 = vmatpush.bf16.msrb.mxu0 %v6605_v37  ;;  %3695 = vmatpush.bf16.msra.mxu1 %v6617_v2 }
 0x999   : > { %3708 = vmatpush.bf16.msrb.mxu2 %v6646_v23  ;;  %3721 = vmatpush.bf16.msrb.mxu3 %v6634_v25 }
 0x9f7   : > { %v3432_v45 = vpop.f32.mrf.mxu0  ;;  %v3445_v49 = vpop.f32.mrf.mxu1 }
 0x9f8   : > { %v3475_v20 = vadd.f32 %v3432_v45, %v3418_v58  ;;  %v3476_v43 = vadd.f32 %v3445_v49, %v3419_v62 }
 0x9fa   : > { %v4579_v27 = vmul.f32 -1.442695, %v3475_v20  ;;  %v4580_v51 = vmul.f32 -1.442695, %v3476_v43 }
 0x9fc   : > { %4964 = vpow2.f32 %v4579_v27 }
 0x9fd   : > { %4966 = vpow2.f32 %v4580_v51  ;;  %v7243_v51 = vld [vmem:[#allocation28_spill] sm:$0xff] }
 0x9fe   : > { %v3458_v61 = vpop.f32.mrf.mxu2  ;;  %v3471_v63 = vpop.f32.mrf.mxu3 }
 0x9ff   : > { %v3478_v59 = vadd.f32 %v3471_v63, %v3421_v22  ;;  %v3434_v8 = vpop.f32.mrf.mxu0  ;;  %v3447_v37 = vpop.f32.mrf.mxu1  ;;  %v3477_v18 = vadd.f32 %v3458_v61, %v3420_v54  ;;  %v3547_v22 = vunpack.c.h.bf16 %v7243_v51  ;;  %v3546_v54 = vunpack.c.l.bf16 %v7243_v51  ;;  %v3840_v51 = vld [vmem:[%s7139_s11 + $0x58] sm:$0xff] }
 0xa01   : > { %v4581_v2 = vmul.f32 -1.442695, %v3478_v59 }
 0xa02   : > { %v4965_v13 = vpop.eup %4964 }
 0xa03   : > { %v4967_v25 = vpop.eup %4966  ;;  %v3482_v23 = vadd.f32 1.0, %v4965_v13  ;;  %4968 = vpow2.f32 %v4581_v2 }
 0xa04   : > { %v3501_v39 = vadd.f32 1.0, %v4967_v25 }
 0xa05   : > { %4970 = vrcp.f32 %v3482_v23  ;;  %v3494_v1 = vand.u32 2147483648, %v3482_v23  ;;  %v3492_v26 = vand.u32 2147483647, %v3482_v23  ;;  %vm3488_vm15 = vweird.f32 %v3482_v23 }
 0xa06   : > { %4972 = vrcp.f32 %v3501_v39  ;;  %v3460_v35 = vpop.f32.mrf.mxu2  ;;  %v3473_v38 = vpop.f32.mrf.mxu3  ;;  %v3513_v15 = vand.u32 2147483648, %v3501_v39  ;;  %v3511_v21 = vand.u32 2147483647, %v3501_v39  ;;  %vm3507_vm0 = vweird.f32 %v3501_v39 }
 0xa07   : > { %v3495_v52 = vor.u32 1.1754944e-38, %v3494_v1  ;;  %vm3493_vm3 = vcmp.eq.f32.partialorder %v3492_v26, 8.507059e+37 }
 0xa08   : > { %v3514_v44 = vor.u32 1.1754944e-38, %v3513_v15  ;;  %vm3512_vm4 = vcmp.eq.f32.partialorder %v3511_v21, 8.507059e+37 }
 0xa09   : > { %v4969_v10 = vpop.eup %4968 }
 0xa0a   : > { %v3521_v57 = vadd.f32 1.0, %v4969_v10 }
 0xa0b   : > { %v4971_v30 = vpop.eup %4970 }
 0xa0c   : > { %v4973_v56 = vpop.eup %4972  ;;  %v3484_v46 = vmul.f32 %v4971_v30, %v3482_v23  ;;  %4974 = vrcp.f32 %v3521_v57  ;;  %vm3489_vm13 = vweird.f32 %v4971_v30  ;;  %v3533_v12 = vand.u32 2147483648, %v3521_v57 }
 0xa0d   : > { %v3503_v48 = vmul.f32 %v4973_v56, %v3501_v39  ;;  %4976 = vtanh.f32 %v3477_v18  ;;  %vm3508_vm14 = vweird.f32 %v4973_v56  ;;  %vm3490_vm1 = vmor %vm3488_vm15, %vm3489_vm13  ;;  %vm3527_vm6 = vweird.f32 %v3521_v57 }
 0xa0e   : > { %v3485_v60 = vsub.f32 1.0, %v3484_v46  ;;  %vm3509_vm2 = vmor %vm3507_vm0, %vm3508_vm14  ;;  %v3531_v7 = vand.u32 2147483647, %v3521_v57  ;;  %v3534_v24 = vor.u32 1.1754944e-38, %v3533_v12 }
 0xa0f   : > { %v3504_v34 = vsub.f32 1.0, %v3503_v48 }
 0xa10   : > { %v3486_v36 = vmul.f32 %v4971_v30, %v3485_v60  ;;  %vm3532_vm8 = vcmp.eq.f32.partialorder %v3531_v7, 8.507059e+37 }
 0xa11   : > { %v3505_v42 = vmul.f32 %v4973_v56, %v3504_v34 }
 0xa12   : > { %v4975_v41 = vpop.eup %4974  ;;  %v3487_v32 = vadd.f32 %v4971_v30, %v3486_v36 }
 0xa13   : > { %v3506_v29 = vadd.f32 %v4973_v56, %v3505_v42  ;;  %v3523_v6 = vmul.f32 %v4975_v41, %v3521_v57  ;;  %v4977_v19 = vpop.eup %4976  ;;  %vm3528_vm5 = vweird.f32 %v4975_v41 }
 0xa14   : > { %v3491_v4 = vsel %vm3490_vm1, %v4971_v30, %v3487_v32  ;;  %vm3529_vm7 = vmor %vm3527_vm6, %vm3528_vm5 }
 0xa15   : > { %v3496_v17 = vsel %vm3493_vm3, %v3495_v52, %v3491_v4  ;;  %v3510_v3 = vsel %vm3509_vm2, %v4973_v56, %v3506_v29  ;;  %v3524_v47 = vsub.f32 1.0, %v3523_v6 }
 0xa16   : > { %v3515_v11 = vsel %vm3512_vm4, %v3514_v44, %v3510_v3  ;;  %v3538_v55 = vmul.f32 %v4977_v19, %v3496_v17 }
 0xa17   : > { %v3537_v0 = vmul.f32 %v3515_v11, %v6930_v53  ;;  %v3525_v9 = vmul.f32 %v4975_v41, %v3524_v47  ;;  %v7242_v53 = vld [vmem:[#allocation27_spill] sm:$0xff] }
 0xa18   : > { %v3544_v58 = vunpack.c.l.bf16 %v7242_v53  ;;  %v3545_v62 = vunpack.c.h.bf16 %v7242_v53 }
 0xa19   : > { %v6974_v40 = vadd.f32 %v3538_v55, %v3537_v0  ;;  %v3526_v5 = vadd.f32 %v4975_v41, %v3525_v9 }
 0xa1b   : > { %4978 = vtanh.f32 %v6974_v40  ;;  %v3530_v33 = vsel %vm3529_vm7, %v4975_v41, %v3526_v5 }
 0xa1c   : > { %v3535_v14 = vsel %vm3532_vm8, %v3534_v24, %v3530_v33 }
 0xa21   : > { %v4979_v16 = vpop.eup %4978 }
 0xa22   : > { %v3541_v28 = vmul.f32 %v4979_v16, %v3535_v14 }
 0xa24   : > { %v3548_v50 = vpack.c.bf16 %v3541_v28, %v3541_v28 }
 0xa26   : > { %3557 = vmatmul.bf16.vlgmr.msra.gmra.mxu0 %v3548_v50  ;;  %3570 = vmatmul.bf16.vlgmr.msrb.gmra.mxu1 %v3548_v50 }
 0xa27   : > { %3583 = vmatmul.bf16.vlgmr.msra.gmra.mxu2 %v3548_v50  ;;  %3596 = vmatmul.bf16.vlgmr.msra.gmra.mxu3 %v3548_v50 }
 0xaa3   : > { %v3558_v45 = vpop.f32.mrf.mxu0  ;;  %v3571_v49 = vpop.f32.mrf.mxu1 }
 0xaa4   : > { %v3601_v20 = vadd.f32 %v3558_v45, %v3544_v58  ;;  %v3602_v43 = vadd.f32 %v3571_v49, %v3545_v62  ;;  %v3843_v58 = vld [vmem:[%s7139_s11 + $0x70] sm:$0xff]  ;;  %v3842_v62 = vld [vmem:[%s7139_s11 + $0x68] sm:$0xff]  ;;  %v3841_v45 = vld [vmem:[%s7139_s11 + $0x60] sm:$0xff] }
 0xaa5   : > { %v7244_v49 = vld [vmem:[#allocation29_spill] sm:$0xff] }
 0xaa6   : > { %v4582_v31 = vmul.f32 -1.442695, %v3601_v20  ;;  %v4583_v27 = vmul.f32 -1.442695, %v3602_v43  ;;  %v3670_v20 = vunpack.c.l.bf16 %v7244_v49  ;;  %v3671_v43 = vunpack.c.h.bf16 %v7244_v49 }
 0xaa8   : > { %4980 = vpow2.f32 %v4582_v31 }
 0xaa9   : > { %4982 = vpow2.f32 %v4583_v27 }
 0xaaa   : > { %v3584_v61 = vpop.f32.mrf.mxu2  ;;  %v3597_v63 = vpop.f32.mrf.mxu3 }
 0xaab   : > { %v3604_v59 = vadd.f32 %v3597_v63, %v3547_v22  ;;  %v3560_v8 = vpop.f32.mrf.mxu0  ;;  %v3573_v37 = vpop.f32.mrf.mxu1  ;;  %v3603_v18 = vadd.f32 %v3584_v61, %v3546_v54  ;;  %v3839_v63 = vld [vmem:[%s7139_s11 + $0x50] sm:$0xff] }
 0xaac   : > { %v3803_v37 = vld [vmem:[%s7138_s10] sm:$0x1] }
 0xaad   : > { %v4584_v2 = vmul.f32 -1.442695, %v3604_v59 }
 0xaae   : > { %v4981_v13 = vpop.eup %4980 }
 0xaaf   : > { %v4983_v25 = vpop.eup %4982  ;;  %v3608_v23 = vadd.f32 1.0, %v4981_v13  ;;  %4984 = vpow2.f32 %v4584_v2  ;;  %v3838_v2 = vld [vmem:[%s7139_s11 + $0x48] sm:$0xff]  ;;  %v7245_v13 = vld [vmem:[#allocation30_spill] sm:$0xff] }
 0xab0   : > { %v3627_v39 = vadd.f32 1.0, %v4983_v25  ;;  %v3673_v25 = vunpack.c.h.bf16 %v7245_v13 }
 0xab1   : > { %4986 = vrcp.f32 %v3608_v23  ;;  %v3620_v1 = vand.u32 2147483648, %v3608_v23  ;;  %v3618_v26 = vand.u32 2147483647, %v3608_v23  ;;  %vm3614_vm11 = vweird.f32 %v3608_v23 }
 0xab2   : > { %4988 = vrcp.f32 %v3627_v39  ;;  %v3586_v35 = vpop.f32.mrf.mxu2  ;;  %v3599_v38 = vpop.f32.mrf.mxu3  ;;  %v3639_v15 = vand.u32 2147483648, %v3627_v39  ;;  %v3637_v21 = vand.u32 2147483647, %v3627_v39  ;;  %vm3633_vm12 = vweird.f32 %v3627_v39 }
 0xab3   : > { %v3621_v52 = vor.u32 1.1754944e-38, %v3620_v1  ;;  %vm3619_vm15 = vcmp.eq.f32.partialorder %v3618_v26, 8.507059e+37 }
 0xab4   : > { %v3640_v44 = vor.u32 1.1754944e-38, %v3639_v15  ;;  %vm3638_vm0 = vcmp.eq.f32.partialorder %v3637_v21, 8.507059e+37  ;;  %v3833_v15 = vld [vmem:[%s7139_s11 + $0x20] sm:$0xff] }
 0xab5   : > { %v4985_v10 = vpop.eup %4984 }
 0xab6   : > { %v3647_v57 = vadd.f32 1.0, %v4985_v10 }
 0xab7   : > { %v4987_v30 = vpop.eup %4986 }
 0xab8   : > { %v4989_v56 = vpop.eup %4988  ;;  %v3610_v46 = vmul.f32 %v4987_v30, %v3608_v23  ;;  %4990 = vrcp.f32 %v3647_v57  ;;  %vm3615_vm9 = vweird.f32 %v4987_v30  ;;  %v3659_v7 = vand.u32 2147483648, %v3647_v57  ;;  %v3837_v23 = vld [vmem:[%s7139_s11 + $0x40] sm:$0xff] }
 0xab9   : > { %v3629_v48 = vmul.f32 %v4989_v56, %v3627_v39  ;;  %4992 = vtanh.f32 %v3603_v18  ;;  %vm3634_vm10 = vweird.f32 %v4989_v56  ;;  %vm3616_vm13 = vmor %vm3614_vm11, %vm3615_vm9  ;;  %vm3653_vm2 = vweird.f32 %v3647_v57 }
 0xaba   : > { %v3611_v60 = vsub.f32 1.0, %v3610_v46  ;;  %vm3635_vm14 = vmor %vm3633_vm12, %vm3634_vm10  ;;  %v3657_v33 = vand.u32 2147483647, %v3647_v57  ;;  %v3660_v16 = vor.u32 1.1754944e-38, %v3659_v7  ;;  %v7015_v39 = vadd.f32 1e-05, %v3803_v37 }
 0xabb   : > { %v3630_v34 = vsub.f32 1.0, %v3629_v48 }
 0xabc   : > { %v3612_v36 = vmul.f32 %v4987_v30, %v3611_v60  ;;  %vm3658_vm4 = vcmp.eq.f32.partialorder %v3657_v33, 8.507059e+37 }
 0xabd   : > { %v3631_v42 = vmul.f32 %v4989_v56, %v3630_v34  ;;  %v3834_v34 = vld [vmem:[%s7139_s11 + $0x28] sm:$0xff] }
 0xabe   : > { %v4991_v41 = vpop.eup %4990  ;;  %v3613_v32 = vadd.f32 %v4987_v30, %v3612_v36  ;;  %v3832_v36 = vld [vmem:[%s7139_s11 + $0x18] sm:$0xff] }
 0xabf   : > { %v3632_v29 = vadd.f32 %v4989_v56, %v3631_v42  ;;  %v3649_v6 = vmul.f32 %v4991_v41, %v3647_v57  ;;  %v4993_v19 = vpop.eup %4992  ;;  %vm3654_vm1 = vweird.f32 %v4991_v41 }
 0xac0   : > { %v3617_v4 = vsel %vm3616_vm13, %v4987_v30, %v3613_v32  ;;  %vm3655_vm3 = vmor %vm3653_vm2, %vm3654_vm1  ;;  %v3836_v30 = vld [vmem:[%s7139_s11 + $0x38] sm:$0xff]  ;;  %vm3811_vm13 = vweird.f32 %v7015_v39 }
 0xac1   : > { %v3622_v17 = vsel %vm3619_vm15, %v3621_v52, %v3617_v4  ;;  %v3636_v3 = vsel %vm3635_vm14, %v4989_v56, %v3632_v29  ;;  %v3650_v47 = vsub.f32 1.0, %v3649_v6  ;;  %v3835_v56 = vld [vmem:[%s7139_s11 + $0x30] sm:$0xff]  ;;  %v3672_v52 = vunpack.c.l.bf16 %v7245_v13  ;;  %v3830_v29 = vld [vmem:[%s7139_s11 + $0x8] sm:$0xff] }
 0xac2   : > { %v3641_v11 = vsel %vm3638_vm0, %v3640_v44, %v3636_v3  ;;  %v3664_v55 = vmul.f32 %v4993_v19, %v3622_v17  ;;  %v3829_v17 = vld [vmem:[%s7139_s11] sm:$0xff] }
 0xac3   : > { %v3663_v0 = vmul.f32 %v3641_v11, %v6974_v40  ;;  %v3651_v9 = vmul.f32 %v4991_v41, %v3650_v47  ;;  %v3844_v40 = vld [vmem:[%s7139_s11 + $0x78] sm:$0xff] }
 0xac4   : > { %3849 = vmatpush.msra.mxu0 %v3844_v40 }
 0xac5   : > { %v6982_v5 = vadd.f32 %v3664_v55, %v3663_v0  ;;  %v3652_v12 = vadd.f32 %v4991_v41, %v3651_v9 }
 0xac6   : > { %3850 = vmatpush.msra.mxu0 %v3843_v58 }
 0xac7   : > { %4994 = vtanh.f32 %v6982_v5  ;;  %v3656_v24 = vsel %vm3655_vm3, %v4991_v41, %v3652_v12  ;;  %v3831_v41 = vld [vmem:[%s7139_s11 + $0x10] sm:$0xff] }
 0xac8   : > { %v3661_v28 = vsel %vm3658_vm4, %v3660_v16, %v3656_v24  ;;  %3851 = vmatpush.msra.mxu0 %v3842_v62 }
 0xaca   : > { %3852 = vmatpush.msra.mxu0 %v3841_v45 }
 0xacc   : > { %3853 = vmatpush.msra.mxu0 %v3840_v51 }
 0xacd   : > { %v4995_v14 = vpop.eup %4994 }
 0xace   : > { %v3667_v50 = vmul.f32 %v4995_v14, %v3661_v28  ;;  %3854 = vmatpush.msra.mxu0 %v3839_v63 }
 0xad0   : > { %v3674_v53 = vpack.c.bf16 %v3667_v50, %v3667_v50  ;;  %3855 = vmatpush.msra.mxu0 %v3838_v2 }
 0xad2   : > { %3683 = vmatmul.bf16.vlgmr.msrb.gmra.mxu0 %v3674_v53  ;;  %3696 = vmatmul.bf16.vlgmr.msra.gmra.mxu1 %v3674_v53 }
 0xad3   : > { %3709 = vmatmul.bf16.vlgmr.msrb.gmra.mxu2 %v3674_v53  ;;  %3722 = vmatmul.bf16.vlgmr.msrb.gmra.mxu3 %v3674_v53 }
 0xad4   : > { %3856 = vmatpush.msra.mxu0 %v3837_v23 }
 0xad6   : > { %3857 = vmatpush.msra.mxu0 %v3836_v30 }
 0xad8   : > { %3858 = vmatpush.msra.mxu0 %v3835_v56 }
 0xada   : > { %3859 = vmatpush.msra.mxu0 %v3834_v34 }
 0xadc   : > { %3860 = vmatpush.msra.mxu0 %v3833_v15 }
 0xade   : > { %3861 = vmatpush.msra.mxu0 %v3832_v36 }
 0xae0   : > { %3862 = vmatpush.msra.mxu0 %v3831_v41 }
 0xae2   : > { %3863 = vmatpush.msra.mxu0 %v3830_v29 }
 0xae4   : > { %3864 = vmatpush.msra.mxu0 %v3829_v17 }
 0xb4f   : > { %v3684_v31 = vpop.f32.mrf.mxu0  ;;  %v3697_v27 = vpop.f32.mrf.mxu1 }
 0xb50   : > { %v3727_v22 = vadd.f32 %v3684_v31, %v3670_v20  ;;  %v3728_v61 = vadd.f32 %v3697_v27, %v3671_v43 }
 0xb52   : > { %v4585_v59 = vmul.f32 -1.442695, %v3727_v22  ;;  %v4586_v8 = vmul.f32 -1.442695, %v3728_v61 }
 0xb54   : > { %4996 = vpow2.f32 %v4585_v59 }
 0xb55   : > { %4998 = vpow2.f32 %v4586_v8 }
 0xb56   : > { %v3710_v35 = vpop.f32.mrf.mxu2  ;;  %v3723_v38 = vpop.f32.mrf.mxu3  ;;  %5000 = vrsqrt.f32 %v7015_v39 }
 0xb57   : > { %v3730_v10 = vadd.f32 %v3723_v38, %v3673_v25  ;;  %v3686_v54 = vpop.f32.mrf.mxu0  ;;  %v3699_v57 = vpop.f32.mrf.mxu1  ;;  %v3729_v19 = vadd.f32 %v3710_v35, %v3672_v52  ;;  %v4752_v35 = vld [vmem:[%s7246_s9] ss:$0 sm:$0xff] }
 0xb59   : > { %v4587_v18 = vmul.f32 -1.442695, %v3730_v10 }
 0xb5a   : > { %v4997_v46 = vpop.eup %4996 }
 0xb5b   : > { %v4999_v48 = vpop.eup %4998  ;;  %v3734_v60 = vadd.f32 1.0, %v4997_v46  ;;  %5002 = vpow2.f32 %v4587_v18  ;;  %v4753_v18 = vld [vmem:[%s7247_s7] ss:$0 sm:$0xff] }
 0xb5c   : > { %v3753_v1 = vadd.f32 1.0, %v4999_v48  ;;  %v7033_v21 = vpop.eup %5000  ;;  %v4754_v46 = vld [vmem:[%s7248_s8] ss:$0 sm:$0xff] }
 0xb5d   : > { %5004 = vrcp.f32 %v3734_v60  ;;  %v3806_v44 = vmul.f32 %v7033_v21, %v7015_v39  ;;  %v3746_v12 = vand.u32 2147483648, %v3734_v60  ;;  %v3744_v24 = vand.u32 2147483647, %v3734_v60 }
 0xb5e   : > { %5006 = vrcp.f32 %v3753_v1  ;;  %v3712_v26 = vpop.f32.mrf.mxu2  ;;  %v3725_v42 = vpop.f32.mrf.mxu3  ;;  %v3765_v7 = vand.u32 2147483648, %v3753_v1  ;;  %v3763_v14 = vand.u32 2147483647, %v3753_v1  ;;  %vm3740_vm7 = vweird.f32 %v3734_v60 }
 0xb5f   : > { %v3807_v0 = vmul.f32 %v7033_v21, %v3806_v44  ;;  %vm3759_vm8 = vweird.f32 %v3753_v1  ;;  %v3747_v40 = vor.u32 1.1754944e-38, %v3746_v12  ;;  %vm3745_vm11 = vcmp.eq.f32.partialorder %v3744_v24, 8.507059e+37 }
 0xb60   : > { %v3766_v45 = vor.u32 1.1754944e-38, %v3765_v7  ;;  %vm3764_vm12 = vcmp.eq.f32.partialorder %v3763_v14, 8.507059e+37  ;;  %vm3812_vm14 = vweird.f32 %v7033_v21 }
 0xb61   : > { %v5003_v32 = vpop.eup %5002  ;;  %v3808_v53 = vmul.f32 0.5, %v3807_v0  ;;  %vm3813_vm1 = vmor %vm3811_vm13, %vm3812_vm14 }
 0xb62   : > { %v7042_v6 = vadd.f32 1.0, %v5003_v32 }
 0xb63   : > { %v5005_v4 = vpop.eup %5004  ;;  %v3809_v59 = vsub.f32 1.5, %v3808_v53 }
 0xb64   : > { %v5007_v3 = vpop.eup %5006  ;;  %v3736_v47 = vmul.f32 %v5005_v4, %v3734_v60  ;;  %5008 = vrcp.f32 %v7042_v6  ;;  %vm3741_vm5 = vweird.f32 %v5005_v4  ;;  %v3785_v2 = vand.u32 2147483648, %v7042_v6 }
 0xb65   : > { %v3755_v11 = vmul.f32 %v5007_v3, %v3753_v1  ;;  %5010 = vtanh.f32 %v3729_v19  ;;  %vm3760_vm6 = vweird.f32 %v5007_v3  ;;  %vm3742_vm9 = vmor %vm3740_vm7, %vm3741_vm5  ;;  %v3810_v13 = vmul.f32 %v7033_v21, %v3809_v59 }
 0xb66   : > { %v3737_v55 = vsub.f32 1.0, %v3736_v47  ;;  %vm3761_vm10 = vmor %vm3759_vm8, %vm3760_vm6  ;;  %vm3779_vm0 = vweird.f32 %v7042_v6  ;;  %v3786_v23 = vor.u32 1.1754944e-38, %v3785_v2 }
 0xb67   : > { %v3756_v9 = vsub.f32 1.0, %v3755_v11  ;;  %v3814_v39 = vsel %vm3813_vm1, %v7033_v21, %v3810_v13 }
 0xb68   : > { %v3738_v33 = vmul.f32 %v5005_v4, %v3737_v55  ;;  %v3816_v57 = vperm.slane %v3814_v39, 0 }
 0xb69   : > { %v3757_v16 = vmul.f32 %v5007_v3, %v3756_v9 }
 0xb6a   : > { %v5009_v28 = vpop.eup %5008  ;;  %v3739_v50 = vadd.f32 %v5005_v4, %v3738_v33 }
 0xb6b   : > { %v3758_v58 = vadd.f32 %v5007_v3, %v3757_v16  ;;  %v3775_v62 = vmul.f32 %v5009_v28, %v7042_v6  ;;  %v5011_v20 = vpop.eup %5010  ;;  %vm3780_vm15 = vweird.f32 %v5009_v28 }
 0xb6c   : > { %v3743_v49 = vsel %vm3742_vm9, %v5005_v4, %v3739_v50  ;;  %vm3781_vm2 = vmor %vm3779_vm0, %vm3780_vm15 }
 0xb6d   : > { %v3748_v43 = vsel %vm3745_vm11, %v3747_v40, %v3743_v49  ;;  %v3762_v31 = vsel %vm3761_vm10, %v5007_v3, %v3758_v58  ;;  %v3776_v27 = vsub.f32 1.0, %v3775_v62 }
 0xb6e   : > { %v3767_v51 = vsel %vm3764_vm12, %v3766_v45, %v3762_v31  ;;  %v3790_v22 = vmul.f32 %v5011_v20, %v3748_v43 }
 0xb6f   : > { %v3789_v61 = vmul.f32 %v3767_v51, %v6982_v5  ;;  %v3777_v63 = vmul.f32 %v5009_v28, %v3776_v27  ;;  %v3783_v5 = vand.u32 2147483647, %v7042_v6 }
 0xb71   : > { %v3791_v8 = vadd.f32 %v3790_v22, %v3789_v61  ;;  %v3778_v37 = vadd.f32 %v5009_v28, %v3777_v63  ;;  %vm3784_vm3 = vcmp.eq.f32.partialorder %v3783_v5, 8.507059e+37 }
 0xb73   : > { %5012 = vtanh.f32 %v3791_v8  ;;  %4589 = vst [vmem:[%s6600_s17 + $0x8] sm:$0xff] %v3791_v8  ;;  %v3782_v25 = vsel %vm3781_vm2, %v5009_v28, %v3778_v37 }
 0xb74   : > { %v3787_v10 = vsel %vm3784_vm3, %v3786_v23, %v3782_v25 }
 0xb79   : > { %v5013_v38 = vpop.eup %5012 }
 0xb7a   : > { %v3793_v54 = vmul.f32 %v5013_v38, %v3787_v10 }
 0xb7c   : > { %4588 = vst [vmem:[%s6657_s0 + $0x8] sm:$0xff] %v3793_v54  ;;  %v3802_v30 = vsub.f32 %v3793_v54, %v4752_v35 }
 0xb7e   : > { %v3818_v56 = vmul.f32 %v3816_v57, %v3802_v30 }
 0xb80   : > { %v3823_v48 = vmul.f32 %v4753_v18, %v3818_v56 }
 0xb82   : > { %v3828_v60 = vadd.f32 %v4754_v46, %v3823_v48 }
 0xb84   : > { %3865 = vmatmul.f32.vlgmr.msra.gmra.mxu0 %v3828_v60 }
 0xb85   : > { %5041 = shalt.err (!%p5038_p5)
}
 0xb86   : > { %s5110_s0 = smov 128   ;;  %s5111_s18 = smov 256  }
 0xb87   : > { %s5112_s30 = smov 8   ;;  %s7249_s1 = sld [smem:[#allocation43_spill]] }
 0xb88   : > { %4705 = dma.vmem_to_hbm [thread:$0]  (%p5246_p6), %s3895_s15, 256, %s3897_s2, %s3875_s12, %s5110_s0, %s5111_s18, %s5112_s30  }
 0xb89   : > { %s3910_s8 = sshll.u32 %s6600_s17, 4  ;;  %s3880_s3 = scalar_lea.sflag [#allocation11], %s5299_s24  ;;  %s3911_s8 = int_to_ptr.vmem [resolvable:$true] %s3910_s8 }
 0xb8d   : > { %s3909_s7 = scalar_lea.hbm %s7249_s1, %s4592_s29  ;;  %s5062_s2 = scalar_lea.hbm %s7249_s1, 32 }
 0xb8e   : > { %s3912_s5 = sshll.u32 %s3909_s7, 4  ;;  %s3913_s5 = int_to_ptr.hbm [resolvable:$true] %s3912_s5 }
 0xb8f   : > { %s5056_s4 = sshra.s32 %s3913_s5, 4  ;;  %s5057_s4 = int_to_ptr.hbm [resolvable:$true] %s5056_s4 }
 0xb90   : > { %s5058_s6 = scalar_lea.hbm %s5057_s4, 16  ;;  %p5063_p12 = scmp.lt.s32.totalorder %s5057_s4, %s7249_s1 }
 0xb91   : > { %p5059_p7 = scmp.ne.s32.totalorder %s5057_s4, %s5058_s6  ;;  %p5064_p13 = scmp.lt.s32.totalorder %s5062_s2, %s5058_s6 }
 0xb93   : > { %p5060_p10 = pnand %p5059_p7, %p5246_p6  ;;  %p5065_p0 = por %p5064_p13, %p5063_p12 }
 0xb95   : > { %p5061_p11 = pneg %p5060_p10 }
 0xb97   : > { %p5066_p1 = pnand %p5065_p0, %p5061_p11 }
 0xb99   : > { %5069 = shalt.err (!%p5066_p1)
}
 0xb9a   : > { %4706 = dma.vmem_to_hbm [thread:$0]  (%p5246_p6), %s3911_s8, 256, %s3913_s5, %s3880_s3, %s5110_s0, %s5111_s18, %s5112_s30  }
 0xb9b   : > { %p753_p2 = scmp.lt.s32.totalorder %s5224_s28, 1  ;;  %s7250_s9 = sld [smem:[#allocation41_spill]] }
 0xb9c   : > { %s7251_s22 = sld [smem:[#allocation42_spill]] }
 0xb9d   : > { %s7260_s28 = smov (!%p753_p2, %s5224_s28), 1 }
 0xb9e   : > { %s4089_s7 = sshll.u32 %s7260_s28, 3 }
 0xba1   : > { %v4755_v34 = vld [vmem:[%s7250_s9] ss:$0 sm:$0xff] }
 0xba2   : > { %s756_s4 = scalar_lea.vmem %s7251_s22, %s4089_s7 }
 0xc01   : > { %v3866_v1 = vpop.f32.mrf.mxu0 }
 0xc02   : > { %v3867_v15 = vadd.f32 %v4755_v34, %v3866_v1 }
 0xc04   : > { %3869 = vst [vmem:[%s756_s4] sm:$0xff] %v3867_v15 }
 0xc05 PF: > { %s7252_s6 = sld [smem:[#allocation14_spill]]  ;;  %p4710_p6 = pnand %p4076_p9, %p5250_p8 }
 0xc07   : > { %p4711_p3 = pneg %p4710_p6 }
 0xc0b   : > { %s3934_s19 = sand.u32 1, %s7252_s6  }
 0xc0c   : > { %s3935_s8 = scalar_lea.sflag [#allocation9], %s3934_s19 }
 0xc0d   : > { %5087 = dma.done.wait (%p4711_p3), %s3935_s8, 256  }
 0xc0e   : > { %5089 = vsyncadd (%p4711_p3), %s3935_s8, 4294967040  ;;  %s3945_s28 = scalar_lea.sflag [#allocation11], %s3934_s19 }
 0xc0f   : > { %5091 = dma.done.wait (%p4711_p3), %s3945_s28, 256  }
 0xc10   : > { %5093 = vsyncadd (%p4711_p3), %s3945_s28, 4294967040  ;;  %s7254_s27 = sld [smem:[#allocation15_spill]]  ;;  %s7256_s24 = smov %s5100_s25 }
 0xc11   : > { %s7255_s0 = sld [smem:[#allocation16_spill]]  ;;  %s7257_s25 = smov %s5104_s26 }
 0xc16   : > { %p31_p4 = scmp.ge.s32.totalorder %s7254_s27, 4  }
 0xc17   : > { %s7258_s26 = smov %s7255_s0 }
 0xc18   :  { %33 = sbr.rel (!%p31_p4) target bundleno = 19 (0x13), region = 300 }
 0xc1d   :  { %3951 = vsyncpa [#allocation9], 1 }
 0xc1e   :  { %3953 = vsyncpa [#allocation9 + $0x1], 1 }
 0xc1f   :  { %3954 = vsyncpa [#allocation11], 1 }
 0xc20   :  { %3956 = vsyncpa [#allocation11 + $0x1], 1 }

</bundles_post_ra>
